<compile_context>
chip_gen: v7x
topology: tpu7x:2x2x1
jax: 0.10.0
libtpu: 0.0.40
codegen_flags: <defaults>
</compile_context>

<pallas_src>
import functools

import jax
import jax.numpy as jnp
from jax.experimental import pallas as pl
from jax.experimental.pallas import tpu as pltpu


_VMEM_LIMIT = 32 * 1024 * 1024


# ---------------------------------------------------------------------------
# Small helpers
# ---------------------------------------------------------------------------
def _round_up(x, k):
    return (x + k - 1) // k * k


def _pad2d(a, rows, cols):
    return jnp.pad(a, ((0, rows - a.shape[0]), (0, cols - a.shape[1])))


def _pad1d(a, n):
    return jnp.pad(a, (0, n - a.shape[0]))


def fold_bn(p, eps=1e-5):
    scale = p["gamma"] / jnp.sqrt(p["var"] + eps)
    bias = p["beta"] - p["mean"] * scale
    return scale, bias


# ---------------------------------------------------------------------------
# Pallas kernels
# ---------------------------------------------------------------------------
def _mm_bias_kernel(relu, x_ref, w_ref, b_ref, o_ref):
    # y = x @ w (bf16 -> f32 acc) + bias [; relu]
    y = jnp.dot(x_ref[...], w_ref[...], preferred_element_type=jnp.float32)
    y = y + b_ref[...]
    if relu:
        y = jnp.maximum(y, 0.0)
    o_ref[...] = y.astype(o_ref.dtype)


def _mm_bias_res_relu_kernel(x_ref, w_ref, b_ref, r_ref, o_ref):
    # y = relu(x @ w + bias + residual)      (identity shortcut)
    y = jnp.dot(x_ref[...], w_ref[...], preferred_element_type=jnp.float32)
    y = y + b_ref[...] + r_ref[...].astype(jnp.float32)
    o_ref[...] = jnp.maximum(y, 0.0).astype(o_ref.dtype)


def _mm2_bias_relu_kernel(x_ref, w_ref, b_ref, r_ref, wr_ref, o_ref):
    # y = relu(x @ w + r @ wr + bias)        (projection shortcut fused in)
    y = jnp.dot(x_ref[...], w_ref[...], preferred_element_type=jnp.float32)
    y = y + jnp.dot(r_ref[...], wr_ref[...], preferred_element_type=jnp.float32)
    y = y + b_ref[...]
    o_ref[...] = jnp.maximum(y, 0.0).astype(o_ref.dtype)


def _conv3_bias_relu_kernel(stride, ho, wo, x_ref, w_ref, b_ref, o_ref):
    # x_ref: (Hp, Wp, Cin)  spatially padded image (batch dim squeezed), bf16
    # w_ref: (9, Cin, tn)   BN-scale-folded weights, bf16 (tap = 3*kh + kw)
    # b_ref: (1, tn)        f32 folded bias
    # o_ref: (Ho*Wo, tn)
    tn = o_ref.shape[-1]
    acc = jnp.zeros((ho * wo, tn), jnp.float32)
    for kh in range(3):
        for kw in range(3):
            if stride == 1:
                xs = x_ref[pl.ds(kh, ho), pl.ds(kw, wo), :]
            else:
                xs = x_ref[pl.ds(kh, ho, stride), pl.ds(kw, wo, stride), :]
            xs = xs.reshape(ho * wo, xs.shape[-1])
            acc = acc + jnp.dot(xs, w_ref[kh * 3 + kw],
                                preferred_element_type=jnp.float32)
    y = acc + b_ref[...]
    o_ref[...] = jnp.maximum(y, 0.0).astype(o_ref.dtype)


# ---------------------------------------------------------------------------
# Pallas wrappers
# ---------------------------------------------------------------------------
def matmul_bias_act(x2d, w2d, bias2, *, relu, residual=None, residual_w=None,
                    out_dtype=jnp.float32):
    """act((x2d @ w2d) + bias [+ residual | + residual @ residual_w])."""
    m, k = x2d.shape
    k2, cout = w2d.shape
    assert k == k2 and k % 128 == 0 and cout % 128 == 0
    if residual is not None:
        assert relu, "fused residual paths always apply ReLU"

    tm = 256 if m >= 256 else _round_up(m, 8)
    mp = _round_up(m, tm)
    tn = 256 if cout % 256 == 0 else 128

    def pad_rows(a):
        return a if mp == m else jnp.pad(a, ((0, mp - m), (0, 0)))

    args = [pad_rows(x2d), w2d, bias2]
    in_specs = [
        pl.BlockSpec((tm, k), lambda i, j: (i, 0)),     # activations tile
        pl.BlockSpec((k, tn), lambda i, j: (0, j)),     # BN-folded weights
        pl.BlockSpec((1, tn), lambda i, j: (0, j)),     # BN-folded bias
    ]
    if residual is None:
        kernel = functools.partial(_mm_bias_kernel, relu)
    elif residual_w is None:
        args.append(pad_rows(residual))
        in_specs.append(pl.BlockSpec((tm, tn), lambda i, j: (i, j)))
        kernel = _mm_bias_res_relu_kernel
    else:
        kr = residual_w.shape[0]
        assert residual.shape[1] == kr and kr % 128 == 0
        args.append(pad_rows(residual))
        args.append(residual_w)
        in_specs.append(pl.BlockSpec((tm, kr), lambda i, j: (i, 0)))
        in_specs.append(pl.BlockSpec((kr, tn), lambda i, j: (0, j)))
        kernel = _mm2_bias_relu_kernel

    out = pl.pallas_call(
        kernel,
        out_shape=jax.ShapeDtypeStruct((mp, cout), out_dtype),
        grid=(mp // tm, cout // tn),
        in_specs=in_specs,
        out_specs=pl.BlockSpec((tm, tn), lambda i, j: (i, j)),
        compiler_params=pltpu.CompilerParams(
            dimension_semantics=("parallel", "parallel"),
            vmem_limit_bytes=_VMEM_LIMIT),
    )(*args)
    return out if mp == m else out[:m]


def conv3x3_bias_relu(x_nhwc, w_taps, bias2, stride, *, out_dtype=jnp.bfloat16):
    """3x3 conv (pad=1, given stride) + folded-BN bias + ReLU, no HBM im2col.

    x_nhwc: (N, H, W, Cin) bf16, Cin padded to 128-multiple.
    w_taps: (9, Cin, Cout) bf16, BN scale folded in.
    bias2:  (1, Cout) f32.
    Returns (N, Ho*Wo, Cout) in out_dtype.
    """
    n, h, w, cin = x_nhwc.shape
    _, cin2, cout = w_taps.shape
    assert cin == cin2 and cin % 128 == 0 and cout % 128 == 0
    ho = (h + 2 - 3) // stride + 1
    wo = (w + 2 - 3) // stride + 1
    xp = jnp.pad(x_nhwc, ((0, 0), (1, 1), (1, 1), (0, 0)))
    hp, wp = h + 2, w + 2
    tn = 256 if cout % 256 == 0 else 128

    kernel = functools.partial(_conv3_bias_relu_kernel, stride, ho, wo)
    return pl.pallas_call(
        kernel,
        out_shape=jax.ShapeDtypeStruct((n, ho * wo, cout), out_dtype),
        grid=(n, cout // tn),
        in_specs=[
            pl.BlockSpec((None, hp, wp, cin), lambda b, j: (b, 0, 0, 0)),
            pl.BlockSpec((9, cin, tn), lambda b, j: (0, 0, j)),
            pl.BlockSpec((1, tn), lambda b, j: (0, j)),
        ],
        out_specs=pl.BlockSpec((None, ho * wo, tn), lambda b, j: (b, 0, j)),
        compiler_params=pltpu.CompilerParams(
            dimension_semantics=("parallel", "parallel"),
            vmem_limit_bytes=_VMEM_LIMIT),
    )(xp, w_taps, bias2)


# ---------------------------------------------------------------------------
# Parameter init (matches PyTorch OIHW conv layout)
# ---------------------------------------------------------------------------
def init_params(key, in_planes, planes, stride):
    exp = 4
    layers = {
        "c1": (planes, in_planes, 1),
        "c2": (planes, planes, 3),
        "c3": (exp * planes, planes, 1),
    }
    if stride != 1 or in_planes != exp * planes:
        layers["sc"] = (exp * planes, in_planes, 1)
    params = {}
    keys = jax.random.split(key, len(layers))
    for kk, (name, (cout, cin, ks)) in zip(keys, layers.items()):
        k1, k2, k3, k4, k5 = jax.random.split(kk, 5)
        fan_in = cin * ks * ks
        params[name] = {
            "w": jax.random.normal(k1, (cout, cin, ks, ks), jnp.float32)
                 / jnp.sqrt(jnp.float32(fan_in)),
            "gamma": 1.0 + 0.1 * jax.random.normal(k2, (cout,), jnp.float32),
            "beta": 0.1 * jax.random.normal(k3, (cout,), jnp.float32),
            "mean": 0.1 * jax.random.normal(k4, (cout,), jnp.float32),
            "var": jnp.abs(jax.random.normal(k5, (cout,), jnp.float32)) + 0.5,
        }
    return params


# ---------------------------------------------------------------------------
# Bottleneck forward (Pallas path)
# ---------------------------------------------------------------------------
def bottleneck_forward(x_nchw, params, in_planes, planes, stride):
    exp = 4
    x = jnp.transpose(x_nchw, (0, 2, 3, 1)).astype(jnp.float32)  # NCHW -> NHWC
    n, h, w, cin = x.shape
    cin_p = _round_up(cin, 128)
    mid_p = _round_up(planes, 128)
    out_c = exp * planes
    out_p = _round_up(out_c, 128)

    # channel-pad + cast once; padded weight rows are zero so results match.
    xc = jnp.pad(x, ((0, 0), (0, 0), (0, 0), (0, cin_p - cin))).astype(jnp.bfloat16)

    # --- stage 1: 1x1 conv + BN + ReLU -------------------------------------
    s1, b1 = fold_bn(params["c1"])
    w1 = params["c1"]["w"][:, :, 0, 0].T * s1[None, :]            # (Cin, planes)
    w1p = _pad2d(w1, cin_p, mid_p).astype(jnp.bfloat16)
    b1p = _pad1d(b1, mid_p).reshape(1, mid_p).astype(jnp.float32)
    o1 = matmul_bias_act(xc.reshape(-1, cin_p), w1p, b1p, relu=True,
                         out_dtype=jnp.bfloat16)
    o1 = o1.reshape(n, h, w, mid_p)

    # --- stage 2: 3x3 conv (stride) + BN + ReLU (in-kernel 9-tap accum) ----
    s2, b2 = fold_bn(params["c2"])
    w2 = jnp.transpose(params["c2"]["w"], (2, 3, 1, 0)) * s2[None, None, None, :]
    w2p = jnp.pad(w2, ((0, 0), (0, 0), (0, mid_p - planes), (0, mid_p - planes)))
    w2p = w2p.reshape(9, mid_p, mid_p).astype(jnp.bfloat16)
    b2p = _pad1d(b2, mid_p).reshape(1, mid_p).astype(jnp.float32)
    o2 = conv3x3_bias_relu(o1, w2p, b2p, stride, out_dtype=jnp.bfloat16)
    ho = (h - 1) // stride + 1
    wo = (w - 1) // stride + 1
    o2 = o2.reshape(-1, mid_p)

    # --- stage 3: 1x1 conv + BN + shortcut + add + ReLU (single kernel) ----
    s3, b3 = fold_bn(params["c3"])
    w3 = params["c3"]["w"][:, :, 0, 0].T * s3[None, :]
    w3p = _pad2d(w3, mid_p, out_p).astype(jnp.bfloat16)
    if "sc" in params:
        ssc, bsc = fold_bn(params["sc"])
        wsc = params["sc"]["w"][:, :, 0, 0].T * ssc[None, :]
        wscp = _pad2d(wsc, cin_p, out_p).astype(jnp.bfloat16)
        bp = _pad1d(b3 + bsc, out_p).reshape(1, out_p).astype(jnp.float32)
        xs = xc[:, ::stride, ::stride, :].reshape(-1, cin_p)
        o3 = matmul_bias_act(o2, w3p, bp, relu=True,
                             residual=xs, residual_w=wscp,
                             out_dtype=jnp.float32)
    else:
        # identity shortcut: stride == 1 and cin_p == out_p
        bp = _pad1d(b3, out_p).reshape(1, out_p).astype(jnp.float32)
        res = xc.reshape(-1, cin_p)
        o3 = matmul_bias_act(o2, w3p, bp, relu=True,
                             residual=res, out_dtype=jnp.float32)

    out = o3.reshape(n, ho, wo, out_p)[..., :out_c]
    return jnp.transpose(out, (0, 3, 1, 2))  # back to NCHW


# ---------------------------------------------------------------------------
# Pure-JAX f32 reference (for correctness check)
# ---------------------------------------------------------------------------
def _conv_bn_ref(x, p, stride, pad, relu, eps=1e-5):
    y = jax.lax.conv_general_dilated(
        x, p["w"], (stride, stride), [(pad, pad), (pad, pad)],
        dimension_numbers=("NCHW", "OIHW", "NCHW"))
    scale = (p["gamma"] / jnp.sqrt(p["var"] + eps))[None, :, None, None]
    bias = (p["beta"] - p["mean"] * p["gamma"] / jnp.sqrt(p["var"] + eps))[None, :, None, None]
    y = y * scale + bias
    return jnp.maximum(y, 0.0) if relu else y


def bottleneck_reference(x, params, in_planes, planes, stride):
    exp = 4
    o = _conv_bn_ref(x, params["c1"], 1, 0, True)
    o = _conv_bn_ref(o, params["c2"], stride, 1, True)
    o = _conv_bn_ref(o, params["c3"], 1, 0, False)
    if stride != 1 or in_planes != exp * planes:
        sc = _conv_bn_ref(x, params["sc"], stride, 0, False)
    else:
        sc = x
    return jnp.maximum(o + sc, 0.0)


if __name__ == "__main__":
    in_planes, planes, stride = 4, 4, 1      # projection shortcut active (4 != 16)
    n, h, w = 2, 16, 16

    key = jax.random.PRNGKey(0)
    kx, kp = jax.random.split(key)
    x = jax.random.normal(kx, (n, in_planes, h, w), jnp.float32)
    params = init_params(kp, in_planes, planes, stride)

    fwd = jax.jit(bottleneck_forward, static_argnums=(2, 3, 4))
    out = jax.block_until_ready(fwd(x, params, in_planes, planes, stride))

    ref = bottleneck_reference(x, params, in_planes, planes, stride)
    assert out.shape == ref.shape, (out.shape, ref.shape)
    err = float(jnp.max(jnp.abs(out - ref)))
    scale = float(jnp.max(jnp.abs(ref))) + 1.0
    # bf16 matmul operands (f32 accumulation) -> loosened tolerance vs pure f32
    assert err / scale < 3e-2, f"relative error too large: {err} (scale {scale})"

    print("KERNEL_OK")
</pallas_src>

<mosaic_0001>
module attributes {stable_mosaic.version = 11 : i64} {
  func.func @_mm_bias_kernel(%arg0: i32, %arg1: i32, %arg2: memref<256x128xbf16, #tpu.memory_space<vmem>>, %arg3: memref<128x128xbf16, #tpu.memory_space<vmem>>, %arg4: memref<1x128xf32, #tpu.memory_space<vmem>>, %arg5: memref<256x128xbf16, #tpu.memory_space<vmem>>) attributes {dimension_semantics = [#tpu.dimension_semantics<parallel>, #tpu.dimension_semantics<parallel>], iteration_bounds = array<i64: 2, 1>, scalar_prefetch = 0 : i64, scratch_operands = 0 : i64, tpu.core_type = #tpu.core_type<tc>, window_params = [{transform_indices = @transform_0, window_bounds = array<i64: 256, 128>}, {transform_indices = @transform_1, window_bounds = array<i64: 128, 128>}, {transform_indices = @transform_2, window_bounds = array<i64: 1, 128>}, {transform_indices = @transform_3, window_bounds = array<i64: 256, 128>}]} {
    %c0 = arith.constant 0 : index
    %c0_0 = arith.constant 0 : index
    %0 = vector.load %arg2[%c0, %c0_0] : memref<256x128xbf16, #tpu.memory_space<vmem>>, vector<256x128xbf16>
    %c0_1 = arith.constant 0 : index
    %c0_2 = arith.constant 0 : index
    %1 = vector.load %arg3[%c0_1, %c0_2] : memref<128x128xbf16, #tpu.memory_space<vmem>>, vector<128x128xbf16>
    %cst = arith.constant dense<0.000000e+00> : vector<256x128xf32>
    %2 = tpu.matmul %0, %1, %cst {dimension_numbers = #tpu.dot_dimension_numbers<[1], [0], [0], [1], [0, 0, 1, 1], [], []>} : vector<256x128xbf16>, vector<128x128xbf16>, vector<256x128xf32> -> vector<256x128xf32>
    %c0_3 = arith.constant 0 : index
    %c0_4 = arith.constant 0 : index
    %3 = vector.load %arg4[%c0_3, %c0_4] : memref<1x128xf32, #tpu.memory_space<vmem>>, vector<1x128xf32>
    %4 = vector.broadcast %3 : vector<1x128xf32> to vector<256x128xf32>
    %5 = arith.addf %2, %4 : vector<256x128xf32>
    %cst_5 = arith.constant 0.000000e+00 : f32
    %6 = vector.broadcast %cst_5 : f32 to vector<256x128xf32>
    %7 = arith.maximumf %5, %6 : vector<256x128xf32>
    %8 = arith.truncf %7 : vector<256x128xf32> to vector<256x128xbf16>
    %c0_6 = arith.constant 0 : index
    %c0_7 = arith.constant 0 : index
    %9 = vector.load %arg5[%c0_6, %c0_7] : memref<256x128xbf16, #tpu.memory_space<vmem>>, vector<256x128xbf16>
    tpu.vector_store %arg5[%c0_6, %c0_7], %8 {strides = array<i32>} : memref<256x128xbf16, #tpu.memory_space<vmem>>, vector<256x128xbf16>,
    return
  }
  func.func @transform_0(%arg0: i32, %arg1: i32) -> (i32, i32) {
    %c0_i32 = arith.constant 0 : i32
    %c0_i32_0 = arith.constant 0 : i32
    return %arg0, %c0_i32 : i32, i32
  }
  func.func @transform_1(%arg0: i32, %arg1: i32) -> (i32, i32) {
    %c0_i32 = arith.constant 0 : i32
    %c0_i32_0 = arith.constant 0 : i32
    return %c0_i32, %arg1 : i32, i32
  }
  func.func @transform_2(%arg0: i32, %arg1: i32) -> (i32, i32) {
    %c0_i32 = arith.constant 0 : i32
    %c0_i32_0 = arith.constant 0 : i32
    return %c0_i32, %arg1 : i32, i32
  }
  func.func @transform_3(%arg0: i32, %arg1: i32) -> (i32, i32) {
    %c0_i32 = arith.constant 0 : i32
    return %arg0, %arg1 : i32, i32
  }
}

module attributes {stable_mosaic.version = 11 : i64} {
  func.func @_conv3_bias_relu_kernel(%arg0: i32, %arg1: i32, %arg2: memref<1x18x18x128xbf16, #tpu.memory_space<vmem>>, %arg3: memref<9x128x128xbf16, #tpu.memory_space<vmem>>, %arg4: memref<1x128xf32, #tpu.memory_space<vmem>>, %arg5: memref<1x256x128xbf16, #tpu.memory_space<vmem>>) attributes {dimension_semantics = [#tpu.dimension_semantics<parallel>, #tpu.dimension_semantics<parallel>], iteration_bounds = array<i64: 2, 1>, scalar_prefetch = 0 : i64, scratch_operands = 0 : i64, tpu.core_type = #tpu.core_type<tc>, window_params = [{transform_indices = @transform_0, window_bounds = array<i64: 1, 18, 18, 128>}, {transform_indices = @transform_1, window_bounds = array<i64: 9, 128, 128>}, {transform_indices = @transform_2, window_bounds = array<i64: 1, 128>}, {transform_indices = @transform_3, window_bounds = array<i64: 1, 256, 128>}]} {
    %cst = arith.constant 0.000000e+00 : f32
    %0 = vector.broadcast %cst : f32 to vector<256x128xf32>
    %c0 = arith.constant 0 : index
    %c0_0 = arith.constant 0 : index
    %c0_1 = arith.constant 0 : index
    %c0_2 = arith.constant 0 : index
    %1 = vector.load %arg2[%c0, %c0_0, %c0_1, %c0_2] : memref<1x18x18x128xbf16, #tpu.memory_space<vmem>>, vector<1x16x16x128xbf16>
    %2 = vector.shape_cast %1 : vector<1x16x16x128xbf16> to vector<16x16x128xbf16>
    %3 = vector.shape_cast %2 : vector<16x16x128xbf16> to vector<256x128xbf16>
    %c0_3 = arith.constant 0 : index
    %c0_4 = arith.constant 0 : index
    %c0_5 = arith.constant 0 : index
    %4 = vector.load %arg3[%c0_3, %c0_4, %c0_5] : memref<9x128x128xbf16, #tpu.memory_space<vmem>>, vector<1x128x128xbf16>
    %5 = vector.shape_cast %4 : vector<1x128x128xbf16> to vector<128x128xbf16>
    %cst_6 = arith.constant dense<0.000000e+00> : vector<256x128xf32>
    %6 = tpu.matmul %3, %5, %cst_6 {dimension_numbers = #tpu.dot_dimension_numbers<[1], [0], [0], [1], [0, 0, 1, 1], [], []>} : vector<256x128xbf16>, vector<128x128xbf16>, vector<256x128xf32> -> vector<256x128xf32>
    %7 = arith.addf %0, %6 : vector<256x128xf32>
    %c0_7 = arith.constant 0 : index
    %c0_8 = arith.constant 0 : index
    %c1 = arith.constant 1 : index
    %c0_9 = arith.constant 0 : index
    %8 = vector.load %arg2[%c0_7, %c0_8, %c1, %c0_9] : memref<1x18x18x128xbf16, #tpu.memory_space<vmem>>, vector<1x16x16x128xbf16>
    %9 = vector.shape_cast %8 : vector<1x16x16x128xbf16> to vector<16x16x128xbf16>
    %10 = vector.shape_cast %9 : vector<16x16x128xbf16> to vector<256x128xbf16>
    %c1_10 = arith.constant 1 : index
    %c0_11 = arith.constant 0 : index
    %c0_12 = arith.constant 0 : index
    %11 = vector.load %arg3[%c1_10, %c0_11, %c0_12] : memref<9x128x128xbf16, #tpu.memory_space<vmem>>, vector<1x128x128xbf16>
    %12 = vector.shape_cast %11 : vector<1x128x128xbf16> to vector<128x128xbf16>
    %cst_13 = arith.constant dense<0.000000e+00> : vector<256x128xf32>
    %13 = tpu.matmul %10, %12, %cst_13 {dimension_numbers = #tpu.dot_dimension_numbers<[1], [0], [0], [1], [0, 0, 1, 1], [], []>} : vector<256x128xbf16>, vector<128x128xbf16>, vector<256x128xf32> -> vector<256x128xf32>
    %14 = arith.addf %7, %13 : vector<256x128xf32>
    %c0_14 = arith.constant 0 : index
    %c0_15 = arith.constant 0 : index
    %c2 = arith.constant 2 : index
    %c0_16 = arith.constant 0 : index
    %15 = vector.load %arg2[%c0_14, %c0_15, %c2, %c0_16] : memref<1x18x18x128xbf16, #tpu.memory_space<vmem>>, vector<1x16x16x128xbf16>
    %16 = vector.shape_cast %15 : vector<1x16x16x128xbf16> to vector<16x16x128xbf16>
    %17 = vector.shape_cast %16 : vector<16x16x128xbf16> to vector<256x128xbf16>
    %c2_17 = arith.constant 2 : index
    %c0_18 = arith.constant 0 : index
    %c0_19 = arith.constant 0 : index
    %18 = vector.load %arg3[%c2_17, %c0_18, %c0_19] : memref<9x128x128xbf16, #tpu.memory_space<vmem>>, vector<1x128x128xbf16>
    %19 = vector.shape_cast %18 : vector<1x128x128xbf16> to vector<128x128xbf16>
    %cst_20 = arith.constant dense<0.000000e+00> : vector<256x128xf32>
    %20 = tpu.matmul %17, %19, %cst_20 {dimension_numbers = #tpu.dot_dimension_numbers<[1], [0], [0], [1], [0, 0, 1, 1], [], []>} : vector<256x128xbf16>, vector<128x128xbf16>, vector<256x128xf32> -> vector<256x128xf32>
    %21 = arith.addf %14, %20 : vector<256x128xf32>
    %c0_21 = arith.constant 0 : index
    %c1_22 = arith.constant 1 : index
    %c0_23 = arith.constant 0 : index
    %c0_24 = arith.constant 0 : index
    %22 = vector.load %arg2[%c0_21, %c1_22, %c0_23, %c0_24] : memref<1x18x18x128xbf16, #tpu.memory_space<vmem>>, vector<1x16x16x128xbf16>
    %23 = vector.shape_cast %22 : vector<1x16x16x128xbf16> to vector<16x16x128xbf16>
    %24 = vector.shape_cast %23 : vector<16x16x128xbf16> to vector<256x128xbf16>
    %c3 = arith.constant 3 : index
    %c0_25 = arith.constant 0 : index
    %c0_26 = arith.constant 0 : index
    %25 = vector.load %arg3[%c3, %c0_25, %c0_26] : memref<9x128x128xbf16, #tpu.memory_space<vmem>>, vector<1x128x128xbf16>
    %26 = vector.shape_cast %25 : vector<1x128x128xbf16> to vector<128x128xbf16>
    %cst_27 = arith.constant dense<0.000000e+00> : vector<256x128xf32>
    %27 = tpu.matmul %24, %26, %cst_27 {dimension_numbers = #tpu.dot_dimension_numbers<[1], [0], [0], [1], [0, 0, 1, 1], [], []>} : vector<256x128xbf16>, vector<128x128xbf16>, vector<256x128xf32> -> vector<256x128xf32>
    %28 = arith.addf %21, %27 : vector<256x128xf32>
    %c0_28 = arith.constant 0 : index
    %c1_29 = arith.constant 1 : index
    %c1_30 = arith.constant 1 : index
    %c0_31 = arith.constant 0 : index
    %29 = vector.load %arg2[%c0_28, %c1_29, %c1_30, %c0_31] : memref<1x18x18x128xbf16, #tpu.memory_space<vmem>>, vector<1x16x16x128xbf16>
    %30 = vector.shape_cast %29 : vector<1x16x16x128xbf16> to vector<16x16x128xbf16>
    %31 = vector.shape_cast %30 : vector<16x16x128xbf16> to vector<256x128xbf16>
    %c4 = arith.constant 4 : index
    %c0_32 = arith.constant 0 : index
    %c0_33 = arith.constant 0 : index
    %32 = vector.load %arg3[%c4, %c0_32, %c0_33] : memref<9x128x128xbf16, #tpu.memory_space<vmem>>, vector<1x128x128xbf16>
    %33 = vector.shape_cast %32 : vector<1x128x128xbf16> to vector<128x128xbf16>
    %cst_34 = arith.constant dense<0.000000e+00> : vector<256x128xf32>
    %34 = tpu.matmul %31, %33, %cst_34 {dimension_numbers = #tpu.dot_dimension_numbers<[1], [0], [0], [1], [0, 0, 1, 1], [], []>} : vector<256x128xbf16>, vector<128x128xbf16>, vector<256x128xf32> -> vector<256x128xf32>
    %35 = arith.addf %28, %34 : vector<256x128xf32>
    %c0_35 = arith.constant 0 : index
    %c1_36 = arith.constant 1 : index
    %c2_37 = arith.constant 2 : index
    %c0_38 = arith.constant 0 : index
    %36 = vector.load %arg2[%c0_35, %c1_36, %c2_37, %c0_38] : memref<1x18x18x128xbf16, #tpu.memory_space<vmem>>, vector<1x16x16x128xbf16>
    %37 = vector.shape_cast %36 : vector<1x16x16x128xbf16> to vector<16x16x128xbf16>
    %38 = vector.shape_cast %37 : vector<16x16x128xbf16> to vector<256x128xbf16>
    %c5 = arith.constant 5 : index
    %c0_39 = arith.constant 0 : index
    %c0_40 = arith.constant 0 : index
    %39 = vector.load %arg3[%c5, %c0_39, %c0_40] : memref<9x128x128xbf16, #tpu.memory_space<vmem>>, vector<1x128x128xbf16>
    %40 = vector.shape_cast %39 : vector<1x128x128xbf16> to vector<128x128xbf16>
    %cst_41 = arith.constant dense<0.000000e+00> : vector<256x128xf32>
    %41 = tpu.matmul %38, %40, %cst_41 {dimension_numbers = #tpu.dot_dimension_numbers<[1], [0], [0], [1], [0, 0, 1, 1], [], []>} : vector<256x128xbf16>, vector<128x128xbf16>, vector<256x128xf32> -> vector<256x128xf32>
    %42 = arith.addf %35, %41 : vector<256x128xf32>
    %c0_42 = arith.constant 0 : index
    %c2_43 = arith.constant 2 : index
    %c0_44 = arith.constant 0 : index
    %c0_45 = arith.constant 0 : index
    %43 = vector.load %arg2[%c0_42, %c2_43, %c0_44, %c0_45] : memref<1x18x18x128xbf16, #tpu.memory_space<vmem>>, vector<1x16x16x128xbf16>
    %44 = vector.shape_cast %43 : vector<1x16x16x128xbf16> to vector<16x16x128xbf16>
    %45 = vector.shape_cast %44 : vector<16x16x128xbf16> to vector<256x128xbf16>
    %c6 = arith.constant 6 : index
    %c0_46 = arith.constant 0 : index
    %c0_47 = arith.constant 0 : index
    %46 = vector.load %arg3[%c6, %c0_46, %c0_47] : memref<9x128x128xbf16, #tpu.memory_space<vmem>>, vector<1x128x128xbf16>
    %47 = vector.shape_cast %46 : vector<1x128x128xbf16> to vector<128x128xbf16>
    %cst_48 = arith.constant dense<0.000000e+00> : vector<256x128xf32>
    %48 = tpu.matmul %45, %47, %cst_48 {dimension_numbers = #tpu.dot_dimension_numbers<[1], [0], [0], [1], [0, 0, 1, 1], [], []>} : vector<256x128xbf16>, vector<128x128xbf16>, vector<256x128xf32> -> vector<256x128xf32>
    %49 = arith.addf %42, %48 : vector<256x128xf32>
    %c0_49 = arith.constant 0 : index
    %c2_50 = arith.constant 2 : index
    %c1_51 = arith.constant 1 : index
    %c0_52 = arith.constant 0 : index
    %50 = vector.load %arg2[%c0_49, %c2_50, %c1_51, %c0_52] : memref<1x18x18x128xbf16, #tpu.memory_space<vmem>>, vector<1x16x16x128xbf16>
    %51 = vector.shape_cast %50 : vector<1x16x16x128xbf16> to vector<16x16x128xbf16>
    %52 = vector.shape_cast %51 : vector<16x16x128xbf16> to vector<256x128xbf16>
    %c7 = arith.constant 7 : index
    %c0_53 = arith.constant 0 : index
    %c0_54 = arith.constant 0 : index
    %53 = vector.load %arg3[%c7, %c0_53, %c0_54] : memref<9x128x128xbf16, #tpu.memory_space<vmem>>, vector<1x128x128xbf16>
    %54 = vector.shape_cast %53 : vector<1x128x128xbf16> to vector<128x128xbf16>
    %cst_55 = arith.constant dense<0.000000e+00> : vector<256x128xf32>
    %55 = tpu.matmul %52, %54, %cst_55 {dimension_numbers = #tpu.dot_dimension_numbers<[1], [0], [0], [1], [0, 0, 1, 1], [], []>} : vector<256x128xbf16>, vector<128x128xbf16>, vector<256x128xf32> -> vector<256x128xf32>
    %56 = arith.addf %49, %55 : vector<256x128xf32>
    %c0_56 = arith.constant 0 : index
    %c2_57 = arith.constant 2 : index
    %c2_58 = arith.constant 2 : index
    %c0_59 = arith.constant 0 : index
    %57 = vector.load %arg2[%c0_56, %c2_57, %c2_58, %c0_59] : memref<1x18x18x128xbf16, #tpu.memory_space<vmem>>, vector<1x16x16x128xbf16>
    %58 = vector.shape_cast %57 : vector<1x16x16x128xbf16> to vector<16x16x128xbf16>
    %59 = vector.shape_cast %58 : vector<16x16x128xbf16> to vector<256x128xbf16>
    %c8 = arith.constant 8 : index
    %c0_60 = arith.constant 0 : index
    %c0_61 = arith.constant 0 : index
    %60 = vector.load %arg3[%c8, %c0_60, %c0_61] : memref<9x128x128xbf16, #tpu.memory_space<vmem>>, vector<1x128x128xbf16>
    %61 = vector.shape_cast %60 : vector<1x128x128xbf16> to vector<128x128xbf16>
    %cst_62 = arith.constant dense<0.000000e+00> : vector<256x128xf32>
    %62 = tpu.matmul %59, %61, %cst_62 {dimension_numbers = #tpu.dot_dimension_numbers<[1], [0], [0], [1], [0, 0, 1, 1], [], []>} : vector<256x128xbf16>, vector<128x128xbf16>, vector<256x128xf32> -> vector<256x128xf32>
    %63 = arith.addf %56, %62 : vector<256x128xf32>
    %c0_63 = arith.constant 0 : index
    %c0_64 = arith.constant 0 : index
    %64 = vector.load %arg4[%c0_63, %c0_64] : memref<1x128xf32, #tpu.memory_space<vmem>>, vector<1x128xf32>
    %65 = vector.broadcast %64 : vector<1x128xf32> to vector<256x128xf32>
    %66 = arith.addf %63, %65 : vector<256x128xf32>
    %cst_65 = arith.constant 0.000000e+00 : f32
    %67 = vector.broadcast %cst_65 : f32 to vector<256x128xf32>
    %68 = arith.maximumf %66, %67 : vector<256x128xf32>
    %69 = arith.truncf %68 : vector<256x128xf32> to vector<256x128xbf16>
    %c0_66 = arith.constant 0 : index
    %c0_67 = arith.constant 0 : index
    %c0_68 = arith.constant 0 : index
    %70 = vector.load %arg5[%c0_66, %c0_67, %c0_68] : memref<1x256x128xbf16, #tpu.memory_space<vmem>>, vector<1x256x128xbf16>
    %71 = vector.shape_cast %70 : vector<1x256x128xbf16> to vector<256x128xbf16>
    %72 = vector.shape_cast %69 : vector<256x128xbf16> to vector<1x256x128xbf16>
    tpu.vector_store %arg5[%c0_66, %c0_67, %c0_68], %72 {strides = array<i32>} : memref<1x256x128xbf16, #tpu.memory_space<vmem>>, vector<1x256x128xbf16>,
    return
  }
  func.func @transform_0(%arg0: i32, %arg1: i32) -> (i32, i32, i32, i32) {
    %c0_i32 = arith.constant 0 : i32
    %c0_i32_0 = arith.constant 0 : i32
    %c0_i32_1 = arith.constant 0 : i32
    %c0_i32_2 = arith.constant 0 : i32
    return %arg0, %c0_i32, %c0_i32_0, %c0_i32_1 : i32, i32, i32, i32
  }
  func.func @transform_1(%arg0: i32, %arg1: i32) -> (i32, i32, i32) {
    %c0_i32 = arith.constant 0 : i32
    %c0_i32_0 = arith.constant 0 : i32
    %c0_i32_1 = arith.constant 0 : i32
    return %c0_i32, %c0_i32_0, %arg1 : i32, i32, i32
  }
  func.func @transform_2(%arg0: i32, %arg1: i32) -> (i32, i32) {
    %c0_i32 = arith.constant 0 : i32
    %c0_i32_0 = arith.constant 0 : i32
    return %c0_i32, %arg1 : i32, i32
  }
  func.func @transform_3(%arg0: i32, %arg1: i32) -> (i32, i32, i32) {
    %c0_i32 = arith.constant 0 : i32
    %c0_i32_0 = arith.constant 0 : i32
    return %arg0, %c0_i32, %arg1 : i32, i32, i32
  }
}

module attributes {stable_mosaic.version = 11 : i64} {
  func.func @_mm2_bias_relu_kernel(%arg0: i32, %arg1: i32, %arg2: memref<256x128xbf16, #tpu.memory_space<vmem>>, %arg3: memref<128x128xbf16, #tpu.memory_space<vmem>>, %arg4: memref<1x128xf32, #tpu.memory_space<vmem>>, %arg5: memref<256x128xbf16, #tpu.memory_space<vmem>>, %arg6: memref<128x128xbf16, #tpu.memory_space<vmem>>, %arg7: memref<256x128xf32, #tpu.memory_space<vmem>>) attributes {dimension_semantics = [#tpu.dimension_semantics<parallel>, #tpu.dimension_semantics<parallel>], iteration_bounds = array<i64: 2, 1>, scalar_prefetch = 0 : i64, scratch_operands = 0 : i64, tpu.core_type = #tpu.core_type<tc>, window_params = [{transform_indices = @transform_0, window_bounds = array<i64: 256, 128>}, {transform_indices = @transform_1, window_bounds = array<i64: 128, 128>}, {transform_indices = @transform_2, window_bounds = array<i64: 1, 128>}, {transform_indices = @transform_3, window_bounds = array<i64: 256, 128>}, {transform_indices = @transform_4, window_bounds = array<i64: 128, 128>}, {transform_indices = @transform_5, window_bounds = array<i64: 256, 128>}]} {
    %c0 = arith.constant 0 : index
    %c0_0 = arith.constant 0 : index
    %0 = vector.load %arg2[%c0, %c0_0] : memref<256x128xbf16, #tpu.memory_space<vmem>>, vector<256x128xbf16>
    %c0_1 = arith.constant 0 : index
    %c0_2 = arith.constant 0 : index
    %1 = vector.load %arg3[%c0_1, %c0_2] : memref<128x128xbf16, #tpu.memory_space<vmem>>, vector<128x128xbf16>
    %cst = arith.constant dense<0.000000e+00> : vector<256x128xf32>
    %2 = tpu.matmul %0, %1, %cst {dimension_numbers = #tpu.dot_dimension_numbers<[1], [0], [0], [1], [0, 0, 1, 1], [], []>} : vector<256x128xbf16>, vector<128x128xbf16>, vector<256x128xf32> -> vector<256x128xf32>
    %c0_3 = arith.constant 0 : index
    %c0_4 = arith.constant 0 : index
    %3 = vector.load %arg5[%c0_3, %c0_4] : memref<256x128xbf16, #tpu.memory_space<vmem>>, vector<256x128xbf16>
    %c0_5 = arith.constant 0 : index
    %c0_6 = arith.constant 0 : index
    %4 = vector.load %arg6[%c0_5, %c0_6] : memref<128x128xbf16, #tpu.memory_space<vmem>>, vector<128x128xbf16>
    %cst_7 = arith.constant dense<0.000000e+00> : vector<256x128xf32>
    %5 = tpu.matmul %3, %4, %cst_7 {dimension_numbers = #tpu.dot_dimension_numbers<[1], [0], [0], [1], [0, 0, 1, 1], [], []>} : vector<256x128xbf16>, vector<128x128xbf16>, vector<256x128xf32> -> vector<256x128xf32>
    %6 = arith.addf %2, %5 : vector<256x128xf32>
    %c0_8 = arith.constant 0 : index
    %c0_9 = arith.constant 0 : index
    %7 = vector.load %arg4[%c0_8, %c0_9] : memref<1x128xf32, #tpu.memory_space<vmem>>, vector<1x128xf32>
    %8 = vector.broadcast %7 : vector<1x128xf32> to vector<256x128xf32>
    %9 = arith.addf %6, %8 : vector<256x128xf32>
    %cst_10 = arith.constant 0.000000e+00 : f32
    %10 = vector.broadcast %cst_10 : f32 to vector<256x128xf32>
    %11 = arith.maximumf %9, %10 : vector<256x128xf32>
    %c0_11 = arith.constant 0 : index
    %c0_12 = arith.constant 0 : index
    %12 = vector.load %arg7[%c0_11, %c0_12] : memref<256x128xf32, #tpu.memory_space<vmem>>, vector<256x128xf32>
    tpu.vector_store %arg7[%c0_11, %c0_12], %11 {strides = array<i32>} : memref<256x128xf32, #tpu.memory_space<vmem>>, vector<256x128xf32>,
    return
  }
  func.func @transform_0(%arg0: i32, %arg1: i32) -> (i32, i32) {
    %c0_i32 = arith.constant 0 : i32
    %c0_i32_0 = arith.constant 0 : i32
    return %arg0, %c0_i32 : i32, i32
  }
  func.func @transform_1(%arg0: i32, %arg1: i32) -> (i32, i32) {
    %c0_i32 = arith.constant 0 : i32
    %c0_i32_0 = arith.constant 0 : i32
    return %c0_i32, %arg1 : i32, i32
  }
  func.func @transform_2(%arg0: i32, %arg1: i32) -> (i32, i32) {
    %c0_i32 = arith.constant 0 : i32
    %c0_i32_0 = arith.constant 0 : i32
    return %c0_i32, %arg1 : i32, i32
  }
  func.func @transform_3(%arg0: i32, %arg1: i32) -> (i32, i32) {
    %c0_i32 = arith.constant 0 : i32
    %c0_i32_0 = arith.constant 0 : i32
    return %arg0, %c0_i32 : i32, i32
  }
  func.func @transform_4(%arg0: i32, %arg1: i32) -> (i32, i32) {
    %c0_i32 = arith.constant 0 : i32
    %c0_i32_0 = arith.constant 0 : i32
    return %c0_i32, %arg1 : i32, i32
  }
  func.func @transform_5(%arg0: i32, %arg1: i32) -> (i32, i32) {
    %c0_i32 = arith.constant 0 : i32
    return %arg0, %arg1 : i32, i32
  }
}

</mosaic_0001>

<bundles_post_ra>
// kernel: bottleneck_forward.3
= control target key start
LH: loop header
LB: loop body
LE: loop exit
PB: predicated region body
PF: predicated region fallthrough
CT: control target
= control target key end

     0   :  { %s1257_s12 = smov 0   ;;  %s1259_s13 = smov 0   ;;  %s1394_s0 = inlined_call_operand.vmem [shape: bf16[512,128], index: 0, kind: input, shape index: {}]   ;;  %s1395_s1 = inlined_call_operand.vmem [shape: bf16[128,128], index: 1, kind: input, shape index: {}]   ;;  %s1396_s2 = inlined_call_operand.vmem [shape: f32[1,128], index: 2, kind: input, shape index: {}]   ;;  %s1397_s3 = inlined_call_operand.vmem [shape: bf16[512,128], index: 3, kind: output, shape index: {}]  }
   0x1   :  { %s1261_s14 = smov 0  }
   0x2 LB: > { %s25_s15 = sadd.s32 1, %s1231_s13  ;;  %p886_p0 = scmp.ge.s32.totalorder %s1235_s14, 1  ;;  %s1235_s14 = sphi %s1261_s14, %s13_s14   ;;  %s1231_s13 = sphi %s1259_s13, %s1399_s13   ;;  %s1227_s12 = sphi %s1257_s12, %s1398_s12  }
   0x3   : > { %p27_p1 = scmp.ge.s32.totalorder %s25_s15, 2  ;;  %p169_p2 = scmp.lt.s32.totalorder %s1235_s14, 3 }
   0x5   : > { %s1401_s15 = smov (%p27_p1, %s25_s15), 0  ;;  %p170_p3 = pnand %p886_p0, %p169_p2 }
   0x6   : > { %v1189_v0 = vld [vmem:[%s1395_s1] sm:$0xff] (!%p170_p3)   ;;  %s887_s18 = sshll.u32 (!%p170_p3), %s1227_s12, 5  ;;  %v1190_v1 = vld [vmem:[%s1395_s1 + $0x8] sm:$0xff] (!%p170_p3)   ;;  %v1191_v2 = vld [vmem:[%s1395_s1 + $0x10] sm:$0xff] (!%p170_p3)  }
   0x7   : > { %173 = sbr.rel (%p170_p3) target bundleno = 285 (0x11d), region = 32  ;;  %p204_p4 = scmp.lt.s32.totalorder (!%p170_p3), %s887_s18, 63  ;;  %1101 = vmatprep.subr.bf16.mxu0 (!%p170_p3), %v1189_v0  ;;  %1149 = vmatprep.subr.bf16.mxu1 (!%p170_p3), %v1189_v0  ;;  %v1192_v3 = vld [vmem:[%s1395_s1 + $0x18] sm:$0xff] (!%p170_p3)   ;;  %v1193_v6 = vld [vmem:[%s1395_s1 + $0x20] sm:$0xff] (!%p170_p3)   ;;  %v1194_v7 = vld [vmem:[%s1395_s1 + $0x28] sm:$0xff] (!%p170_p3)  }
   0x8   : > { %1102 = vmatpush3.bf16.msra.mxu0 (!%p170_p3), %v1189_v0  ;;  %1157 = vmatpush3.bf16.msra.mxu1 (!%p170_p3), %v1189_v0  ;;  %v1195_v8 = vld [vmem:[%s1395_s1 + $0x30] sm:$0xff] (!%p170_p3)   ;;  %v1196_v9 = vld [vmem:[%s1395_s1 + $0x38] sm:$0xff] (!%p170_p3)   ;;  %v1328_v24 = vld [vmem:[%s1396_s2] ss:$0 sm:$0xff] (!%p170_p3) }
   0x9   : > { %1103 = vmatprep.subr.bf16.mxu0 (!%p170_p3), %v1190_v1  ;;  %1150 = vmatprep.subr.bf16.mxu1 (!%p170_p3), %v1190_v1 }
   0xc   : > { %1104 = vmatpush3.bf16.msra.mxu0 (!%p170_p3), %v1190_v1  ;;  %1158 = vmatpush3.bf16.msra.mxu1 (!%p170_p3), %v1190_v1 }
   0xd   : > { %1105 = vmatprep.subr.bf16.mxu0 (!%p170_p3), %v1191_v2  ;;  %1151 = vmatprep.subr.bf16.mxu1 (!%p170_p3), %v1191_v2 }
   0xe   : > { %s1403_s18 = smov (!%p204_p4, %s887_s18), 63 }
   0xf   : > { %s888_s23 = sshll.u32 %s1403_s18, 2 }
  0x10   : > { %s1292_s26 = scalar_lea.vmem %s1394_s0, %s888_s23  ;;  %1106 = vmatpush3.bf16.msra.mxu0 %v1191_v2  ;;  %1159 = vmatpush3.bf16.msra.mxu1 %v1191_v2  ;;  %s1343_s17 = scalar_lea.vmem %s1397_s3, %s888_s23 }
  0x11   : > { %v1197_v4 = vld [vmem:[%s1292_s26] sm:$0xff]   ;;  %1107 = vmatprep.subr.bf16.mxu0 %v1192_v3  ;;  %1152 = vmatprep.subr.bf16.mxu1 %v1192_v3  ;;  %v1199_v10 = vld [vmem:[%s1292_s26 + $0x8] sm:$0xff]   ;;  %v1201_v12 = vld [vmem:[%s1292_s26 + $0x10] sm:$0xff]  }
  0x12   : > { %v1198_v5 = vld [vmem:[%s1292_s26 + $0x40] sm:$0xff]   ;;  %1117 = vmatprep.mubr.bf16.mxu0 %v1197_v4  ;;  %v1200_v11 = vld [vmem:[%s1292_s26 + $0x48] sm:$0xff]   ;;  %v1202_v13 = vld [vmem:[%s1292_s26 + $0x50] sm:$0xff]  }
  0x13   : > { %1133 = vmatprep.mubr.bf16.mxu1 %v1198_v5  ;;  %v1203_v14 = vld [vmem:[%s1292_s26 + $0x18] sm:$0xff]   ;;  %v1205_v16 = vld [vmem:[%s1292_s26 + $0x20] sm:$0xff]   ;;  %v1207_v18 = vld [vmem:[%s1292_s26 + $0x28] sm:$0xff]  }
  0x14   : > { %1108 = vmatpush3.bf16.msra.mxu0 %v1192_v3  ;;  %1160 = vmatpush3.bf16.msra.mxu1 %v1192_v3  ;;  %v1204_v15 = vld [vmem:[%s1292_s26 + $0x58] sm:$0xff]   ;;  %v1206_v17 = vld [vmem:[%s1292_s26 + $0x60] sm:$0xff]   ;;  %v1208_v19 = vld [vmem:[%s1292_s26 + $0x68] sm:$0xff]  }
  0x15   : > { %1109 = vmatprep.subr.bf16.mxu0 %v1193_v6  ;;  %1153 = vmatprep.subr.bf16.mxu1 %v1193_v6  ;;  %v1209_v20 = vld [vmem:[%s1292_s26 + $0x30] sm:$0xff]   ;;  %v1211_v22 = vld [vmem:[%s1292_s26 + $0x38] sm:$0xff]  }
  0x16   : > { %v1210_v21 = vld [vmem:[%s1292_s26 + $0x70] sm:$0xff]   ;;  %v1212_v23 = vld [vmem:[%s1292_s26 + $0x78] sm:$0xff]  }
  0x18   : > { %1110 = vmatpush3.bf16.msra.mxu0 %v1193_v6  ;;  %1161 = vmatpush3.bf16.msra.mxu1 %v1193_v6 }
  0x19   : > { %1111 = vmatprep.subr.bf16.mxu0 %v1194_v7  ;;  %1154 = vmatprep.subr.bf16.mxu1 %v1194_v7 }
  0x1c   : > { %1112 = vmatpush3.bf16.msra.mxu0 %v1194_v7  ;;  %1162 = vmatpush3.bf16.msra.mxu1 %v1194_v7 }
  0x1d   : > { %1113 = vmatprep.subr.bf16.mxu0 %v1195_v8  ;;  %1155 = vmatprep.subr.bf16.mxu1 %v1195_v8 }
  0x20   : > { %1114 = vmatpush3.bf16.msra.mxu0 %v1195_v8  ;;  %1163 = vmatpush3.bf16.msra.mxu1 %v1195_v8 }
  0x21   : > { %1115 = vmatprep.subr.bf16.mxu0 %v1196_v9  ;;  %1156 = vmatprep.subr.bf16.mxu1 %v1196_v9 }
  0x24   : > { %1116 = vmatpush3.bf16.msra.mxu0 %v1196_v9  ;;  %1164 = vmatpush3.bf16.msra.mxu1 %v1196_v9 }
  0x27   : > { %1118 = vmatmul.mubr.bf16.vlgmr.msra.gmra.mrb[0].mxu0 %v1199_v10  ;;  %1134 = vmatmul.mubr.bf16.vlgmr.msra.gmra.mrb[0].mxu1 %v1200_v11 }
  0x28   : > { %1121 = vmatprep.mubr.bf16.mxu0 %v1201_v12  ;;  %1137 = vmatprep.mubr.bf16.mxu1 %v1202_v13 }
  0x2f   : > { %1122 = vmatmul.mubr.bf16.gmra.mrb[4].mxu0 %v1203_v14  ;;  %1138 = vmatmul.mubr.bf16.gmra.mrb[4].mxu1 %v1204_v15 }
  0x30   : > { %1125 = vmatprep.mubr.bf16.mxu0 %v1205_v16  ;;  %1141 = vmatprep.mubr.bf16.mxu1 %v1206_v17 }
  0x37   : > { %1126 = vmatmul.mubr.bf16.gmra.mrb[8].mxu0 %v1207_v18  ;;  %1142 = vmatmul.mubr.bf16.gmra.mrb[8].mxu1 %v1208_v19 }
  0x38   : > { %1129 = vmatprep.mubr.bf16.mxu0 %v1209_v20  ;;  %1145 = vmatprep.mubr.bf16.mxu1 %v1210_v21 }
  0x3f   : > { %1130 = vmatmul.mubr.bf16.gmra.mrb[12].mxu0 %v1211_v22  ;;  %1146 = vmatmul.mubr.bf16.gmra.mrb[12].mxu1 %v1212_v23 }
  0xfa   : > { %v1119_v25 = vpop.f32.mrb[0].mxu0  ;;  %v1135_v26 = vpop.f32.mrb[0].mxu1 }
  0xfb   : > { %v468_v27 = vadd.f32 %v1119_v25, %v1328_v24  ;;  %v532_v28 = vadd.f32 %v1135_v26, %v1328_v24  ;;  %v459_v29 = vpop.f32.mrb[1].mxu0  ;;  %v523_v30 = vpop.f32.mrb[1].mxu1 }
  0xfc   : > { %v460_v31 = vadd.f32 %v1328_v24, %v459_v29  ;;  %v524_v32 = vadd.f32 %v1328_v24, %v523_v30  ;;  %v1120_v33 = vpop.f32.mrb[2].mxu0  ;;  %v1136_v34 = vpop.f32.mrb[2].mxu1 }
  0xfd   : > { %v471_v35 = vadd.f32 %v1120_v33, %v1328_v24  ;;  %v535_v36 = vadd.f32 %v1136_v34, %v1328_v24  ;;  %v462_v37 = vpop.f32.mrb[3].mxu0  ;;  %v526_v38 = vpop.f32.mrb[3].mxu1  ;;  %v588_v41 = vmax.f32 %v468_v27, 0.0  ;;  %v604_v42 = vmax.f32 %v532_v28, 0.0 }
  0xfe   : > { %v463_v39 = vadd.f32 %v1328_v24, %v462_v37  ;;  %v527_v40 = vadd.f32 %v1328_v24, %v526_v38  ;;  %v586_v45 = vmax.f32 %v460_v31, 0.0  ;;  %v602_v46 = vmax.f32 %v524_v32, 0.0 }
  0xff   : > { %v589_v43 = vmax.f32 %v471_v35, 0.0  ;;  %v605_v44 = vmax.f32 %v535_v36, 0.0 }
 0x100   : > { %v587_v47 = vmax.f32 %v463_v39, 0.0  ;;  %v603_v48 = vmax.f32 %v527_v40, 0.0 }
 0x101   : > { %v990_v49 = vpack.c.bf16 %v589_v43, %v588_v41  ;;  %v1030_v50 = vpack.c.bf16 %v605_v44, %v604_v42 }
 0x102   : > { %v985_v51 = vpack.c.bf16 %v587_v47, %v586_v45  ;;  %v1025_v52 = vpack.c.bf16 %v603_v48, %v602_v46  ;;  %v1123_v53 = vpop.f32.mrb[4].mxu0  ;;  %v1139_v54 = vpop.f32.mrb[4].mxu1 }
 0x103   : > { %1062 = vst [vmem:[%s1343_s17 + $0x8] sm:$0xff] %v990_v49   ;;  %1070 = vst [vmem:[%s1343_s17 + $0x48] sm:$0xff] %v1030_v50   ;;  %v484_v55 = vadd.f32 %v1123_v53, %v1328_v24  ;;  %v548_v56 = vadd.f32 %v1139_v54, %v1328_v24  ;;  %v475_v57 = vpop.f32.mrb[5].mxu0  ;;  %v539_v58 = vpop.f32.mrb[5].mxu1 }
 0x104   : > { %986 = vst [vmem:[%s1343_s17] sm:$0xff] %v985_v51   ;;  %1069 = vst [vmem:[%s1343_s17 + $0x40] sm:$0xff] %v1025_v52   ;;  %v476_v59 = vadd.f32 %v1328_v24, %v475_v57  ;;  %v540_v60 = vadd.f32 %v1328_v24, %v539_v58  ;;  %v1124_v61 = vpop.f32.mrb[6].mxu0  ;;  %v1140_v62 = vpop.f32.mrb[6].mxu1 }
 0x105   : > { %v487_v63 = vadd.f32 %v1124_v61, %v1328_v24  ;;  %v551_v0 = vadd.f32 %v1140_v62, %v1328_v24  ;;  %v478_v1 = vpop.f32.mrb[7].mxu0  ;;  %v542_v2 = vpop.f32.mrb[7].mxu1  ;;  %v592_v5 = vmax.f32 %v484_v55, 0.0  ;;  %v608_v6 = vmax.f32 %v548_v56, 0.0 }
 0x106   : > { %v479_v3 = vadd.f32 %v1328_v24, %v478_v1  ;;  %v543_v4 = vadd.f32 %v1328_v24, %v542_v2  ;;  %v590_v9 = vmax.f32 %v476_v59, 0.0  ;;  %v606_v10 = vmax.f32 %v540_v60, 0.0 }
 0x107   : > { %v593_v7 = vmax.f32 %v487_v63, 0.0  ;;  %v609_v8 = vmax.f32 %v551_v0, 0.0 }
 0x108   : > { %v591_v11 = vmax.f32 %v479_v3, 0.0  ;;  %v607_v12 = vmax.f32 %v543_v4, 0.0 }
 0x109   : > { %v1000_v13 = vpack.c.bf16 %v593_v7, %v592_v5  ;;  %v1040_v14 = vpack.c.bf16 %v609_v8, %v608_v6 }
 0x10a   : > { %v995_v15 = vpack.c.bf16 %v591_v11, %v590_v9  ;;  %v1035_v16 = vpack.c.bf16 %v607_v12, %v606_v10  ;;  %v1127_v17 = vpop.f32.mrb[8].mxu0  ;;  %v1143_v18 = vpop.f32.mrb[8].mxu1 }
 0x10b   : > { %1064 = vst [vmem:[%s1343_s17 + $0x18] sm:$0xff] %v1000_v13   ;;  %1072 = vst [vmem:[%s1343_s17 + $0x58] sm:$0xff] %v1040_v14   ;;  %v500_v19 = vadd.f32 %v1127_v17, %v1328_v24  ;;  %v564_v20 = vadd.f32 %v1143_v18, %v1328_v24  ;;  %v491_v21 = vpop.f32.mrb[9].mxu0  ;;  %v555_v22 = vpop.f32.mrb[9].mxu1 }
 0x10c   : > { %1063 = vst [vmem:[%s1343_s17 + $0x10] sm:$0xff] %v995_v15   ;;  %1071 = vst [vmem:[%s1343_s17 + $0x50] sm:$0xff] %v1035_v16   ;;  %v492_v23 = vadd.f32 %v1328_v24, %v491_v21  ;;  %v556_v25 = vadd.f32 %v1328_v24, %v555_v22  ;;  %v1128_v26 = vpop.f32.mrb[10].mxu0  ;;  %v1144_v27 = vpop.f32.mrb[10].mxu1 }
 0x10d   : > { %v503_v28 = vadd.f32 %v1128_v26, %v1328_v24  ;;  %v567_v29 = vadd.f32 %v1144_v27, %v1328_v24  ;;  %v494_v30 = vpop.f32.mrb[11].mxu0  ;;  %v558_v31 = vpop.f32.mrb[11].mxu1  ;;  %v596_v34 = vmax.f32 %v500_v19, 0.0  ;;  %v612_v35 = vmax.f32 %v564_v20, 0.0 }
 0x10e   : > { %v495_v32 = vadd.f32 %v1328_v24, %v494_v30  ;;  %v559_v33 = vadd.f32 %v1328_v24, %v558_v31  ;;  %v594_v38 = vmax.f32 %v492_v23, 0.0  ;;  %v610_v39 = vmax.f32 %v556_v25, 0.0 }
 0x10f   : > { %v597_v36 = vmax.f32 %v503_v28, 0.0  ;;  %v613_v37 = vmax.f32 %v567_v29, 0.0 }
 0x110   : > { %v595_v40 = vmax.f32 %v495_v32, 0.0  ;;  %v611_v41 = vmax.f32 %v559_v33, 0.0 }
 0x111   : > { %v1010_v42 = vpack.c.bf16 %v597_v36, %v596_v34  ;;  %v1050_v43 = vpack.c.bf16 %v613_v37, %v612_v35 }
 0x112   : > { %v1005_v44 = vpack.c.bf16 %v595_v40, %v594_v38  ;;  %v1045_v45 = vpack.c.bf16 %v611_v41, %v610_v39  ;;  %v1131_v46 = vpop.f32.mrb[12].mxu0  ;;  %v1147_v47 = vpop.f32.mrb[12].mxu1 }
 0x113   : > { %1066 = vst [vmem:[%s1343_s17 + $0x28] sm:$0xff] %v1010_v42   ;;  %1074 = vst [vmem:[%s1343_s17 + $0x68] sm:$0xff] %v1050_v43   ;;  %v516_v48 = vadd.f32 %v1131_v46, %v1328_v24  ;;  %v580_v49 = vadd.f32 %v1147_v47, %v1328_v24  ;;  %v507_v50 = vpop.f32.mrb[13].mxu0  ;;  %v571_v51 = vpop.f32.mrb[13].mxu1 }
 0x114   : > { %1065 = vst [vmem:[%s1343_s17 + $0x20] sm:$0xff] %v1005_v44   ;;  %1073 = vst [vmem:[%s1343_s17 + $0x60] sm:$0xff] %v1045_v45   ;;  %v508_v52 = vadd.f32 %v1328_v24, %v507_v50  ;;  %v572_v53 = vadd.f32 %v1328_v24, %v571_v51  ;;  %v1132_v54 = vpop.f32.mrb[14].mxu0  ;;  %v1148_v55 = vpop.f32.mrb[14].mxu1 }
 0x115   : > { %v519_v56 = vadd.f32 %v1132_v54, %v1328_v24  ;;  %v583_v57 = vadd.f32 %v1148_v55, %v1328_v24  ;;  %v510_v58 = vpop.f32.mrb[15].mxu0  ;;  %v574_v59 = vpop.f32.mrb[15].mxu1  ;;  %v600_v62 = vmax.f32 %v516_v48, 0.0  ;;  %v616_v63 = vmax.f32 %v580_v49, 0.0 }
 0x116   : > { %v511_v60 = vadd.f32 %v1328_v24, %v510_v58  ;;  %v575_v61 = vadd.f32 %v1328_v24, %v574_v59  ;;  %v598_v2 = vmax.f32 %v508_v52, 0.0  ;;  %v614_v3 = vmax.f32 %v572_v53, 0.0 }
 0x117   : > { %v601_v0 = vmax.f32 %v519_v56, 0.0  ;;  %v617_v1 = vmax.f32 %v583_v57, 0.0 }
 0x118   : > { %v599_v4 = vmax.f32 %v511_v60, 0.0  ;;  %v615_v5 = vmax.f32 %v575_v61, 0.0 }
 0x119   : > { %v1020_v6 = vpack.c.bf16 %v601_v0, %v600_v62  ;;  %v1060_v7 = vpack.c.bf16 %v617_v1, %v616_v63 }
 0x11a   : > { %v1015_v8 = vpack.c.bf16 %v599_v4, %v598_v2  ;;  %v1055_v9 = vpack.c.bf16 %v615_v5, %v614_v3 }
 0x11b   : > { %1068 = vst [vmem:[%s1343_s17 + $0x38] sm:$0xff] %v1020_v6   ;;  %1076 = vst [vmem:[%s1343_s17 + $0x78] sm:$0xff] %v1060_v7  }
 0x11c   : > { %1067 = vst [vmem:[%s1343_s17 + $0x30] sm:$0xff] %v1015_v8   ;;  %1075 = vst [vmem:[%s1343_s17 + $0x70] sm:$0xff] %v1055_v9  }
 0x11d PF: > { %s13_s14 = sadd.s32 1, %s1235_s14   ;;  %s1398_s12 = smov %s1231_s13 }
 0x11e   : > { %p10_p5 = scmp.ge.s32.totalorder %s13_s14, 4   ;;  %s1399_s13 = smov %s1401_s15 }
 0x120   :  { %12 = sbr.rel (!%p10_p5) target bundleno = 2 (0x2), region = 68 }

// kernel: bottleneck_forward.5
= control target key start
LH: loop header
LB: loop body
LE: loop exit
PB: predicated region body
PF: predicated region fallthrough
CT: control target
= control target key end

     0   :  { %s1624_s18 = smov 0   ;;  %s1626_s19 = smov 0   ;;  %s1819_s0 = inlined_call_operand.vmem [shape: bf16[512,128], index: 0, kind: input, shape index: {}]   ;;  %s1820_s1 = inlined_call_operand.vmem [shape: bf16[128,128], index: 1, kind: input, shape index: {}]   ;;  %s1821_s2 = inlined_call_operand.vmem [shape: f32[1,128], index: 2, kind: input, shape index: {}]   ;;  %s1822_s3 = inlined_call_operand.vmem [shape: bf16[512,128], index: 3, kind: input, shape index: {}]   ;;  %s1823_s4 = inlined_call_operand.vmem [shape: bf16[128,128], index: 4, kind: input, shape index: {}]   ;;  %s1824_s5 = inlined_call_operand.vmem [shape: f32[512,128], index: 5, kind: output, shape index: {}]  }
   0x1   :  { %s1628_s20 = smov 0  }
   0x2 LB: > { %s27_s21 = sadd.s32 1, %s1588_s19  ;;  %p1264_p0 = scmp.ge.s32.totalorder %s1592_s20, 1  ;;  %s1592_s20 = sphi %s1628_s20, %s15_s20   ;;  %s1588_s19 = sphi %s1626_s19, %s1826_s19   ;;  %s1584_s18 = sphi %s1624_s18, %s1825_s18  }
   0x3   : > { %p29_p1 = scmp.ge.s32.totalorder %s27_s21, 2  ;;  %p239_p2 = scmp.lt.s32.totalorder %s1592_s20, 3 }
   0x5   : > { %s1828_s21 = smov (%p29_p1, %s27_s21), 0  ;;  %p240_p3 = pnand %p1264_p0, %p239_p2 }
   0x6   : > { %v1522_v0 = vld [vmem:[%s1823_s4] sm:$0xff] (!%p240_p3)   ;;  %s1265_s24 = sshll.u32 (!%p240_p3), %s1584_s18, 5  ;;  %v1524_v2 = vld [vmem:[%s1823_s4 + $0x8] sm:$0xff] (!%p240_p3)   ;;  %v1526_v4 = vld [vmem:[%s1823_s4 + $0x10] sm:$0xff] (!%p240_p3)  }
   0x7   : > { %243 = sbr.rel (%p240_p3) target bundleno = 318 (0x13e), region = 40  ;;  %v1523_v1 = vld [vmem:[%s1820_s1] sm:$0xff] (!%p240_p3)   ;;  %1370 = vmatprep.subr.bf16.mxu1 (!%p240_p3), %v1522_v0  ;;  %p287_p4 = scmp.lt.s32.totalorder (!%p240_p3), %s1265_s24, 63  ;;  %v1525_v3 = vld [vmem:[%s1820_s1 + $0x8] sm:$0xff] (!%p240_p3)   ;;  %v1527_v5 = vld [vmem:[%s1820_s1 + $0x10] sm:$0xff] (!%p240_p3)  }
   0x8   : > { %1418 = vmatprep.subr.bf16.mxu0 (!%p240_p3), %v1523_v1  ;;  %1371 = vmatpush3.bf16.msra.mxu1 (!%p240_p3), %v1522_v0  ;;  %v1528_v6 = vld [vmem:[%s1823_s4 + $0x18] sm:$0xff] (!%p240_p3)   ;;  %v1530_v8 = vld [vmem:[%s1823_s4 + $0x20] sm:$0xff] (!%p240_p3)   ;;  %v1532_v10 = vld [vmem:[%s1823_s4 + $0x28] sm:$0xff] (!%p240_p3)  }
   0x9   : > { %1419 = vmatpush3.bf16.msra.mxu0 (!%p240_p3), %v1523_v1  ;;  %1372 = vmatprep.subr.bf16.mxu1 (!%p240_p3), %v1524_v2  ;;  %v1529_v7 = vld [vmem:[%s1820_s1 + $0x18] sm:$0xff] (!%p240_p3)   ;;  %v1531_v9 = vld [vmem:[%s1820_s1 + $0x20] sm:$0xff] (!%p240_p3)   ;;  %v1533_v11 = vld [vmem:[%s1820_s1 + $0x28] sm:$0xff] (!%p240_p3)  }
   0xa   : > { %1420 = vmatprep.subr.bf16.mxu0 (!%p240_p3), %v1525_v3  ;;  %v1534_v14 = vld [vmem:[%s1823_s4 + $0x30] sm:$0xff] (!%p240_p3)   ;;  %v1536_v16 = vld [vmem:[%s1823_s4 + $0x38] sm:$0xff] (!%p240_p3)   ;;  %v1738_v50 = vld [vmem:[%s1821_s2] ss:$0 sm:$0xff] (!%p240_p3) }
   0xb   : > { %v1535_v15 = vld [vmem:[%s1820_s1 + $0x30] sm:$0xff] (!%p240_p3)   ;;  %v1537_v17 = vld [vmem:[%s1820_s1 + $0x38] sm:$0xff] (!%p240_p3)  }
   0xc   : > { %1373 = vmatpush3.bf16.msra.mxu1 (!%p240_p3), %v1524_v2 }
   0xd   : > { %1421 = vmatpush3.bf16.msra.mxu0 (!%p240_p3), %v1525_v3  ;;  %1374 = vmatprep.subr.bf16.mxu1 (!%p240_p3), %v1526_v4 }
   0xe   : > { %s1830_s24 = smov (!%p287_p4, %s1265_s24), 63  ;;  %1422 = vmatprep.subr.bf16.mxu0 %v1527_v5 }
   0xf   : > { %s1266_s14 = sshll.u32 %s1830_s24, 2  ;;  %s1270_s18 = sshll.u32 %s1830_s24, 3 }
  0x10   : > { %1375 = vmatpush3.bf16.msra.mxu1 %v1526_v4  ;;  %s1678_s25 = scalar_lea.vmem %s1822_s3, %s1266_s14  ;;  %s1686_s30 = scalar_lea.vmem %s1819_s0, %s1266_s14 }
  0x11   : > { %1423 = vmatpush3.bf16.msra.mxu0 %v1527_v5  ;;  %1376 = vmatprep.subr.bf16.mxu1 %v1528_v6  ;;  %v1538_v12 = vld [vmem:[%s1678_s25] sm:$0xff]   ;;  %v1540_v18 = vld [vmem:[%s1678_s25 + $0x8] sm:$0xff]   ;;  %v1542_v20 = vld [vmem:[%s1678_s25 + $0x10] sm:$0xff]  }
  0x12   : > { %1424 = vmatprep.subr.bf16.mxu0 %v1529_v7  ;;  %v1539_v13 = vld [vmem:[%s1686_s30] sm:$0xff]   ;;  %1386 = vmatprep.mubr.bf16.mxu1 %v1538_v12  ;;  %v1541_v19 = vld [vmem:[%s1686_s30 + $0x8] sm:$0xff]   ;;  %v1543_v21 = vld [vmem:[%s1686_s30 + $0x10] sm:$0xff]  }
  0x13   : > { %1434 = vmatprep.mubr.bf16.mxu0 %v1539_v13  ;;  %v1544_v22 = vld [vmem:[%s1678_s25 + $0x18] sm:$0xff]   ;;  %v1546_v24 = vld [vmem:[%s1678_s25 + $0x20] sm:$0xff]   ;;  %v1548_v26 = vld [vmem:[%s1678_s25 + $0x28] sm:$0xff]  }
  0x14   : > { %1377 = vmatpush3.bf16.msra.mxu1 %v1528_v6  ;;  %v1545_v23 = vld [vmem:[%s1686_s30 + $0x18] sm:$0xff]   ;;  %v1547_v25 = vld [vmem:[%s1686_s30 + $0x20] sm:$0xff]   ;;  %v1549_v27 = vld [vmem:[%s1686_s30 + $0x28] sm:$0xff]  }
  0x15   : > { %1425 = vmatpush3.bf16.msra.mxu0 %v1529_v7  ;;  %1378 = vmatprep.subr.bf16.mxu1 %v1530_v8  ;;  %v1550_v28 = vld [vmem:[%s1678_s25 + $0x30] sm:$0xff]   ;;  %v1552_v30 = vld [vmem:[%s1678_s25 + $0x38] sm:$0xff]   ;;  %v1554_v32 = vld [vmem:[%s1678_s25 + $0x40] sm:$0xff]  }
  0x16   : > { %1426 = vmatprep.subr.bf16.mxu0 %v1531_v9  ;;  %v1551_v29 = vld [vmem:[%s1686_s30 + $0x30] sm:$0xff]   ;;  %v1553_v31 = vld [vmem:[%s1686_s30 + $0x38] sm:$0xff]   ;;  %v1555_v33 = vld [vmem:[%s1686_s30 + $0x40] sm:$0xff]  }
  0x17   : > { %v1556_v34 = vld [vmem:[%s1678_s25 + $0x48] sm:$0xff]   ;;  %v1558_v36 = vld [vmem:[%s1678_s25 + $0x50] sm:$0xff]   ;;  %v1560_v38 = vld [vmem:[%s1678_s25 + $0x58] sm:$0xff]  }
  0x18   : > { %1379 = vmatpush3.bf16.msra.mxu1 %v1530_v8  ;;  %v1557_v35 = vld [vmem:[%s1686_s30 + $0x48] sm:$0xff]   ;;  %v1559_v37 = vld [vmem:[%s1686_s30 + $0x50] sm:$0xff]   ;;  %v1561_v39 = vld [vmem:[%s1686_s30 + $0x58] sm:$0xff]  }
  0x19   : > { %1427 = vmatpush3.bf16.msra.mxu0 %v1531_v9  ;;  %1380 = vmatprep.subr.bf16.mxu1 %v1532_v10  ;;  %v1562_v40 = vld [vmem:[%s1678_s25 + $0x60] sm:$0xff]   ;;  %v1564_v42 = vld [vmem:[%s1678_s25 + $0x68] sm:$0xff]   ;;  %v1566_v44 = vld [vmem:[%s1678_s25 + $0x70] sm:$0xff]  }
  0x1a   : > { %1428 = vmatprep.subr.bf16.mxu0 %v1533_v11  ;;  %v1563_v41 = vld [vmem:[%s1686_s30 + $0x60] sm:$0xff]   ;;  %v1565_v43 = vld [vmem:[%s1686_s30 + $0x68] sm:$0xff]   ;;  %v1567_v45 = vld [vmem:[%s1686_s30 + $0x70] sm:$0xff]  }
  0x1b   : > { %v1568_v46 = vld [vmem:[%s1678_s25 + $0x78] sm:$0xff]   ;;  %s1745_s25 = scalar_lea.vmem %s1824_s5, %s1270_s18 }
  0x1c   : > { %1381 = vmatpush3.bf16.msra.mxu1 %v1532_v10  ;;  %v1569_v47 = vld [vmem:[%s1686_s30 + $0x78] sm:$0xff]  }
  0x1d   : > { %1429 = vmatpush3.bf16.msra.mxu0 %v1533_v11  ;;  %1382 = vmatprep.subr.bf16.mxu1 %v1534_v14 }
  0x1e   : > { %1430 = vmatprep.subr.bf16.mxu0 %v1535_v15 }
  0x20   : > { %1383 = vmatpush3.bf16.msra.mxu1 %v1534_v14 }
  0x21   : > { %1431 = vmatpush3.bf16.msra.mxu0 %v1535_v15  ;;  %1384 = vmatprep.subr.bf16.mxu1 %v1536_v16 }
  0x22   : > { %1432 = vmatprep.subr.bf16.mxu0 %v1537_v17 }
  0x24   : > { %1385 = vmatpush3.bf16.msra.mxu1 %v1536_v16 }
  0x25   : > { %1433 = vmatpush3.bf16.msra.mxu0 %v1537_v17 }
  0x27   : > { %1387 = vmatmul.mubr.bf16.vlgmr.msra.gmra.mrb[0].mxu1 %v1540_v18 }
  0x28   : > { %1435 = vmatmul.mubr.bf16.vlgmr.msra.gmra.mrb[0].mxu0 %v1541_v19  ;;  %1390 = vmatprep.mubr.bf16.mxu1 %v1542_v20 }
  0x29   : > { %1438 = vmatprep.mubr.bf16.mxu0 %v1543_v21 }
  0x2f   : > { %1391 = vmatmul.mubr.bf16.gmra.mrb[4].mxu1 %v1544_v22 }
  0x30   : > { %1439 = vmatmul.mubr.bf16.gmra.mrb[4].mxu0 %v1545_v23  ;;  %1394 = vmatprep.mubr.bf16.mxu1 %v1546_v24 }
  0x31   : > { %1442 = vmatprep.mubr.bf16.mxu0 %v1547_v25 }
  0x37   : > { %1395 = vmatmul.mubr.bf16.gmra.mrb[8].mxu1 %v1548_v26 }
  0x38   : > { %1443 = vmatmul.mubr.bf16.gmra.mrb[8].mxu0 %v1549_v27  ;;  %1398 = vmatprep.mubr.bf16.mxu1 %v1550_v28 }
  0x39   : > { %1446 = vmatprep.mubr.bf16.mxu0 %v1551_v29 }
  0x3f   : > { %1399 = vmatmul.mubr.bf16.gmra.mrb[12].mxu1 %v1552_v30 }
  0x40   : > { %1447 = vmatmul.mubr.bf16.gmra.mrb[12].mxu0 %v1553_v31  ;;  %1402 = vmatprep.mubr.bf16.mxu1 %v1554_v32 }
  0x41   : > { %1450 = vmatprep.mubr.bf16.mxu0 %v1555_v33 }
  0x47   : > { %1403 = vmatmul.mubr.bf16.gmra.mrb[16].mxu1 %v1556_v34 }
  0x48   : > { %1451 = vmatmul.mubr.bf16.gmra.mrb[16].mxu0 %v1557_v35  ;;  %1406 = vmatprep.mubr.bf16.mxu1 %v1558_v36 }
  0x49   : > { %1454 = vmatprep.mubr.bf16.mxu0 %v1559_v37 }
  0x4f   : > { %1407 = vmatmul.mubr.bf16.gmra.mrb[20].mxu1 %v1560_v38 }
  0x50   : > { %1455 = vmatmul.mubr.bf16.gmra.mrb[20].mxu0 %v1561_v39  ;;  %1410 = vmatprep.mubr.bf16.mxu1 %v1562_v40 }
  0x51   : > { %1458 = vmatprep.mubr.bf16.mxu0 %v1563_v41 }
  0x57   : > { %1411 = vmatmul.mubr.bf16.gmra.mrb[24].mxu1 %v1564_v42 }
  0x58   : > { %1459 = vmatmul.mubr.bf16.gmra.mrb[24].mxu0 %v1565_v43  ;;  %1414 = vmatprep.mubr.bf16.mxu1 %v1566_v44 }
  0x59   : > { %1462 = vmatprep.mubr.bf16.mxu0 %v1567_v45 }
  0x5f   : > { %1415 = vmatmul.mubr.bf16.gmra.mrb[28].mxu1 %v1568_v46 }
  0x60   : > { %1463 = vmatmul.mubr.bf16.gmra.mrb[28].mxu0 %v1569_v47 }
  0xfa   : > { %v1388_v48 = vpop.f32.mrb[0].mxu1 }
  0xfb   : > { %v1436_v49 = vpop.f32.mrb[0].mxu0  ;;  %v593_v51 = vpop.f32.mrb[1].mxu1 }
  0xfc   : > { %v907_v52 = vadd.f32 %v1436_v49, %v1388_v48  ;;  %v898_v53 = vpop.f32.mrb[1].mxu0  ;;  %v1389_v54 = vpop.f32.mrb[2].mxu1 }
  0xfd   : > { %v899_v55 = vadd.f32 %v898_v53, %v593_v51  ;;  %v1437_v56 = vpop.f32.mrb[2].mxu0  ;;  %v596_v57 = vpop.f32.mrb[3].mxu1 }
  0xfe   : > { %v1034_v58 = vadd.f32 %v1738_v50, %v907_v52  ;;  %v910_v59 = vadd.f32 %v1437_v56, %v1389_v54  ;;  %v901_v60 = vpop.f32.mrb[3].mxu0 }
  0xff   : > { %v1032_v61 = vadd.f32 %v1738_v50, %v899_v55  ;;  %v902_v62 = vadd.f32 %v901_v60, %v596_v57 }
 0x100   : > { %v1066_v63 = vmax.f32 %v1034_v58, 0.0  ;;  %v1035_v0 = vadd.f32 %v1738_v50, %v910_v59 }
 0x101   : > { %v1064_v1 = vmax.f32 %v1032_v61, 0.0  ;;  %v1033_v2 = vadd.f32 %v1738_v50, %v902_v62 }
 0x102   : > { %1098 = vst [vmem:[%s1745_s25 + $0x10] sm:$0xff] %v1066_v63  ;;  %v1067_v3 = vmax.f32 %v1035_v0, 0.0  ;;  %v1392_v4 = vpop.f32.mrb[4].mxu1 }
 0x103   : > { %1096 = vst [vmem:[%s1745_s25] sm:$0xff] %v1064_v1  ;;  %v1065_v5 = vmax.f32 %v1033_v2, 0.0  ;;  %v1440_v6 = vpop.f32.mrb[4].mxu0  ;;  %v609_v7 = vpop.f32.mrb[5].mxu1 }
 0x104   : > { %1099 = vst [vmem:[%s1745_s25 + $0x18] sm:$0xff] %v1067_v3  ;;  %v923_v8 = vadd.f32 %v1440_v6, %v1392_v4  ;;  %v914_v9 = vpop.f32.mrb[5].mxu0  ;;  %v1393_v10 = vpop.f32.mrb[6].mxu1 }
 0x105   : > { %1097 = vst [vmem:[%s1745_s25 + $0x8] sm:$0xff] %v1065_v5  ;;  %v915_v11 = vadd.f32 %v914_v9, %v609_v7  ;;  %v1441_v12 = vpop.f32.mrb[6].mxu0  ;;  %v612_v13 = vpop.f32.mrb[7].mxu1 }
 0x106   : > { %v1038_v14 = vadd.f32 %v1738_v50, %v923_v8  ;;  %v926_v15 = vadd.f32 %v1441_v12, %v1393_v10  ;;  %v917_v16 = vpop.f32.mrb[7].mxu0 }
 0x107   : > { %v1036_v17 = vadd.f32 %v1738_v50, %v915_v11  ;;  %v918_v18 = vadd.f32 %v917_v16, %v612_v13 }
 0x108   : > { %v1070_v19 = vmax.f32 %v1038_v14, 0.0  ;;  %v1039_v20 = vadd.f32 %v1738_v50, %v926_v15 }
 0x109   : > { %v1068_v21 = vmax.f32 %v1036_v17, 0.0  ;;  %v1037_v22 = vadd.f32 %v1738_v50, %v918_v18 }
 0x10a   : > { %1102 = vst [vmem:[%s1745_s25 + $0x30] sm:$0xff] %v1070_v19  ;;  %v1071_v23 = vmax.f32 %v1039_v20, 0.0  ;;  %v1396_v24 = vpop.f32.mrb[8].mxu1 }
 0x10b   : > { %1100 = vst [vmem:[%s1745_s25 + $0x20] sm:$0xff] %v1068_v21  ;;  %v1069_v25 = vmax.f32 %v1037_v22, 0.0  ;;  %v1444_v26 = vpop.f32.mrb[8].mxu0  ;;  %v625_v27 = vpop.f32.mrb[9].mxu1 }
 0x10c   : > { %1103 = vst [vmem:[%s1745_s25 + $0x38] sm:$0xff] %v1071_v23  ;;  %v939_v28 = vadd.f32 %v1444_v26, %v1396_v24  ;;  %v930_v29 = vpop.f32.mrb[9].mxu0  ;;  %v1397_v30 = vpop.f32.mrb[10].mxu1 }
 0x10d   : > { %1101 = vst [vmem:[%s1745_s25 + $0x28] sm:$0xff] %v1069_v25  ;;  %v931_v31 = vadd.f32 %v930_v29, %v625_v27  ;;  %v1445_v32 = vpop.f32.mrb[10].mxu0  ;;  %v628_v33 = vpop.f32.mrb[11].mxu1 }
 0x10e   : > { %v1042_v34 = vadd.f32 %v1738_v50, %v939_v28  ;;  %v942_v35 = vadd.f32 %v1445_v32, %v1397_v30  ;;  %v933_v36 = vpop.f32.mrb[11].mxu0 }
 0x10f   : > { %v1040_v37 = vadd.f32 %v1738_v50, %v931_v31  ;;  %v934_v38 = vadd.f32 %v933_v36, %v628_v33 }
 0x110   : > { %v1074_v39 = vmax.f32 %v1042_v34, 0.0  ;;  %v1043_v40 = vadd.f32 %v1738_v50, %v942_v35 }
 0x111   : > { %v1072_v41 = vmax.f32 %v1040_v37, 0.0  ;;  %v1041_v42 = vadd.f32 %v1738_v50, %v934_v38 }
 0x112   : > { %1106 = vst [vmem:[%s1745_s25 + $0x50] sm:$0xff] %v1074_v39  ;;  %v1075_v43 = vmax.f32 %v1043_v40, 0.0  ;;  %v1400_v44 = vpop.f32.mrb[12].mxu1 }
 0x113   : > { %1104 = vst [vmem:[%s1745_s25 + $0x40] sm:$0xff] %v1072_v41  ;;  %v1073_v45 = vmax.f32 %v1041_v42, 0.0  ;;  %v1448_v46 = vpop.f32.mrb[12].mxu0  ;;  %v641_v47 = vpop.f32.mrb[13].mxu1 }
 0x114   : > { %1107 = vst [vmem:[%s1745_s25 + $0x58] sm:$0xff] %v1075_v43  ;;  %v955_v48 = vadd.f32 %v1448_v46, %v1400_v44  ;;  %v946_v49 = vpop.f32.mrb[13].mxu0  ;;  %v1401_v51 = vpop.f32.mrb[14].mxu1 }
 0x115   : > { %1105 = vst [vmem:[%s1745_s25 + $0x48] sm:$0xff] %v1073_v45  ;;  %v947_v52 = vadd.f32 %v946_v49, %v641_v47  ;;  %v1449_v53 = vpop.f32.mrb[14].mxu0  ;;  %v644_v54 = vpop.f32.mrb[15].mxu1 }
 0x116   : > { %v1046_v55 = vadd.f32 %v1738_v50, %v955_v48  ;;  %v958_v56 = vadd.f32 %v1449_v53, %v1401_v51  ;;  %v949_v57 = vpop.f32.mrb[15].mxu0 }
 0x117   : > { %v1044_v58 = vadd.f32 %v1738_v50, %v947_v52  ;;  %v950_v59 = vadd.f32 %v949_v57, %v644_v54 }
 0x118   : > { %v1078_v60 = vmax.f32 %v1046_v55, 0.0  ;;  %v1047_v61 = vadd.f32 %v1738_v50, %v958_v56 }
 0x119   : > { %v1076_v62 = vmax.f32 %v1044_v58, 0.0  ;;  %v1045_v63 = vadd.f32 %v1738_v50, %v950_v59 }
 0x11a   : > { %1110 = vst [vmem:[%s1745_s25 + $0x70] sm:$0xff] %v1078_v60  ;;  %v1079_v0 = vmax.f32 %v1047_v61, 0.0  ;;  %v1404_v1 = vpop.f32.mrb[16].mxu1 }
 0x11b   : > { %1108 = vst [vmem:[%s1745_s25 + $0x60] sm:$0xff] %v1076_v62  ;;  %v1077_v2 = vmax.f32 %v1045_v63, 0.0  ;;  %v1452_v3 = vpop.f32.mrb[16].mxu0  ;;  %v657_v4 = vpop.f32.mrb[17].mxu1 }
 0x11c   : > { %1111 = vst [vmem:[%s1745_s25 + $0x78] sm:$0xff] %v1079_v0  ;;  %v971_v5 = vadd.f32 %v1452_v3, %v1404_v1  ;;  %v962_v6 = vpop.f32.mrb[17].mxu0  ;;  %v1405_v7 = vpop.f32.mrb[18].mxu1 }
 0x11d   : > { %1109 = vst [vmem:[%s1745_s25 + $0x68] sm:$0xff] %v1077_v2  ;;  %v963_v8 = vadd.f32 %v962_v6, %v657_v4  ;;  %v1453_v9 = vpop.f32.mrb[18].mxu0  ;;  %v660_v10 = vpop.f32.mrb[19].mxu1 }
 0x11e   : > { %v1050_v11 = vadd.f32 %v1738_v50, %v971_v5  ;;  %v974_v12 = vadd.f32 %v1453_v9, %v1405_v7  ;;  %v965_v13 = vpop.f32.mrb[19].mxu0 }
 0x11f   : > { %v1048_v14 = vadd.f32 %v1738_v50, %v963_v8  ;;  %v966_v15 = vadd.f32 %v965_v13, %v660_v10 }
 0x120   : > { %v1082_v16 = vmax.f32 %v1050_v11, 0.0  ;;  %v1051_v17 = vadd.f32 %v1738_v50, %v974_v12 }
 0x121   : > { %v1080_v18 = vmax.f32 %v1048_v14, 0.0  ;;  %v1049_v19 = vadd.f32 %v1738_v50, %v966_v15 }
 0x122   : > { %1114 = vst [vmem:[%s1745_s25 + $0x90] sm:$0xff] %v1082_v16  ;;  %v1083_v20 = vmax.f32 %v1051_v17, 0.0  ;;  %v1408_v21 = vpop.f32.mrb[20].mxu1 }
 0x123   : > { %1112 = vst [vmem:[%s1745_s25 + $0x80] sm:$0xff] %v1080_v18  ;;  %v1081_v22 = vmax.f32 %v1049_v19, 0.0  ;;  %v1456_v23 = vpop.f32.mrb[20].mxu0  ;;  %v673_v24 = vpop.f32.mrb[21].mxu1 }
 0x124   : > { %1115 = vst [vmem:[%s1745_s25 + $0x98] sm:$0xff] %v1083_v20  ;;  %v987_v25 = vadd.f32 %v1456_v23, %v1408_v21  ;;  %v978_v26 = vpop.f32.mrb[21].mxu0  ;;  %v1409_v27 = vpop.f32.mrb[22].mxu1 }
 0x125   : > { %1113 = vst [vmem:[%s1745_s25 + $0x88] sm:$0xff] %v1081_v22  ;;  %v979_v28 = vadd.f32 %v978_v26, %v673_v24  ;;  %v1457_v29 = vpop.f32.mrb[22].mxu0  ;;  %v676_v30 = vpop.f32.mrb[23].mxu1 }
 0x126   : > { %v1054_v31 = vadd.f32 %v1738_v50, %v987_v25  ;;  %v990_v32 = vadd.f32 %v1457_v29, %v1409_v27  ;;  %v981_v33 = vpop.f32.mrb[23].mxu0 }
 0x127   : > { %v1052_v34 = vadd.f32 %v1738_v50, %v979_v28  ;;  %v982_v35 = vadd.f32 %v981_v33, %v676_v30 }
 0x128   : > { %v1086_v36 = vmax.f32 %v1054_v31, 0.0  ;;  %v1055_v37 = vadd.f32 %v1738_v50, %v990_v32 }
 0x129   : > { %v1084_v38 = vmax.f32 %v1052_v34, 0.0  ;;  %v1053_v39 = vadd.f32 %v1738_v50, %v982_v35 }
 0x12a   : > { %1118 = vst [vmem:[%s1745_s25 + $0xb0] sm:$0xff] %v1086_v36  ;;  %v1087_v40 = vmax.f32 %v1055_v37, 0.0  ;;  %v1412_v41 = vpop.f32.mrb[24].mxu1 }
 0x12b   : > { %1116 = vst [vmem:[%s1745_s25 + $0xa0] sm:$0xff] %v1084_v38  ;;  %v1085_v42 = vmax.f32 %v1053_v39, 0.0  ;;  %v1460_v43 = vpop.f32.mrb[24].mxu0  ;;  %v689_v44 = vpop.f32.mrb[25].mxu1 }
 0x12c   : > { %1119 = vst [vmem:[%s1745_s25 + $0xb8] sm:$0xff] %v1087_v40  ;;  %v1003_v45 = vadd.f32 %v1460_v43, %v1412_v41  ;;  %v994_v46 = vpop.f32.mrb[25].mxu0  ;;  %v1413_v47 = vpop.f32.mrb[26].mxu1 }
 0x12d   : > { %1117 = vst [vmem:[%s1745_s25 + $0xa8] sm:$0xff] %v1085_v42  ;;  %v995_v48 = vadd.f32 %v994_v46, %v689_v44  ;;  %v1461_v49 = vpop.f32.mrb[26].mxu0  ;;  %v692_v51 = vpop.f32.mrb[27].mxu1 }
 0x12e   : > { %v1058_v52 = vadd.f32 %v1738_v50, %v1003_v45  ;;  %v1006_v53 = vadd.f32 %v1461_v49, %v1413_v47  ;;  %v997_v54 = vpop.f32.mrb[27].mxu0 }
 0x12f   : > { %v1056_v55 = vadd.f32 %v1738_v50, %v995_v48  ;;  %v998_v56 = vadd.f32 %v997_v54, %v692_v51 }
 0x130   : > { %v1090_v57 = vmax.f32 %v1058_v52, 0.0  ;;  %v1059_v58 = vadd.f32 %v1738_v50, %v1006_v53 }
 0x131   : > { %v1088_v59 = vmax.f32 %v1056_v55, 0.0  ;;  %v1057_v60 = vadd.f32 %v1738_v50, %v998_v56 }
 0x132   : > { %1122 = vst [vmem:[%s1745_s25 + $0xd0] sm:$0xff] %v1090_v57  ;;  %v1091_v61 = vmax.f32 %v1059_v58, 0.0  ;;  %v1416_v62 = vpop.f32.mrb[28].mxu1 }
 0x133   : > { %1120 = vst [vmem:[%s1745_s25 + $0xc0] sm:$0xff] %v1088_v59  ;;  %v1089_v63 = vmax.f32 %v1057_v60, 0.0  ;;  %v1464_v0 = vpop.f32.mrb[28].mxu0  ;;  %v705_v1 = vpop.f32.mrb[29].mxu1 }
 0x134   : > { %1123 = vst [vmem:[%s1745_s25 + $0xd8] sm:$0xff] %v1091_v61  ;;  %v1019_v2 = vadd.f32 %v1464_v0, %v1416_v62  ;;  %v1010_v3 = vpop.f32.mrb[29].mxu0  ;;  %v1417_v4 = vpop.f32.mrb[30].mxu1 }
 0x135   : > { %1121 = vst [vmem:[%s1745_s25 + $0xc8] sm:$0xff] %v1089_v63  ;;  %v1011_v5 = vadd.f32 %v1010_v3, %v705_v1  ;;  %v1465_v6 = vpop.f32.mrb[30].mxu0  ;;  %v708_v7 = vpop.f32.mrb[31].mxu1 }
 0x136   : > { %v1062_v8 = vadd.f32 %v1738_v50, %v1019_v2  ;;  %v1022_v9 = vadd.f32 %v1465_v6, %v1417_v4  ;;  %v1013_v10 = vpop.f32.mrb[31].mxu0 }
 0x137   : > { %v1060_v11 = vadd.f32 %v1738_v50, %v1011_v5  ;;  %v1014_v12 = vadd.f32 %v1013_v10, %v708_v7 }
 0x138   : > { %v1094_v13 = vmax.f32 %v1062_v8, 0.0  ;;  %v1063_v14 = vadd.f32 %v1738_v50, %v1022_v9 }
 0x139   : > { %v1092_v15 = vmax.f32 %v1060_v11, 0.0  ;;  %v1061_v16 = vadd.f32 %v1738_v50, %v1014_v12 }
 0x13a   : > { %1126 = vst [vmem:[%s1745_s25 + $0xf0] sm:$0xff] %v1094_v13  ;;  %v1095_v17 = vmax.f32 %v1063_v14, 0.0 }
 0x13b   : > { %1124 = vst [vmem:[%s1745_s25 + $0xe0] sm:$0xff] %v1092_v15  ;;  %v1093_v18 = vmax.f32 %v1061_v16, 0.0 }
 0x13c   : > { %1127 = vst [vmem:[%s1745_s25 + $0xf8] sm:$0xff] %v1095_v17 }
 0x13d   : > { %1125 = vst [vmem:[%s1745_s25 + $0xe8] sm:$0xff] %v1093_v18 }
 0x13e PF: > { %s15_s20 = sadd.s32 1, %s1592_s20   ;;  %s1825_s18 = smov %s1588_s19 }
 0x13f   : > { %p12_p5 = scmp.ge.s32.totalorder %s15_s20, 4   ;;  %s1826_s19 = smov %s1828_s21 }
 0x141   :  { %14 = sbr.rel (!%p12_p5) target bundleno = 2 (0x2), region = 82 }

// kernel: bottleneck_forward.4
= control target key start
LH: loop header
LB: loop body
LE: loop exit
PB: predicated region body
PF: predicated region fallthrough
CT: control target
= control target key end

     0   :  { %s7304_s12 = smov 0   ;;  %s7306_s13 = smov 0   ;;  %s9166_s0 = inlined_call_operand.vmem [shape: bf16[2,18,18,128], index: 0, kind: input, shape index: {}]   ;;  %s9167_s1 = inlined_call_operand.vmem [shape: bf16[9,128,128], index: 1, kind: input, shape index: {}]   ;;  %s9168_s2 = inlined_call_operand.vmem [shape: f32[1,128], index: 2, kind: input, shape index: {}]   ;;  %s9169_s3 = inlined_call_operand.vmem [shape: bf16[2,256,128], index: 3, kind: output, shape index: {}]  }
   0x1   :  { %s7308_s14 = smov 0  }
   0x2 LB: > { %s25_s15 = sadd.s32 1, %s7278_s13  ;;  %p5374_p0 = scmp.ge.s32.totalorder %s7282_s14, 1  ;;  %s7282_s14 = sphi %s7308_s14, %s13_s14   ;;  %s7278_s13 = sphi %s7306_s13, %s9237_s13   ;;  %s7274_s12 = sphi %s7304_s12, %s9236_s12  }
   0x3   : > { %p27_p1 = scmp.ge.s32.totalorder %s25_s15, 2  ;;  %p168_p2 = scmp.lt.s32.totalorder %s7282_s14, 3 }
   0x5   : > { %s9239_s15 = smov (%p27_p1, %s25_s15), 0  ;;  %p169_p3 = pnand %p5374_p0, %p168_p2 }
   0x7   : > { %172 = sbr.rel (%p169_p3) target bundleno = 590 (0x24e), region = 32 }
   0xe   : > { %v7070_v0 = vld [vmem:[%s9167_s1 + $0x40] sm:$0xff]   ;;  %p202_p4 = scmp.lt.s32.totalorder %s7274_s12, 1  ;;  %v7072_v2 = vld [vmem:[%s9167_s1 + $0x48] sm:$0xff]   ;;  %v7074_v4 = vld [vmem:[%s9167_s1 + $0x50] sm:$0xff]   ;;  %vm287_vm0 = vsmask.f32 3328 }
   0xf   : > { %v7071_v1 = vld [vmem:[%s9167_s1 + $0x100] sm:$0xff]   ;;  %6341 = vmatprep.subr.bf16.mxu1 %v7070_v0  ;;  %v7073_v3 = vld [vmem:[%s9167_s1 + $0x108] sm:$0xff]   ;;  %v7075_v5 = vld [vmem:[%s9167_s1 + $0x110] sm:$0xff]   ;;  %vm288_vm1 = vsmask.f32 7440  ;;  %vm1317_vm3 = vcmask 1042432  }
  0x10   : > { %6533 = vmatprep.subr.bf16.mxu0 %v7071_v1  ;;  %6342 = vmatpush3.bf16.msra.mxu1 %v7070_v0  ;;  %s9241_s12 = smov (!%p202_p4, %s7274_s12), 1  ;;  %v7076_v6 = vld [vmem:[%s9167_s1 + $0x58] sm:$0xff]   ;;  %v7078_v8 = vld [vmem:[%s9167_s1 + $0x60] sm:$0xff]   ;;  %v7080_v10 = vld [vmem:[%s9167_s1 + $0x68] sm:$0xff]   ;;  %vm1318_vm4 = vcmask 1046532  }
  0x11   : > { %6534 = vmatpush3.bf16.msra.mxu0 %v7071_v1  ;;  %6343 = vmatprep.subr.bf16.mxu1 %v7072_v2  ;;  %v7077_v7 = vld [vmem:[%s9167_s1 + $0x118] sm:$0xff]   ;;  %s7045_s5 = smul.u32 216, %s9241_s12  ;;  %v7079_v9 = vld [vmem:[%s9167_s1 + $0x120] sm:$0xff]   ;;  %v7081_v11 = vld [vmem:[%s9167_s1 + $0x128] sm:$0xff]   ;;  %s5997_s26 = sshll.u32 %s9241_s12, 7 }
  0x12   : > { %6535 = vmatprep.subr.bf16.mxu0 %v7073_v3  ;;  %v7082_v25 = vld [vmem:[%s9167_s1 + $0x70] sm:$0xff]   ;;  %v7084_v36 = vld [vmem:[%s9167_s1 + $0x78] sm:$0xff]   ;;  %vm7390_vm2 = vmor %vm287_vm0, %vm288_vm1  ;;  %s9107_s29 = scalar_lea.vmem %s9169_s3, %s5997_s26 }
  0x13   : > { %s7358_s16 = scalar_lea.vmem %s9166_s0, %s7045_s5  ;;  %v7083_v30 = vld [vmem:[%s9167_s1 + $0x130] sm:$0xff]   ;;  %v7085_v51 = vld [vmem:[%s9167_s1 + $0x138] sm:$0xff]   ;;  %vm7636_vm5 = vmor %vm1317_vm3, %vm1318_vm4 }
  0x14   : > { %6344 = vmatpush3.bf16.msra.mxu1 %v7072_v2  ;;  %v223_v12 = vld [vmem:[%s7358_s16] sm:$0xf]  ;;  %v224_v13 = vld [vmem:[%s7358_s16 + $0x4] sm:$0xf]  ;;  %v271_v14 = vld [vmem:[%s7358_s16 + $0x8] sm:$0x1] }
  0x15   : > { %6536 = vmatpush3.bf16.msra.mxu0 %v7073_v3  ;;  %6345 = vmatprep.subr.bf16.mxu1 %v7074_v4  ;;  %v291_v15 = vshrl.u32 %v223_v12, 16  ;;  %v294_v16 = vshll.u32 %v223_v12, 16  ;;  %v300_v17 = vshll.u32 %v224_v13, 16  ;;  %v304_v18 = vshrl.u32 %v224_v13, 16  ;;  %v5570_v20 = vld [vmem:[%s7358_s16 + $0xc] sm:$0xf] }
  0x16   : > { %6537 = vmatprep.subr.bf16.mxu0 %v7075_v5  ;;  %v310_v19 = vshll.u32 %v271_v14, 16  ;;  %v7371_v23 = vld [vmem:[%s7358_s16 + $0x10] sm:$0xf]  ;;  %v7374_v24 = vld [vmem:[%s7358_s16 + $0x14] sm:$0x1]  ;;  %v2190_v29 = vshrl.u32 %v5570_v20, 16 }
  0x17   : > { %v293_v21 = vrot.slane %v291_v15, 4  ;;  %v296_v22 = vrot.slane %v294_v16, 5  ;;  %v302_v26 = vrot.slane %v300_v17, 5  ;;  %v306_v27 = vrot.slane %v304_v18, 4  ;;  %v225_v35 = vld [vmem:[%s7358_s16 + $0xc] sm:$0xf] }
  0x18   : > { %6346 = vmatpush3.bf16.msra.mxu1 %v7074_v4  ;;  %v312_v28 = vrot.slane %v310_v19, 5  ;;  %v2193_v32 = vshll.u32 %v5570_v20, 16  ;;  %v2199_v33 = vshll.u32 %v7371_v23, 16  ;;  %v2203_v34 = vshrl.u32 %v7371_v23, 16  ;;  %v226_v42 = vld [vmem:[%s7358_s16 + $0x10] sm:$0xf] }
  0x19   : > { %6538 = vmatpush3.bf16.msra.mxu0 %v7075_v5  ;;  %6347 = vmatprep.subr.bf16.mxu1 %v7076_v6  ;;  %v297_v31 = vor.u32 %v296_v22, %v293_v21  ;;  %v307_v38 = vor.u32 %v306_v27, %v302_v26  ;;  %v2192_v39 = vrot.slane %v2190_v29, 4  ;;  %v2209_v40 = vshll.u32 %v7374_v24, 16  ;;  %v272_v55 = vld [vmem:[%s7358_s16 + $0x14] sm:$0x1]  ;;  %v5573_v57 = vld [vmem:[%s7358_s16 + $0x18] sm:$0xf] }
  0x1a   : > { %6539 = vmatprep.subr.bf16.mxu0 %v7077_v7  ;;  %v2964_v41 = vrot.slane %v7374_v24, 5  ;;  %v2195_v44 = vrot.slane %v2193_v32, 5  ;;  %v2201_v45 = vrot.slane %v2199_v33, 5  ;;  %v2205_v46 = vrot.slane %v2203_v34, 4  ;;  %v7407_v62 = vld [vmem:[%s7358_s16 + $0x1c] sm:$0xf] }
  0x1b   : > { %v298_v43 = vrot.slane %v297_v31, 4  ;;  %v308_v47 = vrot.slane %v307_v38, 4  ;;  %v2211_v48 = vrot.slane %v2209_v40, 5  ;;  %v315_v49 = vshrl.u32 %v225_v35, 16  ;;  %v7086_v3 = vld [vmem:[%s9167_s1] sm:$0xff]  }
  0x1c   : > { %6348 = vmatpush3.bf16.msra.mxu1 %v7076_v6  ;;  %v318_v50 = vshll.u32 %v225_v35, 16  ;;  %v2196_v53 = vor.u32 %v2195_v44, %v2192_v39  ;;  %v2206_v54 = vor.u32 %v2205_v46, %v2201_v45  ;;  %v324_v56 = vshll.u32 %v226_v42, 16  ;;  %v7415_v4 = vld [vmem:[%s9167_s1 + $0x140] sm:$0xff]   ;;  %v227_v21 = vld [vmem:[%s7358_s16 + $0x18] sm:$0xf]  ;;  %v7089_v46 = vld [vmem:[%s9167_s1 + $0x8] sm:$0xff]  }
  0x1d   : > { %6540 = vmatpush3.bf16.msra.mxu0 %v7077_v7  ;;  %6349 = vmatprep.subr.bf16.mxu1 %v7078_v8  ;;  %v303_v52 = vsel %vm7390_vm2, %v298_v43, %v302_v26  ;;  %v313_v58 = vsel %vm7390_vm2, %v308_v47, %v312_v28  ;;  %v317_v59 = vrot.slane %v315_v49, 4  ;;  %v328_v61 = vshrl.u32 %v226_v42, 16  ;;  %v228_v28 = vld [vmem:[%s7358_s16 + $0x1c] sm:$0xf]  ;;  %v273_v33 = vld [vmem:[%s7358_s16 + $0x20] sm:$0x1] }
  0x1e   : > { %6541 = vmatprep.subr.bf16.mxu0 %v7079_v9  ;;  %v320_v60 = vrot.slane %v318_v50, 5  ;;  %v5394_v63 = vcombine.low %v303_v52, %v313_v58  ;;  %v2197_v0 = vrot.slane %v2196_v53, 4  ;;  %v2207_v1 = vrot.slane %v2206_v54, 4  ;;  %v5576_v39 = vld [vmem:[%s7358_s16 + $0x24] sm:$0xf] }
  0x1f   : > { %v326_v2 = vrot.slane %v324_v56, 5  ;;  %v330_v6 = vrot.slane %v328_v61, 4  ;;  %v334_v7 = vshll.u32 %v272_v55, 16  ;;  %v2217_v12 = vshll.u32 %v5573_v57, 16  ;;  %v229_v52 = vld [vmem:[%s7358_s16 + $0x24] sm:$0xf] }
  0x20   : > { %6350 = vmatpush3.bf16.msra.mxu1 %v7078_v8  ;;  %v321_v5 = vor.u32 %v320_v60, %v317_v59  ;;  %v7418_v8 = vld [vmem:[%s7358_s16 + $0x20] sm:$0x1]  ;;  %6357 = vmatprep.mubr.bf16.mxu1 %v5394_v63  ;;  %v2223_v19 = vshll.u32 %v7407_v62, 16  ;;  %v2227_v20 = vshrl.u32 %v7407_v62, 16  ;;  %v2968_v27 = vrot.slane %v7407_v62, 5  ;;  %v7088_v63 = vld [vmem:[%s9167_s1 + $0x148] sm:$0xff]  }
  0x21   : > { %6542 = vmatpush3.bf16.msra.mxu0 %v7079_v9  ;;  %6351 = vmatprep.subr.bf16.mxu1 %v7080_v10  ;;  %v2202_v9 = vsel %vm7390_vm2, %v2197_v0, %v2201_v45  ;;  %v331_v15 = vor.u32 %v330_v6, %v326_v2  ;;  %v336_v16 = vrot.slane %v334_v7, 5  ;;  %v2219_v18 = vrot.slane %v2217_v12, 5  ;;  %v7443_v45 = vld [vmem:[%s7358_s16 + $0x28] sm:$0xf] }
  0x22   : > { %6543 = vmatprep.subr.bf16.mxu0 %v7081_v11  ;;  %v322_v14 = vrot.slane %v321_v5, 4  ;;  %v2233_v26 = vshll.u32 %v7418_v8, 16  ;;  %v2229_v31 = vrot.slane %v2227_v20, 4  ;;  %v2971_v32 = vrot.slane %v7418_v8, 5  ;;  %v230_v5 = vld [vmem:[%s7358_s16 + $0x28] sm:$0xf] }
  0x23   : > { %v339_v38 = vshrl.u32 %v227_v21, 16  ;;  %v342_v44 = vshll.u32 %v227_v21, 16  ;;  %v352_v49 = vshrl.u32 %v228_v28, 16  ;;  %v358_v50 = vshll.u32 %v273_v33, 16  ;;  %v7474_v33 = vld [vmem:[%s7358_s16 + $0x34] sm:$0xf] }
  0x24   : > { %6352 = vmatpush3.bf16.msra.mxu1 %v7080_v10  ;;  %v2212_v10 = vsel %vm7390_vm2, %v2207_v1, %v2211_v48  ;;  %v327_v22 = vsel %vm7390_vm2, %v322_v14, %v326_v2  ;;  %v2235_v35 = vrot.slane %v2233_v26, 5  ;;  %v348_v48 = vshll.u32 %v228_v28, 16 }
  0x25   : > { %6544 = vmatpush3.bf16.msra.mxu0 %v7081_v11  ;;  %6353 = vmatprep.subr.bf16.mxu1 %v7082_v25  ;;  %v2214_v11 = vshrl.u32 %v5573_v57, 16  ;;  %v5634_v13 = vcombine.low %v2202_v9, %v2212_v10  ;;  %v341_v47 = vrot.slane %v339_v38, 4  ;;  %v344_v55 = vrot.slane %v342_v44, 5 }
  0x26   : > { %6545 = vmatprep.subr.bf16.mxu0 %v7083_v30  ;;  %v2238_v56 = vshrl.u32 %v5576_v39, 16  ;;  %v350_v57 = vrot.slane %v348_v48, 5  ;;  %v354_v58 = vrot.slane %v352_v49, 4  ;;  %v360_v59 = vrot.slane %v358_v50, 5  ;;  %v7091_v48 = vld [vmem:[%s9167_s1 + $0x158] sm:$0xff]  }
  0x27   : > { %v2216_v17 = vrot.slane %v2214_v11, 4  ;;  %6549 = vmatprep.mubr.bf16.mxu0 %v5634_v13  ;;  %v2241_v60 = vshll.u32 %v5576_v39, 16  ;;  %v345_v0 = vor.u32 %v344_v55, %v341_v47  ;;  %v2247_v2 = vshll.u32 %v7443_v45, 16  ;;  %v274_v11 = vld [vmem:[%s7358_s16 + $0x2c] sm:$0x1] }
  0x28   : > { %6354 = vmatpush3.bf16.msra.mxu1 %v7082_v25  ;;  %v332_v25 = vrot.slane %v331_v15, 4  ;;  %v2240_v1 = vrot.slane %v2238_v56, 4  ;;  %v355_v7 = vor.u32 %v354_v58, %v350_v57  ;;  %v2251_v10 = vshrl.u32 %v7443_v45, 16 }
  0x29   : > { %6546 = vmatpush3.bf16.msra.mxu0 %v7083_v30  ;;  %6355 = vmatprep.subr.bf16.mxu1 %v7084_v36  ;;  %v2220_v29 = vor.u32 %v2219_v18, %v2216_v17  ;;  %v2225_v30 = vrot.slane %v2223_v19, 5  ;;  %v2243_v9 = vrot.slane %v2241_v60, 5  ;;  %v346_v12 = vrot.slane %v345_v0, 4  ;;  %v7098_v60 = vld [vmem:[%s9167_s1 + $0x20] sm:$0xff]  }
  0x2a   : > { %6547 = vmatprep.subr.bf16.mxu0 %v7085_v51  ;;  %v337_v34 = vsel %vm7390_vm2, %v332_v25, %v336_v16  ;;  %v2249_v13 = vrot.slane %v2247_v2, 5  ;;  %v363_v15 = vshrl.u32 %v229_v52, 16  ;;  %v5579_v16 = vld [vmem:[%s7358_s16 + $0x30] sm:$0xf]  ;;  %v356_v17 = vrot.slane %v355_v7, 4 }
  0x2b   : > { %v5395_v40 = vcombine.low %v327_v22, %v337_v34  ;;  %v2221_v42 = vrot.slane %v2220_v29, 4  ;;  %v2230_v43 = vor.u32 %v2229_v31, %v2225_v30  ;;  %v2244_v18 = vor.u32 %v2243_v9, %v2240_v1  ;;  %v7095_v34 = vld [vmem:[%s9167_s1 + $0x18] sm:$0xff]  }
  0x2c   : > { %6356 = vmatpush3.bf16.msra.mxu1 %v7084_v36  ;;  %v7439_v36 = vrot.slane %v2968_v27, 4  ;;  %v2253_v19 = vrot.slane %v2251_v10, 4  ;;  %v366_v20 = vshll.u32 %v229_v52, 16  ;;  %v351_v21 = vsel %vm7390_vm2, %v346_v12, %v350_v57  ;;  %v275_v2 = vld [vmem:[%s7358_s16 + $0x38] sm:$0x1] }
  0x2d   : > { %6548 = vmatpush3.bf16.msra.mxu0 %v7085_v51  ;;  %6389 = vmatprep.subr.bf16.mxu1 %v7086_v3  ;;  %v7449_v51 = vld [vmem:[%s7358_s16 + $0x2c] sm:$0x1]  ;;  %v2226_v53 = vsel %vm7390_vm2, %v2221_v42, %v2225_v30  ;;  %v2231_v54 = vrot.slane %v2230_v43, 4  ;;  %v365_v25 = vrot.slane %v363_v15, 4  ;;  %v372_v26 = vshll.u32 %v230_v5, 16 }
  0x2e   : > { %6581 = vmatprep.subr.bf16.mxu0 %v7415_v4  ;;  %v2257_v14 = vshll.u32 %v7449_v51, 16  ;;  %v361_v28 = vsel %vm7390_vm2, %v356_v17, %v360_v59  ;;  %v2245_v29 = vrot.slane %v2244_v18, 4  ;;  %v2254_v30 = vor.u32 %v2253_v19, %v2249_v13  ;;  %v232_v59 = vld [vmem:[%s7358_s16 + $0x34] sm:$0xf]  ;;  %v5582_v9 = vld [vmem:[%s7358_s16 + $0x3c] sm:$0xf] }
  0x2f   : > { %6358 = vmatmul.mubr.bf16.vlgmr.msra.gmra.mrb[0].mxu1 %v5395_v40  ;;  %v2236_v61 = vsel %vm7390_vm2, %v2231_v54, %v2235_v35  ;;  %v368_v31 = vrot.slane %v366_v20, 5  ;;  %v5396_v35 = vcombine.low %v351_v21, %v361_v28  ;;  %v374_v38 = vrot.slane %v372_v26, 5  ;;  %v231_v54 = vld [vmem:[%s7358_s16 + $0x30] sm:$0xf]  ;;  %v7508_v19 = vld [vmem:[%s7358_s16 + $0x40] sm:$0xf] }
  0x30   : > { %6390 = vmatpush3.bf16.msra.mxu1 %v7086_v3  ;;  %v7092_v3 = vld [vmem:[%s9167_s1 + $0x10] sm:$0xff]   ;;  %v5635_v6 = vcombine.low %v2226_v53, %v2236_v61  ;;  %v2259_v22 = vrot.slane %v2257_v14, 5  ;;  %v376_v39 = vshrl.u32 %v230_v5, 16  ;;  %v382_v40 = vshll.u32 %v274_v11, 16  ;;  %v7100_v14 = vld [vmem:[%s9167_s1 + $0x28] sm:$0xff]   ;;  %v7093_v20 = vld [vmem:[%s9167_s1 + $0x160] sm:$0xff]  }
  0x31   : > { %6391 = vmatprep.subr.bf16.mxu1 %v7089_v46  ;;  %v2250_v42 = vsel %vm7390_vm2, %v2245_v29, %v2249_v13  ;;  %v2255_v43 = vrot.slane %v2254_v30, 4  ;;  %v369_v44 = vor.u32 %v368_v31, %v365_v25  ;;  %v2262_v47 = vshrl.u32 %v5579_v16, 16  ;;  %6361 = vmatprep.mubr.bf16.mxu1 %v5396_v35  ;;  %v7516_v28 = vld [vmem:[%s7358_s16 + $0x44] sm:$0x1]  ;;  %v7102_v35 = vld [vmem:[%s9167_s1 + $0x30] sm:$0xff]  }
  0x32   : > { %6550 = vmatmul.mubr.bf16.vlgmr.msra.gmra.mrb[0].mxu0 %v5635_v6  ;;  %v378_v49 = vrot.slane %v376_v39, 4  ;;  %v384_v50 = vrot.slane %v382_v40, 5  ;;  %v2265_v52 = vshll.u32 %v5579_v16, 16  ;;  %v2271_v53 = vshll.u32 %v7474_v33, 16 }
  0x33   : > { %6582 = vmatpush3.bf16.msra.mxu0 %v7415_v4  ;;  %v7090_v4 = vld [vmem:[%s9167_s1 + $0x150] sm:$0xff]   ;;  %v2260_v55 = vsel %vm7390_vm2, %v2255_v43, %v2259_v22  ;;  %v370_v56 = vrot.slane %v369_v44, 4  ;;  %v2264_v57 = vrot.slane %v2262_v47, 4  ;;  %v2275_v58 = vshrl.u32 %v7474_v33, 16 }
  0x34   : > { %6392 = vmatpush3.bf16.msra.mxu1 %v7089_v46  ;;  %6583 = vmatprep.subr.bf16.mxu0 %v7088_v63  ;;  %v7485_v46 = vld [vmem:[%s7358_s16 + $0x38] sm:$0x1]  ;;  %v5636_v61 = vcombine.low %v2250_v42, %v2260_v55  ;;  %v2267_v0 = vrot.slane %v2265_v52, 5  ;;  %v2273_v1 = vrot.slane %v2271_v53, 5  ;;  %v387_v7 = vshrl.u32 %v231_v54, 16 }
  0x35   : > { %6393 = vmatprep.subr.bf16.mxu1 %v7092_v3  ;;  %v375_v5 = vsel %vm7390_vm2, %v370_v56, %v374_v38  ;;  %v2281_v6 = vshll.u32 %v7485_v46, 16  ;;  %v390_v12 = vshll.u32 %v231_v54, 16  ;;  %v396_v13 = vshll.u32 %v232_v59, 16  ;;  %v234_v55 = vld [vmem:[%s7358_s16 + $0x40] sm:$0xf] }
  0x36   : > { %6553 = vmatprep.mubr.bf16.mxu0 %v5636_v61  ;;  %v2268_v11 = vor.u32 %v2267_v0, %v2264_v57  ;;  %v389_v17 = vrot.slane %v387_v7, 4  ;;  %v400_v18 = vshrl.u32 %v232_v59, 16  ;;  %v2286_v40 = vshrl.u32 %v5582_v9, 16 }
  0x37   : > { %6584 = vmatpush3.bf16.msra.mxu0 %v7088_v63  ;;  %v379_v63 = vor.u32 %v378_v49, %v374_v38  ;;  %v2283_v16 = vrot.slane %v2281_v6, 5  ;;  %v392_v25 = vrot.slane %v390_v12, 5  ;;  %v398_v26 = vrot.slane %v396_v13, 5 }
  0x38   : > { %6394 = vmatpush3.bf16.msra.mxu1 %v7092_v3  ;;  %6585 = vmatprep.subr.bf16.mxu0 %v7090_v4  ;;  %v2277_v3 = vrot.slane %v2275_v58, 4  ;;  %v2269_v22 = vrot.slane %v2268_v11, 4  ;;  %v402_v31 = vrot.slane %v400_v18, 4  ;;  %v2289_v42 = vshll.u32 %v5582_v9, 16  ;;  %v5585_v9 = vld [vmem:[%s7358_s16 + $0x48] sm:$0xf] }
  0x39   : > { %6395 = vmatprep.subr.bf16.mxu1 %v7095_v34  ;;  %v380_v10 = vrot.slane %v379_v63, 4  ;;  %v393_v39 = vor.u32 %v392_v25, %v389_v17  ;;  %v2295_v49 = vshll.u32 %v7508_v19, 16  ;;  %v2288_v53 = vrot.slane %v2286_v40, 4  ;;  %v276_v63 = vld [vmem:[%s7358_s16 + $0x44] sm:$0x1] }
  0x3a   : > { %v2278_v15 = vor.u32 %v2277_v3, %v2273_v1  ;;  %v2274_v38 = vsel %vm7390_vm2, %v2269_v22, %v2273_v1  ;;  %v403_v44 = vor.u32 %v402_v31, %v398_v26  ;;  %v2291_v54 = vrot.slane %v2289_v42, 5  ;;  %v7549_v22 = vld [vmem:[%s7358_s16 + $0x50] sm:$0x1]  ;;  %v7097_v31 = vld [vmem:[%s9167_s1 + $0x178] sm:$0xff]  }
  0x3b   : > { %6586 = vmatpush3.bf16.msra.mxu0 %v7090_v4  ;;  %v385_v21 = vsel %vm7390_vm2, %v380_v10, %v384_v50  ;;  %v406_v4 = vshll.u32 %v275_v2, 16  ;;  %v394_v52 = vrot.slane %v393_v39, 4  ;;  %v2297_v57 = vrot.slane %v2295_v49, 5  ;;  %v7104_v2 = vld [vmem:[%s9167_s1 + $0x38] sm:$0xff]  }
  0x3c   : > { %6396 = vmatpush3.bf16.msra.mxu1 %v7095_v34  ;;  %6587 = vmatprep.subr.bf16.mxu0 %v7091_v48  ;;  %v5397_v29 = vcombine.low %v375_v5, %v385_v21  ;;  %v2279_v30 = vrot.slane %v2278_v15, 4  ;;  %v233_v34 = vld [vmem:[%s7358_s16 + $0x3c] sm:$0xf]  ;;  %v404_v56 = vrot.slane %v403_v44, 4  ;;  %v2299_v58 = vshrl.u32 %v7508_v19, 16  ;;  %v7096_v15 = vld [vmem:[%s9167_s1 + $0x170] sm:$0xff]  }
  0x3d   : > { %6397 = vmatprep.subr.bf16.mxu1 %v7098_v60  ;;  %v408_v47 = vrot.slane %v406_v4, 5  ;;  %v2305_v59 = vshll.u32 %v7516_v28, 16  ;;  %v2292_v61 = vor.u32 %v2291_v54, %v2288_v53  ;;  %v411_v0 = vshrl.u32 %v233_v34, 16  ;;  %v7560_v4 = vld [vmem:[%s9167_s1 + $0x80] sm:$0xff]   ;;  %v236_v53 = vld [vmem:[%s7358_s16 + $0x4c] sm:$0xf] }
  0x3e   : > { %6362 = vmatmul.mubr.bf16.gmra.mrb[4].mxu1 %v5397_v29  ;;  %v2284_v43 = vsel %vm7390_vm2, %v2279_v30, %v2283_v16  ;;  %v414_v1 = vshll.u32 %v233_v34, 16  ;;  %v2301_v3 = vrot.slane %v2299_v58, 4  ;;  %v420_v7 = vshll.u32 %v234_v55, 16  ;;  %v235_v30 = vld [vmem:[%s7358_s16 + $0x48] sm:$0xf] }
  0x3f   : > { %6588 = vmatpush3.bf16.msra.mxu0 %v7091_v48  ;;  %v5637_v50 = vcombine.low %v2274_v38, %v2284_v43  ;;  %v7094_v48 = vld [vmem:[%s9167_s1 + $0x168] sm:$0xff]   ;;  %v409_v5 = vsel %vm7390_vm2, %v404_v56, %v408_v47  ;;  %v2307_v6 = vrot.slane %v2305_v59, 5  ;;  %v2293_v11 = vrot.slane %v2292_v61, 4  ;;  %v277_v54 = vld [vmem:[%s7358_s16 + $0x50] sm:$0x1] }
  0x40   : > { %6398 = vmatpush3.bf16.msra.mxu1 %v7098_v60  ;;  %6589 = vmatprep.subr.bf16.mxu0 %v7093_v20  ;;  %v399_v60 = vsel %vm7390_vm2, %v394_v52, %v398_v26  ;;  %v413_v12 = vrot.slane %v411_v0, 4  ;;  %v416_v13 = vrot.slane %v414_v1, 5  ;;  %v2302_v16 = vor.u32 %v2301_v3, %v2297_v57  ;;  %v5588_v58 = vld [vmem:[%s7358_s16 + $0x54] sm:$0xf]  ;;  %v7574_v0 = vld [vmem:[%s7358_s16 + $0x58] sm:$0xf] }
  0x41   : > { %6399 = vmatprep.subr.bf16.mxu1 %v7100_v14  ;;  %6554 = vmatmul.mubr.bf16.gmra.mrb[4].mxu0 %v5637_v50  ;;  %v5398_v10 = vcombine.low %v399_v60, %v409_v5  ;;  %v422_v17 = vrot.slane %v420_v7, 5  ;;  %v424_v18 = vshrl.u32 %v234_v55, 16  ;;  %v430_v21 = vshll.u32 %v276_v63, 16 }
  0x42   : > { %v417_v25 = vor.u32 %v416_v13, %v413_v12  ;;  %v2310_v26 = vshrl.u32 %v5585_v9, 16  ;;  %v2313_v29 = vshll.u32 %v5585_v9, 16  ;;  %v2303_v34 = vrot.slane %v2302_v16, 4 }
  0x43   : > { %6590 = vmatpush3.bf16.msra.mxu0 %v7093_v20  ;;  %6365 = vmatprep.mubr.bf16.mxu1 %v5398_v10  ;;  %v2298_v20 = vsel %vm7390_vm2, %v2293_v11, %v2297_v57  ;;  %v432_v38 = vrot.slane %v430_v21, 5  ;;  %v2329_v52 = vshll.u32 %v7549_v22, 16  ;;  %v435_v61 = vshrl.u32 %v235_v30, 16 }
  0x44   : > { %6400 = vmatpush3.bf16.msra.mxu1 %v7100_v14  ;;  %v7543_v14 = vld [vmem:[%s7358_s16 + $0x4c] sm:$0xf]  ;;  %6591 = vmatprep.subr.bf16.mxu0 %v7094_v48  ;;  %v418_v40 = vrot.slane %v417_v25, 4  ;;  %v2312_v42 = vrot.slane %v2310_v26, 4  ;;  %v2315_v43 = vrot.slane %v2313_v29, 5  ;;  %v2308_v47 = vsel %vm7390_vm2, %v2303_v34, %v2307_v6  ;;  %v7579_v6 = vld [vmem:[%s9167_s1 + $0x180] sm:$0xff]  }
  0x45   : > { %6401 = vmatprep.subr.bf16.mxu1 %v7102_v35  ;;  %v2319_v39 = vshll.u32 %v7543_v14, 16  ;;  %v2323_v44 = vshrl.u32 %v7543_v14, 16  ;;  %v5638_v55 = vcombine.low %v2298_v20, %v2308_v47  ;;  %v2331_v60 = vrot.slane %v2329_v52, 5  ;;  %v7586_v20 = vld [vmem:[%s7358_s16 + $0x5c] sm:$0x1] }
  0x46   : > { %v2316_v56 = vor.u32 %v2315_v43, %v2312_v42  ;;  %v438_v63 = vshll.u32 %v235_v30, 16  ;;  %v448_v3 = vshrl.u32 %v236_v53, 16  ;;  %v437_v9 = vrot.slane %v435_v61, 4  ;;  %v238_v43 = vld [vmem:[%s7358_s16 + $0x58] sm:$0xf] }
  0x47   : > { %6592 = vmatpush3.bf16.msra.mxu0 %v7094_v48  ;;  %v2321_v50 = vrot.slane %v2319_v39, 5  ;;  %v423_v48 = vsel %vm7390_vm2, %v418_v40, %v422_v17  ;;  %v2325_v57 = vrot.slane %v2323_v44, 4  ;;  %6557 = vmatprep.mubr.bf16.mxu0 %v5638_v55  ;;  %v454_v11 = vshll.u32 %v277_v54, 16  ;;  %v5591_v52 = vld [vmem:[%s7358_s16 + $0x60] sm:$0xf] }
  0x48   : > { %6402 = vmatpush3.bf16.msra.mxu1 %v7102_v35  ;;  %v426_v35 = vrot.slane %v424_v18, 4  ;;  %6593 = vmatprep.subr.bf16.mxu0 %v7096_v15  ;;  %v2317_v1 = vrot.slane %v2316_v56, 4  ;;  %v440_v10 = vrot.slane %v438_v63, 5  ;;  %v450_v18 = vrot.slane %v448_v3, 4 }
  0x49   : > { %6403 = vmatprep.subr.bf16.mxu1 %v7104_v2  ;;  %v2326_v5 = vor.u32 %v2325_v57, %v2321_v50  ;;  %v456_v21 = vrot.slane %v454_v11, 5  ;;  %v2334_v25 = vshrl.u32 %v5588_v58, 16  ;;  %v2337_v29 = vshll.u32 %v5588_v58, 16 }
  0x4a   : > { %v427_v49 = vor.u32 %v426_v35, %v422_v17  ;;  %v2322_v13 = vsel %vm7390_vm2, %v2317_v1, %v2321_v50  ;;  %v441_v17 = vor.u32 %v440_v10, %v437_v9  ;;  %v2343_v30 = vshll.u32 %v7574_v0, 16  ;;  %v237_v35 = vld [vmem:[%s7358_s16 + $0x54] sm:$0xf]  ;;  %v278_v50 = vld [vmem:[%s7358_s16 + $0x5c] sm:$0x1] }
  0x4b   : > { %6594 = vmatpush3.bf16.msra.mxu0 %v7096_v15  ;;  %v2327_v15 = vrot.slane %v2326_v5, 4  ;;  %v2347_v34 = vshrl.u32 %v7574_v0, 16  ;;  %v2336_v42 = vrot.slane %v2334_v25, 4  ;;  %v459_v55 = vshrl.u32 %v237_v35, 16  ;;  %v7614_v25 = vld [vmem:[%s7358_s16 + $0x60] sm:$0xf] }
  0x4c   : > { %6404 = vmatpush3.bf16.msra.mxu1 %v7104_v2  ;;  %v428_v59 = vrot.slane %v427_v49, 4  ;;  %v444_v2 = vshll.u32 %v236_v53, 16  ;;  %6595 = vmatprep.subr.bf16.mxu0 %v7097_v31  ;;  %v442_v39 = vrot.slane %v441_v17, 4  ;;  %v2345_v44 = vrot.slane %v2343_v30, 5  ;;  %v7610_v17 = vld [vmem:[%s7358_s16 + $0x68] sm:$0x1] }
  0x4d   : > { %6437 = vmatprep.subr.bf16.mxu1 %v7560_v4  ;;  %v2332_v26 = vsel %vm7390_vm2, %v2327_v15, %v2331_v60  ;;  %v2349_v47 = vrot.slane %v2347_v34, 4  ;;  %v2353_v49 = vshll.u32 %v7586_v20, 16  ;;  %v7601_v60 = vld [vmem:[%s7358_s16 + $0x64] sm:$0xf]  ;;  %v461_v63 = vrot.slane %v459_v55, 4 }
  0x4e   : > { %v433_v7 = vsel %vm7390_vm2, %v428_v59, %v432_v38  ;;  %v446_v16 = vrot.slane %v444_v2, 5  ;;  %v5639_v38 = vcombine.low %v2322_v13, %v2332_v26  ;;  %v468_v59 = vshll.u32 %v238_v43, 16 }
  0x4f   : > { %v5399_v12 = vcombine.low %v423_v48, %v433_v7  ;;  %6596 = vmatpush3.bf16.msra.mxu0 %v7097_v31  ;;  %v2339_v31 = vrot.slane %v2337_v29, 5  ;;  %v462_v48 = vshll.u32 %v237_v35, 16  ;;  %v2350_v57 = vor.u32 %v2349_v47, %v2345_v44  ;;  %v7617_v35 = vld [vmem:[%s7358_s16 + $0x64] sm:$0xf] }
  0x50   : > { %6629 = vmatprep.subr.bf16.mxu0 %v7579_v6  ;;  %v451_v40 = vor.u32 %v450_v18, %v446_v16  ;;  %6558 = vmatmul.mubr.bf16.gmra.mrb[8].mxu0 %v5639_v38  ;;  %v447_v53 = vsel %vm7390_vm2, %v442_v39, %v446_v16  ;;  %v2355_v58 = vrot.slane %v2353_v49, 5  ;;  %v472_v5 = vshrl.u32 %v238_v43, 16  ;;  %v279_v43 = vld [vmem:[%s7358_s16 + $0x68] sm:$0x1] }
  0x51   : > { %6366 = vmatmul.mubr.bf16.gmra.mrb[8].mxu1 %v5399_v12  ;;  %v2340_v56 = vor.u32 %v2339_v31, %v2336_v42  ;;  %v464_v1 = vrot.slane %v462_v48, 5  ;;  %v2351_v7 = vrot.slane %v2350_v57, 4  ;;  %v470_v9 = vrot.slane %v468_v59, 5 }
  0x52   : > { %v452_v54 = vrot.slane %v451_v40, 4  ;;  %v474_v11 = vrot.slane %v472_v5, 4  ;;  %v478_v12 = vshll.u32 %v278_v50, 16  ;;  %v2358_v13 = vshrl.u32 %v5591_v52, 16  ;;  %v5658_v50 = vld [vmem:[%s7358_s16 + $0xc] sm:$0xe] }
  0x53   : > { %v2341_v3 = vrot.slane %v2340_v56, 4  ;;  %v465_v10 = vor.u32 %v464_v1, %v461_v63  ;;  %v2356_v16 = vsel %vm7390_vm2, %v2351_v7, %v2355_v58  ;;  %v2361_v18 = vshll.u32 %v5591_v52, 16  ;;  %v7632_v5 = vld [vmem:[%s7358_s16 + $0x6c] sm:$0xf] }
  0x54   : > { %v457_v61 = vsel %vm7390_vm2, %v452_v54, %v456_v21  ;;  %v2367_v21 = vshll.u32 %v7601_v60, 16  ;;  %v475_v30 = vor.u32 %v474_v11, %v470_v9  ;;  %v480_v34 = vrot.slane %v478_v12, 5 }
  0x55   : > { %v5400_v2 = vcombine.low %v447_v53, %v457_v61  ;;  %v2346_v15 = vsel %vm7390_vm2, %v2341_v3, %v2345_v44  ;;  %v466_v29 = vrot.slane %v465_v10, 4  ;;  %v2360_v38 = vrot.slane %v2358_v13, 4 }
  0x56   : > { %v5640_v26 = vcombine.low %v2346_v15, %v2356_v16  ;;  %v2363_v39 = vrot.slane %v2361_v18, 5  ;;  %v2369_v40 = vrot.slane %v2367_v21, 5  ;;  %v2371_v42 = vshrl.u32 %v7601_v60, 16  ;;  %v7644_v21 = vld [vmem:[%s7358_s16 + $0x70] sm:$0xf] }
  0x57   : > { %6369 = vmatprep.mubr.bf16.mxu1 %v5400_v2  ;;  %v471_v31 = vsel %vm7390_vm2, %v466_v29, %v470_v9  ;;  %v476_v44 = vrot.slane %v475_v30, 4  ;;  %v2377_v47 = vshll.u32 %v7610_v17, 16  ;;  %v483_v49 = vshrl.u32 %v7614_v25, 16  ;;  %v7188_v9 = vld [vmem:[%s7358_s16 + $0xb4] sm:$0xff]  }
  0x58   : > { %6561 = vmatprep.mubr.bf16.mxu0 %v5640_v26  ;;  %v2364_v52 = vor.u32 %v2363_v39, %v2360_v38  ;;  %v2373_v53 = vrot.slane %v2371_v42, 4  ;;  %v486_v54 = vshll.u32 %v7614_v25, 16  ;;  %v492_v55 = vshll.u32 %v7617_v35, 16 }
  0x59   : > { %v481_v48 = vsel %vm7390_vm2, %v476_v44, %v480_v34  ;;  %v2379_v56 = vrot.slane %v2377_v47, 5  ;;  %v485_v57 = vrot.slane %v483_v49, 4  ;;  %v496_v58 = vshrl.u32 %v7617_v35, 16  ;;  %v7655_v47 = vld [vmem:[%s7358_s16 + $0x78] sm:$0xf] }
  0x5a   : > { %v5401_v59 = vcombine.low %v471_v31, %v481_v48  ;;  %v2365_v61 = vrot.slane %v2364_v52, 4  ;;  %v2374_v63 = vor.u32 %v2373_v53, %v2369_v40  ;;  %v488_v1 = vrot.slane %v486_v54, 5  ;;  %v7666_v54 = vld [vmem:[%s7358_s16 + $0x7c] sm:$0xf] }
  0x5b   : > { %v494_v2 = vrot.slane %v492_v55, 5  ;;  %v498_v3 = vrot.slane %v496_v58, 4  ;;  %v502_v7 = vshll.u32 %v279_v43, 16  ;;  %v5674_v10 = vrot.slane %v5658_v50, 9  ;;  %v281_v58 = vld [vmem:[%s7358_s16 + $0x80] sm:$0x1] }
  0x5c   : > { %6370 = vmatmul.mubr.bf16.gmra.mrb[12].mxu1 %v5401_v59  ;;  %v2370_v11 = vsel %vm7390_vm2, %v2365_v61, %v2369_v40  ;;  %v2375_v12 = vrot.slane %v2374_v63, 4  ;;  %v489_v13 = vor.u32 %v488_v1, %v485_v57  ;;  %v2961_v15 = vrot.slane %v7371_v23, 5  ;;  %v280_v40 = vld [vmem:[%s7358_s16 + $0x74] sm:$0x1]  ;;  %v5659_v23 = vld [vmem:[%s7358_s16 + $0x18] sm:$0xe] }
  0x5d   : > { %v499_v16 = vor.u32 %v498_v3, %v494_v2  ;;  %v504_v18 = vrot.slane %v502_v7, 5  ;;  %v507_v26 = vshrl.u32 %v7632_v5, 16  ;;  %v510_v29 = vshll.u32 %v7632_v5, 16 }
  0x5e   : > { %v2380_v30 = vsel %vm7390_vm2, %v2375_v12, %v2379_v56  ;;  %v490_v34 = vrot.slane %v489_v13, 4  ;;  %v2962_v38 = vsel %vm7636_vm5, %v5674_v10, %v2961_v15  ;;  %v2963_v39 = vrot.slane %v2961_v15, 4  ;;  %v5660_v13 = vld [vmem:[%s7358_s16 + $0x24] sm:$0xe] }
  0x5f   : > { %v5641_v42 = vcombine.low %v2370_v11, %v2380_v30  ;;  %v500_v43 = vrot.slane %v499_v16, 4  ;;  %v509_v31 = vrot.slane %v507_v26, 4  ;;  %v512_v44 = vrot.slane %v510_v29, 5  ;;  %v7688_v16 = vld [vmem:[%s7358_s16 + $0x84] sm:$0xf]  ;;  %v7101_v29 = vld [vmem:[%s9167_s1 + $0x188] sm:$0xff]  }
  0x60   : > { %v495_v49 = vsel %vm7390_vm2, %v490_v34, %v494_v2  ;;  %v2965_v50 = vsel %vm7636_vm5, %v2963_v39, %v2964_v41  ;;  %v516_v52 = vshll.u32 %v7644_v21, 16  ;;  %v520_v53 = vshrl.u32 %v7644_v21, 16 }
  0x61   : > { %6562 = vmatmul.mubr.bf16.gmra.mrb[12].mxu0 %v5641_v42  ;;  %v505_v55 = vsel %vm7390_vm2, %v500_v43, %v504_v18  ;;  %v5706_v48 = vcombine.low %v2962_v38, %v2965_v50  ;;  %v513_v56 = vor.u32 %v512_v44, %v509_v31  ;;  %v526_v57 = vshll.u32 %v280_v40, 16  ;;  %v7696_v40 = vld [vmem:[%s7358_s16 + $0x88] sm:$0xf]  ;;  %v282_v31 = vld [vmem:[%s7358_s16 + $0x8c] sm:$0x1] }
  0x62   : > { %v5402_v59 = vcombine.low %v495_v49, %v505_v55  ;;  %v518_v24 = vrot.slane %v516_v52, 5  ;;  %v522_v61 = vrot.slane %v520_v53, 4  ;;  %v5675_v63 = vrot.slane %v5659_v23, 9 }
  0x63   : > { %6597 = vmatprep.mubr.bf16.mxu0 %v5706_v48  ;;  %v514_v41 = vrot.slane %v513_v56, 4  ;;  %v528_v1 = vrot.slane %v526_v57, 5  ;;  %v2972_v2 = vsel %vm7636_vm5, %v7439_v36, %v2971_v32  ;;  %v531_v3 = vshrl.u32 %v7655_v47, 16 }
  0x64   : > { %6373 = vmatprep.mubr.bf16.mxu1 %v5402_v59  ;;  %v523_v7 = vor.u32 %v522_v61, %v518_v24  ;;  %v2969_v10 = vsel %vm7636_vm5, %v5675_v63, %v2968_v27  ;;  %v534_v11 = vshll.u32 %v7655_v47, 16  ;;  %v540_v12 = vshll.u32 %v7666_v54, 16 }
  0x65   : > { %v519_v8 = vsel %vm7390_vm2, %v514_v41, %v518_v24  ;;  %v5707_v15 = vcombine.low %v2969_v10, %v2972_v2  ;;  %v533_v32 = vrot.slane %v531_v3, 4  ;;  %v544_v36 = vshrl.u32 %v7666_v54, 16  ;;  %v7717_v2 = vld [vmem:[%s7358_s16 + $0x90] sm:$0xf]  ;;  %v7720_v3 = vld [vmem:[%s7358_s16 + $0x94] sm:$0xf] }
  0x66   : > { %v524_v62 = vrot.slane %v523_v7, 4  ;;  %v536_v18 = vrot.slane %v534_v11, 5  ;;  %v542_v26 = vrot.slane %v540_v12, 5  ;;  %v550_v27 = vshll.u32 %v281_v58, 16 }
  0x67   : > { %v546_v30 = vrot.slane %v544_v36, 4  ;;  %v5676_v34 = vrot.slane %v5660_v13, 9  ;;  %v2975_v38 = vrot.slane %v7443_v45, 5  ;;  %v2978_v39 = vrot.slane %v7449_v51, 5  ;;  %v5661_v45 = vld [vmem:[%s7358_s16 + $0x30] sm:$0xe] }
  0x68   : > { %v529_v23 = vsel %vm7390_vm2, %v524_v62, %v528_v1  ;;  %v537_v42 = vor.u32 %v536_v18, %v533_v32  ;;  %v552_v43 = vrot.slane %v550_v27, 5  ;;  %v555_v44 = vshrl.u32 %v7688_v16, 16  ;;  %v283_v62 = vld [vmem:[%s7358_s16 + $0x98] sm:$0x1] }
  0x69   : > { %v5403_v49 = vcombine.low %v519_v8, %v529_v23  ;;  %6598 = vmatmul.mubr.bf16.vlgmr.msra.gmra.mrb[0].mxu0 %v5707_v15  ;;  %v547_v50 = vor.u32 %v546_v30, %v542_v26  ;;  %v2976_v52 = vsel %vm7636_vm5, %v5676_v34, %v2975_v38  ;;  %v2977_v53 = vrot.slane %v2975_v38, 4  ;;  %v7105_v30 = vld [vmem:[%s9167_s1 + $0x198] sm:$0xff]  }
  0x6a   : > { %6630 = vmatpush3.bf16.msra.mxu0 %v7579_v6  ;;  %v538_v51 = vrot.slane %v537_v42, 4  ;;  %v557_v55 = vrot.slane %v555_v44, 4  ;;  %v558_v48 = vshll.u32 %v7688_v16, 16  ;;  %v564_v56 = vshll.u32 %v7696_v40, 16  ;;  %v7103_v6 = vld [vmem:[%s9167_s1 + $0x190] sm:$0xff]  }
  0x6b   : > { %6374 = vmatmul.mubr.bf16.gmra.mrb[16].mxu1 %v5403_v49  ;;  %v548_v57 = vrot.slane %v547_v50, 4  ;;  %v2979_v58 = vsel %vm7636_vm5, %v2977_v53, %v2978_v39  ;;  %v568_v59 = vshrl.u32 %v7696_v40, 16  ;;  %v574_v24 = vshll.u32 %v282_v31, 16  ;;  %6631 = vmatprep.subr.bf16.mxu0 %v7101_v29  ;;  %v5662_v38 = vld [vmem:[%s7358_s16 + $0x3c] sm:$0xe] }
  0x6c   : > { %v543_v61 = vsel %vm7390_vm2, %v538_v51, %v542_v26  ;;  %v5708_v63 = vcombine.low %v2976_v52, %v2979_v58  ;;  %v560_v41 = vrot.slane %v558_v48, 5  ;;  %v566_v1 = vrot.slane %v564_v56, 5  ;;  %v7738_v31 = vld [vmem:[%s7358_s16 + $0x9c] sm:$0xf]  ;;  %v7747_v48 = vld [vmem:[%s7358_s16 + $0xa0] sm:$0xf] }
  0x6d   : > { %v553_v7 = vsel %vm7390_vm2, %v548_v57, %v552_v43  ;;  %v570_v10 = vrot.slane %v568_v59, 4  ;;  %v576_v11 = vrot.slane %v574_v24, 5  ;;  %v5677_v12 = vrot.slane %v5661_v45, 9  ;;  %v7109_v56 = vld [vmem:[%s9167_s1 + $0x1a0] sm:$0xff]  }
  0x6e   : > { %v5404_v13 = vcombine.low %v543_v61, %v553_v7  ;;  %6601 = vmatprep.mubr.bf16.mxu0 %v5708_v63  ;;  %v561_v8 = vor.u32 %v560_v41, %v557_v55  ;;  %v2982_v15 = vrot.slane %v7474_v33, 5  ;;  %v2985_v32 = vrot.slane %v7485_v46, 5  ;;  %6632 = vmatpush3.bf16.msra.mxu0 %v7101_v29  ;;  %v284_v61 = vld [vmem:[%s7358_s16 + $0xa4] sm:$0x1] }
  0x6f   : > { %v571_v36 = vor.u32 %v570_v10, %v566_v1  ;;  %v579_v18 = vshrl.u32 %v7717_v2, 16  ;;  %v582_v26 = vshll.u32 %v7717_v2, 16  ;;  %v588_v27 = vshll.u32 %v7720_v3, 16  ;;  %6633 = vmatprep.subr.bf16.mxu0 %v7103_v6 }
  0x70   : > { %6377 = vmatprep.mubr.bf16.mxu1 %v5404_v13  ;;  %v562_v34 = vrot.slane %v561_v8, 4  ;;  %v2983_v33 = vsel %vm7636_vm5, %v5677_v12, %v2982_v15  ;;  %v2984_v46 = vrot.slane %v2982_v15, 4  ;;  %v592_v29 = vshrl.u32 %v7720_v3, 16  ;;  %v5663_v15 = vld [vmem:[%s7358_s16 + $0x48] sm:$0xe] }
  0x71   : > { %v572_v39 = vrot.slane %v571_v36, 4  ;;  %v581_v23 = vrot.slane %v579_v18, 4  ;;  %v584_v42 = vrot.slane %v582_v26, 5  ;;  %v590_v43 = vrot.slane %v588_v27, 5  ;;  %v7772_v27 = vld [vmem:[%s7358_s16 + $0xa8] sm:$0xf] }
  0x72   : > { %v567_v44 = vsel %vm7390_vm2, %v562_v34, %v566_v1  ;;  %v2986_v49 = vsel %vm7636_vm5, %v2984_v46, %v2985_v32  ;;  %v594_v50 = vrot.slane %v592_v29, 4  ;;  %v598_v52 = vshll.u32 %v283_v62, 16  ;;  %6634 = vmatpush3.bf16.msra.mxu0 %v7103_v6  ;;  %v7113_v32 = vld [vmem:[%s9167_s1 + $0x1a8] sm:$0xff]  }
  0x73   : > { %v577_v53 = vsel %vm7390_vm2, %v572_v39, %v576_v11  ;;  %v5709_v45 = vcombine.low %v2983_v33, %v2986_v49  ;;  %v585_v51 = vor.u32 %v584_v42, %v581_v23  ;;  %v5678_v55 = vrot.slane %v5662_v38, 9  ;;  %6635 = vmatprep.subr.bf16.mxu0 %v7105_v30  ;;  %v7775_v29 = vld [vmem:[%s7358_s16 + $0xac] sm:$0xf] }
  0x74   : > { %v5405_v57 = vcombine.low %v567_v44, %v577_v53  ;;  %v595_v58 = vor.u32 %v594_v50, %v590_v43  ;;  %v600_v59 = vrot.slane %v598_v52, 5  ;;  %v2989_v24 = vrot.slane %v7508_v19, 5  ;;  %v5664_v53 = vld [vmem:[%s7358_s16 + $0x54] sm:$0xe] }
  0x75   : > { %6602 = vmatmul.mubr.bf16.gmra.mrb[4].mxu0 %v5709_v45  ;;  %v586_v6 = vrot.slane %v585_v51, 4  ;;  %v2992_v63 = vrot.slane %v7516_v28, 5  ;;  %v603_v41 = vshrl.u32 %v7738_v31, 16  ;;  %v606_v1 = vshll.u32 %v7738_v31, 16  ;;  %v7117_v45 = vld [vmem:[%s9167_s1 + $0x1b0] sm:$0xff]  }
  0x76   : > { %6378 = vmatmul.mubr.bf16.gmra.mrb[20].mxu1 %v5405_v57  ;;  %v596_v7 = vrot.slane %v595_v58, 4  ;;  %v2990_v10 = vsel %vm7636_vm5, %v5678_v55, %v2989_v24  ;;  %v2991_v11 = vrot.slane %v2989_v24, 4  ;;  %v612_v12 = vshll.u32 %v7747_v48, 16  ;;  %6636 = vmatpush3.bf16.msra.mxu0 %v7105_v30 }
  0x77   : > { %v591_v19 = vsel %vm7390_vm2, %v586_v6, %v590_v43  ;;  %v605_v13 = vrot.slane %v603_v41, 4  ;;  %v608_v28 = vrot.slane %v606_v1, 5  ;;  %v616_v8 = vshrl.u32 %v7747_v48, 16  ;;  %6637 = vmatprep.subr.bf16.mxu0 %v7109_v56  ;;  %v285_v43 = vld [vmem:[%s7358_s16 + $0xb0] sm:$0x1] }
  0x78   : > { %v601_v36 = vsel %vm7390_vm2, %v596_v7, %v600_v59  ;;  %v2993_v62 = vsel %vm7636_vm5, %v2991_v11, %v2992_v63  ;;  %v614_v18 = vrot.slane %v612_v12, 5  ;;  %v622_v26 = vshll.u32 %v284_v61, 16  ;;  %v7795_v41 = vld [vmem:[%s7358_s16 + $0xb4] sm:$0xf]  ;;  %v7800_v12 = vld [vmem:[%s7358_s16 + $0xb8] sm:$0xf] }
  0x79   : > { %v5406_v30 = vcombine.low %v591_v19, %v601_v36  ;;  %v5710_v34 = vcombine.low %v2990_v10, %v2993_v62  ;;  %v609_v33 = vor.u32 %v608_v28, %v605_v13  ;;  %v618_v46 = vrot.slane %v616_v8, 4  ;;  %v286_v19 = vld [vmem:[%s7358_s16 + $0xbc] sm:$0x1] }
  0x7a   : > { %v624_v38 = vrot.slane %v622_v26, 5  ;;  %v5679_v39 = vrot.slane %v5663_v15, 9  ;;  %v2996_v23 = vrot.slane %v7543_v14, 5  ;;  %v2999_v42 = vrot.slane %v7549_v22, 5  ;;  %6638 = vmatpush3.bf16.msra.mxu0 %v7109_v56  ;;  %v7121_v13 = vld [vmem:[%s9167_s1 + $0x1b8] sm:$0xff]  }
  0x7b   : > { %6381 = vmatprep.mubr.bf16.mxu1 %v5406_v30  ;;  %6605 = vmatprep.mubr.bf16.mxu0 %v5710_v34  ;;  %v610_v44 = vrot.slane %v609_v33, 4  ;;  %v619_v49 = vor.u32 %v618_v46, %v614_v18  ;;  %v627_v50 = vshrl.u32 %v7772_v27, 16  ;;  %v630_v52 = vshll.u32 %v7772_v27, 16  ;;  %v5665_v30 = vld [vmem:[%s7358_s16 + $0x60] sm:$0xe] }
  0x7c   : > { %v2997_v14 = vsel %vm7636_vm5, %v5679_v39, %v2996_v23  ;;  %v2998_v22 = vrot.slane %v2996_v23, 4  ;;  %v636_v51 = vshll.u32 %v7775_v29, 16  ;;  %v640_v55 = vshrl.u32 %v7775_v29, 16  ;;  %6639 = vmatprep.subr.bf16.mxu0 %v7113_v32  ;;  %v5595_v39 = vld [vmem:[%s7358_s16 + $0x70] sm:$0xf] }
  0x7d   : > { %v615_v56 = vsel %vm7390_vm2, %v610_v44, %v614_v18  ;;  %v620_v57 = vrot.slane %v619_v49, 4  ;;  %v629_v58 = vrot.slane %v627_v50, 4  ;;  %v632_v59 = vrot.slane %v630_v52, 5  ;;  %v7822_v44 = vld [vmem:[%s9167_s1 + $0x1c0] sm:$0xff]  }
  0x7e   : > { %v3000_v24 = vsel %vm7636_vm5, %v2998_v22, %v2999_v42  ;;  %v638_v61 = vrot.slane %v636_v51, 5  ;;  %v642_v6 = vrot.slane %v640_v55, 4  ;;  %v646_v63 = vshll.u32 %v285_v43, 16  ;;  %6640 = vmatpush3.bf16.msra.mxu0 %v7113_v32  ;;  %v5666_v43 = vld [vmem:[%s7358_s16 + $0x6c] sm:$0xe] }
  0x7f   : > { %v625_v1 = vsel %vm7390_vm2, %v620_v57, %v624_v38  ;;  %v5711_v7 = vcombine.low %v2997_v14, %v3000_v24  ;;  %v633_v10 = vor.u32 %v632_v59, %v629_v58  ;;  %v5680_v11 = vrot.slane %v5664_v53, 9  ;;  %6641 = vmatprep.subr.bf16.mxu0 %v7117_v45  ;;  %v5596_v55 = vld [vmem:[%s7358_s16 + $0x74] sm:$0x1]  ;;  %v5667_v24 = vld [vmem:[%s7358_s16 + $0x78] sm:$0xe] }
  0x80   : > { %v5407_v28 = vcombine.low %v615_v56, %v625_v1  ;;  %v643_v8 = vor.u32 %v642_v6, %v638_v61  ;;  %v648_v15 = vrot.slane %v646_v63, 5  ;;  %v3003_v32 = vrot.slane %v7574_v0, 5 }
  0x81   : > { %6606 = vmatmul.mubr.bf16.gmra.mrb[8].mxu0 %v5711_v7  ;;  %v634_v36 = vrot.slane %v633_v10, 4  ;;  %v3006_v62 = vrot.slane %v7586_v20, 5  ;;  %v651_v18 = vshrl.u32 %v7795_v41, 16  ;;  %v654_v26 = vshll.u32 %v7795_v41, 16 }
  0x82   : > { %6382 = vmatmul.mubr.bf16.gmra.mrb[24].mxu1 %v5407_v28  ;;  %v644_v34 = vrot.slane %v643_v8, 4  ;;  %v3004_v33 = vsel %vm7636_vm5, %v5680_v11, %v3003_v32  ;;  %v3005_v46 = vrot.slane %v3003_v32, 4  ;;  %v660_v38 = vshll.u32 %v7800_v12, 16  ;;  %6642 = vmatpush3.bf16.msra.mxu0 %v7117_v45  ;;  %v7835_v11 = vld [vmem:[%s7358_s16 + $0x7c] sm:$0xf] }
  0x83   : > { %v639_v0 = vsel %vm7390_vm2, %v634_v36, %v638_v61  ;;  %v653_v20 = vrot.slane %v651_v18, 4  ;;  %v656_v23 = vrot.slane %v654_v26, 5  ;;  %v664_v42 = vshrl.u32 %v7800_v12, 16  ;;  %6643 = vmatprep.subr.bf16.mxu0 %v7121_v13  ;;  %v7190_v36 = vld [vmem:[%s7358_s16] sm:$0xf] }
  0x84   : > { %v649_v49 = vsel %vm7390_vm2, %v644_v34, %v648_v15  ;;  %v3007_v50 = vsel %vm7636_vm5, %v3005_v46, %v3006_v62  ;;  %v662_v52 = vrot.slane %v660_v38, 5  ;;  %v670_v53 = vshll.u32 %v286_v19, 16  ;;  %v5601_v15 = vld [vmem:[%s7358_s16 + $0x88] sm:$0xf]  ;;  %v7850_v62 = vld [vmem:[%s7358_s16 + $0x4] sm:$0xf] }
  0x85   : > { %v5408_v45 = vcombine.low %v639_v0, %v649_v49  ;;  %v5712_v14 = vcombine.low %v3004_v33, %v3007_v50  ;;  %v657_v22 = vor.u32 %v656_v23, %v653_v20  ;;  %v666_v51 = vrot.slane %v664_v42, 4  ;;  %v5602_v26 = vld [vmem:[%s7358_s16 + $0x8c] sm:$0x1]  ;;  %v5605_v23 = vld [vmem:[%s7358_s16 + $0x98] sm:$0x1] }
  0x86   : > { %v672_v56 = vrot.slane %v670_v53, 5  ;;  %v5681_v57 = vrot.slane %v5665_v30, 9  ;;  %v3010_v58 = vrot.slane %v7601_v60, 5  ;;  %v3013_v59 = vrot.slane %v7610_v17, 5  ;;  %6644 = vmatpush3.bf16.msra.mxu0 %v7121_v13  ;;  %v7838_v17 = vld [vmem:[%s7358_s16 + $0x80] sm:$0x1] }
  0x87   : > { %6385 = vmatprep.mubr.bf16.mxu1 %v5408_v45  ;;  %6609 = vmatprep.mubr.bf16.mxu0 %v5712_v14  ;;  %v658_v61 = vrot.slane %v657_v22, 4  ;;  %v667_v6 = vor.u32 %v666_v51, %v662_v52  ;;  %v5682_v63 = vrot.slane %v5666_v43, 9  ;;  %v3017_v1 = vrot.slane %v5595_v39, 5  ;;  %v5668_v30 = vld [vmem:[%s7358_s16 + $0x84] sm:$0xe] }
  0x88   : > { %v3011_v7 = vsel %vm7636_vm5, %v5681_v57, %v3010_v58  ;;  %v3012_v10 = vrot.slane %v3010_v58, 4  ;;  %v3020_v60 = vrot.slane %v5596_v55, 5  ;;  %6677 = vmatprep.subr.bf16.mxu0 %v7822_v44  ;;  %v5418_v18 = vcombine.low %v7190_v36, %v7850_v62  ;;  %v5604_v39 = vld [vmem:[%s7358_s16 + $0x94] sm:$0xf]  ;;  %v5669_v42 = vld [vmem:[%s7358_s16 + $0x90] sm:$0xe] }
  0x89   : > { %v663_v19 = vsel %vm7390_vm2, %v658_v61, %v662_v52  ;;  %v668_v13 = vrot.slane %v667_v6, 4  ;;  %v3018_v28 = vsel %vm7636_vm5, %v5682_v63, %v3017_v1  ;;  %v3019_v8 = vrot.slane %v3017_v1, 4  ;;  %v5670_v50 = vld [vmem:[%s7358_s16 + $0x9c] sm:$0xe]  ;;  %v5607_v14 = vld [vmem:[%s7358_s16 + $0xa0] sm:$0xf] }
  0x8a   : > { %v3014_v32 = vsel %vm7636_vm5, %v3012_v10, %v3013_v59  ;;  %v5683_v38 = vrot.slane %v5667_v24, 9  ;;  %v3024_v43 = vrot.slane %v7835_v11, 5  ;;  %v3027_v49 = vrot.slane %v7838_v17, 5  ;;  %v5608_v22 = vld [vmem:[%s7358_s16 + $0xa4] sm:$0x1] }
  0x8b   : > { %v673_v34 = vsel %vm7390_vm2, %v668_v13, %v672_v56  ;;  %v5713_v33 = vcombine.low %v3011_v7, %v3014_v32  ;;  %v3021_v46 = vsel %vm7636_vm5, %v3019_v8, %v3020_v60  ;;  %v5684_v52 = vrot.slane %v5668_v30, 9  ;;  %v5610_v59 = vld [vmem:[%s7358_s16 + $0xac] sm:$0xf]  ;;  %v7874_v61 = vld [vmem:[%s7358_s16 + $0x10] sm:$0xf] }
  0x8c   : > { %v5409_v0 = vcombine.low %v663_v19, %v673_v34  ;;  %v5714_v20 = vcombine.low %v3018_v28, %v3021_v46  ;;  %v3031_v53 = vrot.slane %v5601_v15, 5  ;;  %v3034_v45 = vrot.slane %v5602_v26, 5  ;;  %v7192_v24 = vld [vmem:[%s7358_s16 + $0xc] sm:$0xf]  ;;  %v7194_v8 = vld [vmem:[%s7358_s16 + $0x18] sm:$0xf] }
  0x8d   : > { %6610 = vmatmul.mubr.bf16.gmra.mrb[12].mxu0 %v5713_v33  ;;  %v3025_v51 = vsel %vm7636_vm5, %v5683_v38, %v3024_v43  ;;  %v3026_v55 = vrot.slane %v3024_v43, 4  ;;  %v3038_v58 = vrot.slane %v5604_v39, 5  ;;  %v5419_v6 = vcombine.low %v7192_v24, %v7874_v61  ;;  %v7112_v19 = vld [vmem:[%s9167_s1 + $0x88] sm:$0xff]   ;;  %v7886_v15 = vld [vmem:[%s7358_s16 + $0x1c] sm:$0xf] }
  0x8e   : > { %6386 = vmatmul.mubr.bf16.gmra.mrb[28].mxu1 %v5409_v0  ;;  %6613 = vmatprep.mubr.bf16.mxu0 %v5714_v20  ;;  %v3032_v56 = vsel %vm7636_vm5, %v5684_v52, %v3031_v53  ;;  %v3033_v57 = vrot.slane %v3031_v53, 4  ;;  %v5685_v1 = vrot.slane %v5669_v42, 9  ;;  %v3041_v7 = vrot.slane %v5605_v23, 5  ;;  %v5611_v30 = vld [vmem:[%s7358_s16 + $0xb0] sm:$0x1] }
  0x8f   : > { %6405 = vmatprep.mubr.bf16.mxu1 %v5418_v18  ;;  %v3028_v63 = vsel %vm7636_vm5, %v3026_v55, %v3027_v49  ;;  %v3040_v13 = vrot.slane %v3038_v58, 4  ;;  %v5686_v28 = vrot.slane %v5670_v50, 9  ;;  %v5420_v32 = vcombine.low %v7194_v8, %v7886_v15  ;;  %v5671_v34 = vld [vmem:[%s7358_s16 + $0xa8] sm:$0xe]  ;;  %v5613_v33 = vld [vmem:[%s7358_s16 + $0xb8] sm:$0xf] }
  0x90   : > { %v5715_v10 = vcombine.low %v3025_v51, %v3028_v63  ;;  %v3035_v60 = vsel %vm7636_vm5, %v3033_v57, %v3034_v45  ;;  %v3045_v18 = vrot.slane %v5607_v14, 5  ;;  %v3048_v26 = vrot.slane %v5608_v22, 5  ;;  %v5614_v20 = vld [vmem:[%s7358_s16 + $0xbc] sm:$0x1]  ;;  %v5672_v23 = vld [vmem:[%s7358_s16 + $0xb4] sm:$0xe] }
  0x91   : > { %v5716_v36 = vcombine.low %v3032_v56, %v3035_v60  ;;  %v3052_v38 = vrot.slane %v5610_v59, 5  ;;  %v3039_v39 = vsel %vm7636_vm5, %v5685_v1, %v3038_v58  ;;  %v3042_v0 = vsel %vm7636_vm5, %v3040_v13, %v3041_v7  ;;  %v7116_v50 = vld [vmem:[%s9167_s1 + $0x90] sm:$0xff]   ;;  %v5616_v53 = vld [vmem:[%s7358_s16 + $0xc4] sm:$0xf]  ;;  %v7909_v51 = vld [vmem:[%s7358_s16 + $0x28] sm:$0xf] }
  0x92   : > { %v3047_v46 = vrot.slane %v3045_v18, 4  ;;  %v3046_v42 = vsel %vm7636_vm5, %v5686_v28, %v3045_v18  ;;  %v3059_v49 = vrot.slane %v5613_v33, 5  ;;  %v5687_v52 = vrot.slane %v5671_v34, 9  ;;  %v7196_v22 = vld [vmem:[%s7358_s16 + $0x24] sm:$0xf]  ;;  %v7120_v1 = vld [vmem:[%s9167_s1 + $0x98] sm:$0xff]  }
  0x93   : > { %v5717_v45 = vcombine.low %v3039_v39, %v3042_v0  ;;  %v3054_v14 = vrot.slane %v3052_v38, 4  ;;  %v5421_v55 = vcombine.low %v7196_v22, %v7909_v51  ;;  %v7198_v57 = vld [vmem:[%s7358_s16 + $0x30] sm:$0xf]  ;;  %v7914_v58 = vld [vmem:[%s7358_s16 + $0x34] sm:$0xf]  ;;  %v5688_v24 = vrot.slane %v5672_v23, 9 }
  0x94   : > { %v3049_v43 = vsel %vm7636_vm5, %v3047_v46, %v3048_v26  ;;  %v5422_v59 = vcombine.low %v7198_v57, %v7914_v58  ;;  %v3062_v63 = vrot.slane %v5614_v20, 5  ;;  %v5673_v7 = vld [vmem:[%s7358_s16 + $0xc0] sm:$0xe]  ;;  %v3053_v60 = vsel %vm7636_vm5, %v5687_v52, %v3052_v38  ;;  %v5617_v8 = vld [vmem:[%s7358_s16 + $0xc8] sm:$0x1]  ;;  %v7123_v22 = vld [vmem:[%s7358_s16 + $0x18] sm:$0xff]  }
  0x95   : > { %6614 = vmatmul.mubr.bf16.gmra.mrb[16].mxu0 %v5715_v10  ;;  %v5718_v56 = vcombine.low %v3046_v42, %v3049_v43  ;;  %v3066_v10 = vrot.slane %v5616_v53, 5  ;;  %v3060_v13 = vsel %vm7636_vm5, %v5688_v24, %v3059_v49  ;;  %v5689_v18 = vrot.slane %v5673_v7, 9  ;;  %v7200_v26 = vld [vmem:[%s7358_s16 + $0x3c] sm:$0xf]  ;;  %v7202_v39 = vld [vmem:[%s7358_s16 + $0x48] sm:$0xf] }
  0x96   : > { %6406 = vmatmul.mubr.bf16.vlgmr.msra.gmra.mrb[0].mxu1 %v5419_v6  ;;  %6617 = vmatprep.mubr.bf16.mxu0 %v5716_v36  ;;  %v3061_v6 = vrot.slane %v3059_v49, 4  ;;  %v3069_v38 = vrot.slane %v5617_v8, 5  ;;  %v7940_v0 = vld [vmem:[%s7358_s16 + $0x4c] sm:$0xf]  ;;  %v7137_v49 = vld [vmem:[%s9167_s1 + $0xb0] sm:$0xff]   ;;  %v2419_v52 = vshrl.u32 %v7835_v11, 16 }
  0x97   : > { %6438 = vmatpush3.bf16.msra.mxu1 %v7560_v4  ;;  %6409 = vmatprep.mubr.bf16.mxu1 %v5420_v32  ;;  %v3055_v4 = vrot.slane %v5611_v30, 5  ;;  %v7125_v32 = vld [vmem:[%s9167_s1 + $0xa0] sm:$0xff]   ;;  %v3068_v46 = vrot.slane %v3066_v10, 4  ;;  %v5424_v20 = vcombine.low %v7202_v39, %v7940_v0  ;;  %v7131_v23 = vld [vmem:[%s9167_s1 + $0xa8] sm:$0xff]   ;;  %v3067_v42 = vsel %vm7636_vm5, %v5689_v18, %v3066_v10  ;;  %v7129_v18 = vld [vmem:[%s7358_s16 + $0x30] sm:$0xff]  }
  0x98   : > { %6439 = vmatprep.subr.bf16.mxu1 %v7112_v19  ;;  %v3063_v28 = vsel %vm7636_vm5, %v3061_v6, %v3062_v63  ;;  %v7935_v30 = vld [vmem:[%s7358_s16 + $0x40] sm:$0xf]  ;;  %v7968_v57 = vrot.slane %v2419_v52, 4  ;;  %v7126_v6 = vld [vmem:[%s7358_s16 + $0x24] sm:$0xff]   ;;  %v1329_v7 = vrot.slane %v7874_v61, 5  ;;  %v2425_v8 = vshll.u32 %v7838_v17, 16 }
  0x99   : > { %v5423_v34 = vcombine.low %v7200_v26, %v7935_v30  ;;  %v5720_v33 = vcombine.low %v3060_v13, %v3063_v28  ;;  %v3070_v43 = vsel %vm7636_vm5, %v3068_v46, %v3069_v38  ;;  %v1269_v63 = vld [vmem:[%s7358_s16] sm:$0xe]  ;;  %v1270_v10 = vld [vmem:[%s7358_s16 + $0xc] sm:$0xe]  ;;  %v1336_v13 = vrot.slane %v7886_v15, 5 }
  0x9a   : > { %v5721_v53 = vcombine.low %v3067_v42, %v3070_v43  ;;  %v1272_v61 = vld [vmem:[%s7358_s16 + $0x24] sm:$0xe]  ;;  %v5429_v15 = vcombine.low %v7688_v16, %v7696_v40  ;;  %v5430_v26 = vcombine.low %v7717_v2, %v7720_v3  ;;  %v5442_v17 = vrot.slane %v1269_v63, 9  ;;  %v7208_v38 = vld [vmem:[%s7358_s16 + $0x20] sm:$0x1]  ;;  %v7138_v2 = vld [vmem:[%s7358_s16 + $0x54] sm:$0xff]  }
  0x9b   : > { %6440 = vmatpush3.bf16.msra.mxu1 %v7112_v19  ;;  %v3056_v19 = vsel %vm7636_vm5, %v3054_v14, %v3055_v4  ;;  %v7957_v14 = vld [vmem:[%s7358_s16 + $0x58] sm:$0xf]  ;;  %v1338_v46 = vrot.slane %v1336_v13, 4  ;;  %v1339_v39 = vrot.slane %v7208_v38, 5  ;;  %v7209_v43 = vld [vmem:[%s7358_s16 + $0x2c] sm:$0x1] }
  0x9c   : > { %6441 = vmatprep.subr.bf16.mxu1 %v7116_v50  ;;  %v5719_v36 = vcombine.low %v3053_v60, %v3056_v19  ;;  %v7983_v60 = vld [vmem:[%s9167_s1 + $0xc0] sm:$0xff]   ;;  %v1271_v19 = vld [vmem:[%s7358_s16 + $0x18] sm:$0xe]  ;;  %v7212_v38 = vld [vmem:[%s7358_s16 + $0x50] sm:$0x1]  ;;  %v1371_v16 = vrot.slane %v7957_v14, 5 }
  0x9d   : > { %6618 = vmatmul.mubr.bf16.gmra.mrb[20].mxu0 %v5717_v45  ;;  %v7204_v45 = vld [vmem:[%s7358_s16 + $0x54] sm:$0xf]  ;;  %v8106_v40 = vld [vmem:[%s7358_s16 + $0x64] sm:$0xf] }
  0x9e   : > { %6410 = vmatmul.mubr.bf16.gmra.mrb[4].mxu1 %v5421_v55  ;;  %6621 = vmatprep.mubr.bf16.mxu0 %v5718_v56  ;;  %v5425_v4 = vcombine.low %v7204_v45, %v7957_v14  ;;  %v5426_v55 = vcombine.low %v7614_v25, %v7617_v35  ;;  %v7143_v56 = vld [vmem:[%s9167_s1 + $0xb8] sm:$0xff]   ;;  %v7207_v25 = vld [vmem:[%s7358_s16 + $0x14] sm:$0x1]  ;;  %v7141_v3 = vld [vmem:[%s7358_s16 + $0x60] sm:$0xff]  }
  0x9f   : > { %6413 = vmatprep.mubr.bf16.mxu1 %v5422_v59  ;;  %6442 = vmatpush3.bf16.msra.mxu1 %v7116_v50  ;;  %v2415_v50 = vshll.u32 %v7835_v11, 16  ;;  %v7971_v59 = vld [vmem:[%s7358_s16 + $0x8] sm:$0x1]  ;;  %v1332_v35 = vrot.slane %v7207_v25, 5 }
  0xa0   : > { %6443 = vmatprep.subr.bf16.mxu1 %v7120_v1  ;;  %v1325_v24 = vrot.slane %v7971_v59, 5 }
  0xa1   : > { %v7966_v11 = vrot.slane %v2415_v50, 5 }
  0xa3   : > { %6444 = vmatpush3.bf16.msra.mxu1 %v7120_v1  ;;  %v1322_v1 = vrot.slane %v7850_v62, 5  ;;  %v5427_v62 = vcombine.low %v7632_v5, %v7644_v21  ;;  %v5443_v21 = vrot.slane %v1270_v10, 9  ;;  %v5802_v10 = vld [vmem:[%s7358_s16 + $0x18] sm:$0xf] }
  0xa4   : > { %6445 = vmatprep.subr.bf16.mxu1 %v7125_v32 }
  0xa5   : > { %6622 = vmatmul.mubr.bf16.gmra.mrb[24].mxu0 %v5719_v36  ;;  %v5428_v36 = vcombine.low %v7655_v47, %v7666_v54  ;;  %v1324_v5 = vrot.slane %v1322_v1, 4  ;;  %v7133_v47 = vld [vmem:[%s9167_s1 + $0x1c8] sm:$0xff]   ;;  %v5444_v54 = vrot.slane %v1271_v19, 9  ;;  %v8026_v59 = vsel %vm7636_vm5, %v5442_v17, %v1322_v1  ;;  %v5803_v19 = vld [vmem:[%s7358_s16 + $0x1c] sm:$0xf] }
  0xa6   : > { %6414 = vmatmul.mubr.bf16.gmra.mrb[8].mxu1 %v5423_v34  ;;  %6625 = vmatprep.mubr.bf16.mxu0 %v5720_v33  ;;  %v1350_v34 = vrot.slane %v7914_v58, 5  ;;  %v1331_v33 = vrot.slane %v1329_v7, 4  ;;  %v5445_v58 = vrot.slane %v1272_v61, 9  ;;  %v1364_v1 = vrot.slane %v7940_v0, 5  ;;  %v7135_v0 = vld [vmem:[%s7358_s16 + $0x48] sm:$0xff]  }
  0xa7   : > { %6417 = vmatprep.mubr.bf16.mxu1 %v5424_v20  ;;  %6446 = vmatpush3.bf16.msra.mxu1 %v7125_v32  ;;  %v1343_v32 = vrot.slane %v7909_v51, 5  ;;  %v1273_v51 = vld [vmem:[%s7358_s16 + $0x30] sm:$0xe]  ;;  %v5431_v20 = vcombine.low %v7738_v31, %v7747_v48  ;;  %v8034_v25 = vsel %vm7636_vm5, %v1324_v5, %v1325_v24  ;;  %v8042_v63 = vsel %vm7636_vm5, %v5444_v54, %v1336_v13  ;;  %v1275_v13 = vld [vmem:[%s7358_s16 + $0x48] sm:$0xe] }
  0xa8   : > { %6447 = vmatprep.subr.bf16.mxu1 %v7131_v23  ;;  %v5446_v50 = vrot.slane %v1273_v51, 9  ;;  %v1352_v52 = vrot.slane %v1350_v34, 4  ;;  %v3829_v5 = vshrl.u32 %v5802_v10, 16  ;;  %v3842_v51 = vshrl.u32 %v5803_v19, 16  ;;  %v7144_v48 = vld [vmem:[%s7358_s16 + $0x6c] sm:$0xff]  }
  0xa9   : > { %v1345_v42 = vrot.slane %v1343_v32, 4  ;;  %v8054_v24 = vsel %vm7636_vm5, %v5445_v58, %v1343_v32  ;;  %v7211_v32 = vld [vmem:[%s7358_s16 + $0x44] sm:$0x1]  ;;  %v5448_v54 = vrot.slane %v1275_v13, 9  ;;  %v5806_v13 = vld [vmem:[%s7358_s16 + $0x28] sm:$0xf] }
  0xaa   : > { %v8064_v61 = vsel %vm7636_vm5, %v5446_v50, %v1350_v34  ;;  %v1360_v17 = vrot.slane %v7211_v32, 5  ;;  %v5804_v50 = vld [vmem:[%s7358_s16 + $0x20] sm:$0x1]  ;;  %v1277_v32 = vld [vmem:[%s7358_s16 + $0x60] sm:$0xe] }
  0xab   : > { %6448 = vmatpush3.bf16.msra.mxu1 %v7131_v23  ;;  %v5432_v23 = vcombine.low %v7772_v27, %v7775_v29 }
  0xac   : > { %6449 = vmatprep.subr.bf16.mxu1 %v7137_v49 }
  0xad   : > { %6626 = vmatmul.mubr.bf16.gmra.mrb[28].mxu0 %v5721_v53  ;;  %v7210_v53 = vld [vmem:[%s7358_s16 + $0x38] sm:$0x1] }
  0xae   : > { %6418 = vmatmul.mubr.bf16.gmra.mrb[12].mxu1 %v5425_v4  ;;  %6645 = vmatprep.mubr.bf16.mxu0 %v7123_v22  ;;  %v1353_v45 = vrot.slane %v7210_v53, 5  ;;  %v1274_v4 = vld [vmem:[%s7358_s16 + $0x3c] sm:$0xe]  ;;  %v1357_v22 = vrot.slane %v7935_v30, 5  ;;  %v8030_v30 = vsel %vm7636_vm5, %v5443_v21, %v1329_v7  ;;  %v3832_v21 = vshll.u32 %v5802_v10, 16  ;;  %v7149_v53 = vld [vmem:[%s9167_s1 + $0x1e0] sm:$0xff]  }
  0xaf   : > { %6421 = vmatprep.mubr.bf16.mxu1 %v5426_v55  ;;  %6450 = vmatpush3.bf16.msra.mxu1 %v7137_v49  ;;  %v1346_v49 = vrot.slane %v7209_v43, 5  ;;  %v8017_v55 = vrot.slane %v2425_v8, 5  ;;  %v7132_v7 = vld [vmem:[%s7358_s16 + $0x3c] sm:$0xff]   ;;  %v8050_v8 = vsel %vm7636_vm5, %v1338_v46, %v1339_v39  ;;  %v1366_v46 = vrot.slane %v1364_v1, 4  ;;  %v5808_v43 = vld [vmem:[%s7358_s16 + $0x30] sm:$0xf] }
  0xb0   : > { %6451 = vmatprep.subr.bf16.mxu1 %v7143_v56  ;;  %v1367_v39 = vrot.slane %v7212_v38, 5  ;;  %v3831_v10 = vrot.slane %v3829_v5, 4 }
  0xb1   : > { %9188 = vst [vmem:[#allocation2_spill] sm:$0xff] %v8017_v55 }
  0xb3   : > { %6452 = vmatpush3.bf16.msra.mxu1 %v7143_v56  ;;  %v7139_v56 = vld [vmem:[%s9167_s1 + $0x1d0] sm:$0xff]  }
  0xb4   : > { %6485 = vmatprep.subr.bf16.mxu1 %v7983_v60 }
  0xb5   : > { %6646 = vmatmul.mubr.bf16.vlgmr.msra.gmra.mrb[0].mxu0 %v7126_v6  ;;  %v8038_v6 = vsel %vm7636_vm5, %v1331_v33, %v1332_v35  ;;  %v8058_v35 = vsel %vm7636_vm5, %v1345_v42, %v1346_v49  ;;  %v3838_v33 = vshll.u32 %v5803_v19, 16  ;;  %v3834_v19 = vrot.slane %v3832_v21, 5  ;;  %v1278_v21 = vld [vmem:[%s7358_s16 + $0x6c] sm:$0xe] }
  0xb6   : > { %6422 = vmatmul.mubr.bf16.gmra.mrb[16].mxu1 %v5427_v62  ;;  %6678 = vmatpush3.bf16.msra.mxu0 %v7822_v44  ;;  %v5447_v62 = vrot.slane %v1274_v4, 9  ;;  %v5451_v58 = vrot.slane %v1278_v21, 9 }
  0xb7   : > { %6425 = vmatprep.mubr.bf16.mxu1 %v5428_v36  ;;  %6649 = vmatprep.mubr.bf16.mxu0 %v7129_v18  ;;  %v8068_v36 = vsel %vm7636_vm5, %v1352_v52, %v1353_v45  ;;  %v1359_v18 = vrot.slane %v1357_v22, 4  ;;  %v5805_v52 = vld [vmem:[%s7358_s16 + $0x24] sm:$0xf]  ;;  %v3866_v45 = vshrl.u32 %v5806_v13, 16 }
  0xb8   : > { %6679 = vmatprep.subr.bf16.mxu0 %v7133_v47  ;;  %v8085_v49 = vsel %vm7636_vm5, %v5447_v62, %v1357_v22  ;;  %v8102_v22 = vld [vmem:[%s7358_s16 + $0x54] sm:$0xe]  ;;  %v3844_v62 = vrot.slane %v3842_v51, 4  ;;  %v3853_v38 = vshrl.u32 %v5805_v52, 16  ;;  %v3856_v28 = vshll.u32 %v5805_v52, 16 }
  0xb9   : > { %v8099_v4 = vsel %vm7636_vm5, %v1359_v18, %v1360_v17  ;;  %v3848_v17 = vshll.u32 %v5804_v50, 16  ;;  %v5449_v5 = vrot.slane %v8102_v22, 9  ;;  %v7153_v50 = vld [vmem:[%s9167_s1 + $0x1e8] sm:$0xff]   ;;  %v1373_v52 = vrot.slane %v1371_v16, 4 }
  0xba   : > { %6680 = vmatpush3.bf16.msra.mxu0 %v7133_v47  ;;  %v7145_v47 = vld [vmem:[%s9167_s1 + $0x1d8] sm:$0xff]   ;;  %v3835_v22 = vor.u32 %v3834_v19, %v3831_v10  ;;  %v3855_v34 = vrot.slane %v3853_v38, 4  ;;  %v3858_v44 = vrot.slane %v3856_v28, 5  ;;  %v7217_v10 = vld [vmem:[%s7358_s16 + $0x74] sm:$0x1]  ;;  %v3868_v28 = vrot.slane %v3866_v45, 4 }
  0xbb   : > { %6681 = vmatprep.subr.bf16.mxu0 %v7139_v56  ;;  %v8140_v42 = vrot.slane %v3848_v17, 5  ;;  %v1388_v19 = vrot.slane %v7217_v10, 5  ;;  %v3877_v38 = vshrl.u32 %v5808_v43, 16  ;;  %v8165_v27 = vsel %vm7636_vm5, %v5449_v5, %v1371_v16 }
  0xbc   : > { %v3836_v21 = vrot.slane %v3835_v22, 4 }
  0xbd   : > { %6650 = vmatmul.mubr.bf16.gmra.mrb[4].mxu0 %v7132_v7  ;;  %v8112_v7 = vrot.slane %v3838_v33, 5  ;;  %v7215_v33 = vld [vmem:[%s7358_s16 + $0x70] sm:$0xf] }
  0xbe   : > { %6426 = vmatmul.mubr.bf16.gmra.mrb[20].mxu1 %v5429_v15  ;;  %6653 = vmatprep.mubr.bf16.mxu0 %v7135_v0  ;;  %v1378_v15 = vrot.slane %v8106_v40, 5  ;;  %v7214_v0 = vld [vmem:[%s7358_s16 + $0x5c] sm:$0x1]  ;;  %v1385_v51 = vrot.slane %v7215_v33, 5 }
  0xbf   : > { %6429 = vmatprep.mubr.bf16.mxu1 %v5430_v26  ;;  %6682 = vmatpush3.bf16.msra.mxu0 %v7139_v56  ;;  %v1374_v18 = vrot.slane %v7214_v0, 5  ;;  %v8121_v26 = vsel %vm7636_vm5, %v5448_v54, %v1364_v1  ;;  %v8125_v56 = vsel %vm7636_vm5, %v1366_v46, %v1367_v39  ;;  %v7216_v1 = vld [vmem:[%s7358_s16 + $0x68] sm:$0x1]  ;;  %v3862_v0 = vshll.u32 %v5806_v13, 16  ;;  %v7161_v40 = vld [vmem:[%s9167_s1 + $0x1f8] sm:$0xff]  }
  0xc0   : > { %6683 = vmatprep.subr.bf16.mxu0 %v7145_v47  ;;  %v1381_v54 = vrot.slane %v7216_v1, 5  ;;  %v5450_v46 = vrot.slane %v1277_v32, 9  ;;  %v1380_v39 = vrot.slane %v1378_v15, 4  ;;  %v3845_v33 = vor.u32 %v3844_v62, %v8112_v7  ;;  %v5809_v1 = vld [vmem:[%s7358_s16 + $0x34] sm:$0xf] }
  0xc1   : > { %v1387_v32 = vrot.slane %v1385_v51, 4  ;;  %v5807_v62 = vld [vmem:[%s7358_s16 + $0x2c] sm:$0x1]  ;;  %v8152_v17 = vrot.slane %v3862_v0, 5  ;;  %v3886_v13 = vshll.u32 %v5809_v1, 16  ;;  %v3890_v31 = vshrl.u32 %v5809_v1, 16 }
  0xc2   : > { %v3846_v10 = vrot.slane %v3845_v33, 4  ;;  %v8169_v29 = vsel %vm7636_vm5, %v1373_v52, %v1374_v18  ;;  %v8176_v45 = vsel %vm7636_vm5, %v5450_v46, %v1378_v15  ;;  %v8180_v14 = vsel %vm7636_vm5, %v1380_v39, %v1381_v54  ;;  %v1279_v18 = vld [vmem:[%s7358_s16 + $0x78] sm:$0xe] }
  0xc3   : > { %6684 = vmatpush3.bf16.msra.mxu0 %v7145_v47  ;;  %v8184_v16 = vsel %vm7636_vm5, %v5451_v58, %v1385_v51  ;;  %v8194_v15 = vsel %vm7636_vm5, %v1387_v32, %v1388_v19  ;;  %v3869_v5 = vor.u32 %v3868_v28, %v8152_v17  ;;  %v3879_v52 = vrot.slane %v3877_v38, 4  ;;  %v5811_v58 = vld [vmem:[%s7358_s16 + $0x3c] sm:$0xf]  ;;  %v5812_v51 = vld [vmem:[%s7358_s16 + $0x40] sm:$0xf] }
  0xc4   : > { %6685 = vmatprep.subr.bf16.mxu0 %v7149_v53  ;;  %v3841_v0 = vsel %vm7390_vm2, %v3836_v21, %v8112_v7  ;;  %v3851_v46 = vsel %vm7390_vm2, %v3846_v10, %v8140_v42  ;;  %v8205_v39 = vrot.slane %v3886_v13, 5  ;;  %v3892_v22 = vrot.slane %v3890_v31, 4  ;;  %v7219_v19 = vld [vmem:[%s7358_s16 + $0x80] sm:$0x1]  ;;  %v8364_v47 = vld [vmem:[%s7358_s16 + $0x68] sm:$0x1] }
  0xc5   : > { %6654 = vmatmul.mubr.bf16.gmra.mrb[8].mxu0 %v7138_v2  ;;  %v3880_v2 = vshll.u32 %v5808_v43, 16  ;;  %v3872_v43 = vshll.u32 %v5807_v62, 16  ;;  %v5452_v32 = vrot.slane %v1279_v18, 9  ;;  %v1280_v62 = vld [vmem:[%s7358_s16 + $0x84] sm:$0xe]  ;;  %v3901_v28 = vshrl.u32 %v5811_v58, 16 }
  0xc6   : > { %6430 = vmatmul.mubr.bf16.gmra.mrb[24].mxu1 %v5431_v20  ;;  %6657 = vmatprep.mubr.bf16.mxu0 %v7141_v3  ;;  %v7157_v20 = vld [vmem:[%s9167_s1 + $0x1f0] sm:$0xff]   ;;  %v7218_v3 = vld [vmem:[%s7358_s16 + $0x7c] sm:$0xf]  ;;  %v3904_v7 = vshll.u32 %v5811_v58, 16  ;;  %v3910_v38 = vshll.u32 %v5812_v51, 16  ;;  %v9189_v42 = vcombine.low %v7795_v41, %v7800_v12  ;;  %v8216_v13 = vrot.slane %v3869_v5, 4 }
  0xc7   : > { %6433 = vmatprep.mubr.bf16.mxu1 %v5432_v23  ;;  %6686 = vmatpush3.bf16.msra.mxu0 %v7149_v53  ;;  %v3859_v23 = vor.u32 %v3858_v44, %v3855_v34  ;;  %v7146_v53 = vld [vmem:[%s7358_s16 + $0x78] sm:$0xff]   ;;  %v1392_v44 = vrot.slane %v7218_v3, 5  ;;  %v3882_v54 = vrot.slane %v3880_v2, 5  ;;  %v8209_v1 = vrot.slane %v3872_v43, 5  ;;  %v8221_v21 = vld [vmem:[%s9167_s1 + $0x200] sm:$0xff]   ;;  %9197 = vst [vmem:[#allocation5_spill] sm:$0xff] %v8364_v47 }
  0xc8   : > { %6687 = vmatprep.subr.bf16.mxu0 %v7153_v50  ;;  %v5810_v34 = vld [vmem:[%s7358_s16 + $0x38] sm:$0x1]  ;;  %v3914_v2 = vshrl.u32 %v5812_v51, 16  ;;  %v7148_v43 = vld [vmem:[%s7358_s16 + $0x84] sm:$0xff]   ;;  %v3893_v12 = vor.u32 %v3892_v22, %v8205_v39  ;;  %v3906_v58 = vrot.slane %v3904_v7, 5  ;;  %v8243_v51 = vrot.slane %v3910_v38, 5 }
  0xc9   : > { %v8207_v33 = vrot.slane %v3859_v23, 4  ;;  %v1394_v10 = vrot.slane %v1392_v44, 4  ;;  %v3883_v31 = vor.u32 %v3882_v54, %v3879_v52  ;;  %v9190_v23 = vcombine.low %v8026_v59, %v8034_v25  ;;  %v7220_v18 = vld [vmem:[%s7358_s16 + $0x88] sm:$0xf]  ;;  %v5813_v5 = vld [vmem:[%s7358_s16 + $0x44] sm:$0x1] }
  0xca   : > { %v1399_v3 = vrot.slane %v7220_v18, 5  ;;  %v8234_v59 = vcombine.low %v3841_v0, %v3851_v46  ;;  %v5814_v52 = vld [vmem:[%s7358_s16 + $0x48] sm:$0xf]  ;;  %v3903_v54 = vrot.slane %v3901_v28, 4  ;;  %v3916_v22 = vrot.slane %v3914_v2, 4 }
  0xcb   : > { %6688 = vmatpush3.bf16.msra.mxu0 %v7153_v50  ;;  %v1395_v50 = vrot.slane %v7219_v19, 5  ;;  %v7150_v19 = vld [vmem:[%s7358_s16 + $0x90] sm:$0xff]   ;;  %v3865_v0 = vsel %vm7390_vm2, %v8207_v33, %v8152_v17  ;;  %v3884_v46 = vrot.slane %v3883_v31, 4  ;;  %v3875_v28 = vsel %vm7390_vm2, %v8216_v13, %v8209_v1  ;;  %v8265_v33 = vld [vmem:[%s7358_s16 + $0x58] sm:$0xf]  ;;  %v7151_v31 = vld [vmem:[%s9167_s1 + $0xc8] sm:$0xff]  }
  0xcc   : > { %6689 = vmatprep.subr.bf16.mxu0 %v7157_v20  ;;  %v3894_v38 = vrot.slane %v3893_v12, 4  ;;  %v1401_v2 = vrot.slane %v1399_v3, 4  ;;  %v5817_v17 = vld [vmem:[%s7358_s16 + $0x54] sm:$0xf]  ;;  %v3920_v1 = vshll.u32 %v5813_v5, 16  ;;  %v3925_v13 = vshrl.u32 %v5814_v52, 16 }
  0xcd   : > { %6658 = vmatmul.mubr.bf16.gmra.mrb[12].mxu0 %v7144_v48  ;;  %v3896_v48 = vshll.u32 %v5810_v34, 16  ;;  %v8261_v7 = vsel %vm7636_vm5, %v1394_v10, %v1395_v50  ;;  %v3928_v50 = vshll.u32 %v5814_v52, 16  ;;  %v3907_v10 = vor.u32 %v3906_v58, %v3903_v54  ;;  %v7152_v54 = vld [vmem:[%s7358_s16 + $0x9c] sm:$0xff]   ;;  %v7226_v41 = vld [vmem:[%s7358_s16 + $0xac] sm:$0xf] }
  0xce   : > { %6434 = vmatmul.mubr.bf16.gmra.mrb[28].mxu1 %v9189_v42  ;;  %6661 = vmatprep.mubr.bf16.mxu0 %v7146_v53  ;;  %v5453_v53 = vrot.slane %v1280_v62, 9  ;;  %v7221_v42 = vld [vmem:[%s7358_s16 + $0x8c] sm:$0x1]  ;;  %v3958_v5 = vshll.u32 %v8265_v33, 16  ;;  %v9192_v52 = vcombine.low %v8042_v63, %v8050_v8  ;;  %v8301_v63 = vld [vmem:[%s7358_s16 + $0x50] sm:$0x1] }
  0xcf   : > { %6453 = vmatprep.mubr.bf16.mxu1 %v9190_v23  ;;  %6690 = vmatpush3.bf16.msra.mxu0 %v7157_v20  ;;  %v8240_v20 = vsel %vm7636_vm5, %v5452_v32, %v1392_v44  ;;  %v3898_v62 = vrot.slane %v3896_v48, 5  ;;  %v1402_v23 = vrot.slane %v7221_v42, 5  ;;  %v1281_v44 = vld [vmem:[%s7358_s16 + $0x90] sm:$0xe]  ;;  %v8253_v32 = vld [vmem:[%s7358_s16 + $0x4c] sm:$0xf]  ;;  %v3917_v48 = vor.u32 %v3916_v22, %v8243_v51 }
  0xd0   : > { %6691 = vmatprep.subr.bf16.mxu0 %v7161_v40  ;;  %v3934_v12 = vshll.u32 %v8253_v32, 16  ;;  %v3938_v18 = vshrl.u32 %v8253_v32, 16  ;;  %v9191_v42 = vcombine.low %v8030_v30, %v8038_v6  ;;  %v7155_v30 = vld [vmem:[%s9167_s1 + $0xd0] sm:$0xff]   ;;  %v3889_v6 = vsel %vm7390_vm2, %v3884_v46, %v8205_v39  ;;  %v7154_v8 = vld [vmem:[%s7358_s16 + $0xa8] sm:$0xff]   ;;  %v8308_v39 = vld [vmem:[%s7358_s16 + $0x5c] sm:$0x1] }
  0xd1   : > { %v3899_v58 = vsel %vm7390_vm2, %v3894_v38, %v3898_v62  ;;  %v5454_v22 = vrot.slane %v1281_v44, 9  ;;  %v3930_v25 = vrot.slane %v3928_v50, 5  ;;  %9193 = vst [vmem:[#allocation3_spill] sm:$0xff] %v8308_v39  ;;  %v3908_v46 = vrot.slane %v3907_v10, 4 }
  0xd2   : > { %v3918_v62 = vrot.slane %v3917_v48, 4  ;;  %v8310_v38 = vrot.slane %v3934_v12, 5  ;;  %v8312_v34 = vrot.slane %v3958_v5, 5  ;;  %v8317_v50 = vcombine.low %v3865_v0, %v3875_v28  ;;  %v5820_v28 = vld [vmem:[%s7358_s16 + $0x60] sm:$0xf] }
  0xd3   : > { %6692 = vmatpush3.bf16.msra.mxu0 %v7161_v40  ;;  %v8273_v40 = vsel %vm7636_vm5, %v5453_v53, %v1399_v3  ;;  %v3949_v53 = vshrl.u32 %v5817_v17, 16  ;;  %v3952_v3 = vshll.u32 %v5817_v17, 16  ;;  %v7222_v17 = vld [vmem:[%s7358_s16 + $0x94] sm:$0xf]  ;;  %v8321_v48 = vcombine.low %v3889_v6, %v3899_v58 }
  0xd4   : > { %6725 = vmatprep.subr.bf16.mxu0 %v8221_v21  ;;  %v3944_v0 = vshll.u32 %v8301_v63, 16  ;;  %v3913_v6 = vsel %vm7390_vm2, %v3908_v46, %v8243_v51  ;;  %v9196_v46 = vcombine.low %v8064_v61, %v8068_v36 }
  0xd5   : > { %6662 = vmatmul.mubr.bf16.gmra.mrb[16].mxu0 %v7148_v43  ;;  %v3962_v43 = vshrl.u32 %v8265_v33, 16  ;;  %v3951_v44 = vrot.slane %v3949_v53, 4  ;;  %v7223_v53 = vld [vmem:[%s7358_s16 + $0x98] sm:$0x1] }
  0xd6   : > { %6454 = vmatmul.mubr.bf16.vlgmr.msra.gmra.mrb[0].mxu1 %v9191_v42  ;;  %6665 = vmatprep.mubr.bf16.mxu0 %v7150_v19  ;;  %v8304_v19 = vrot.slane %v3920_v1, 5  ;;  %v1406_v42 = vrot.slane %v7222_v17, 5  ;;  %v7224_v17 = vld [vmem:[%s7358_s16 + $0xa0] sm:$0xf]  ;;  %v3946_v36 = vrot.slane %v3944_v0, 5 }
  0xd7   : > { %6486 = vmatpush3.bf16.msra.mxu1 %v7983_v60  ;;  %6457 = vmatprep.mubr.bf16.mxu1 %v9192_v52  ;;  %v8298_v60 = vsel %vm7636_vm5, %v1401_v2, %v1402_v23  ;;  %v3927_v52 = vrot.slane %v3925_v13, 4  ;;  %v3940_v23 = vrot.slane %v3938_v18, 4  ;;  %v3954_v2 = vrot.slane %v3952_v3, 5  ;;  %v7159_v13 = vld [vmem:[%s9167_s1 + $0xd8] sm:$0xff]  }
  0xd8   : > { %6487 = vmatprep.subr.bf16.mxu1 %v7151_v31  ;;  %v3964_v1 = vrot.slane %v3962_v43, 4  ;;  %v1282_v18 = vld [vmem:[%s7358_s16 + $0x9c] sm:$0xe]  ;;  %v1409_v3 = vrot.slane %v7223_v53, 5  ;;  %v8334_v43 = vld [vmem:[%s7358_s16 + $0x64] sm:$0xf] }
  0xd9   : > { %v3931_v5 = vor.u32 %v3930_v25, %v3927_v52  ;;  %9194 = vst [vmem:[#allocation4_spill] sm:$0xff] %v8334_v43  ;;  %v3941_v58 = vor.u32 %v3940_v23, %v8310_v38  ;;  %v1413_v12 = vrot.slane %v7224_v17, 5  ;;  %v9195_v25 = vcombine.low %v8054_v24, %v8058_v35  ;;  %v7156_v23 = vld [vmem:[%s7358_s16 + $0xb4] sm:$0xff]   ;;  %v7162_v24 = vld [vmem:[%s9167_s1 + $0xe0] sm:$0xff]   ;;  %v5823_v17 = vld [vmem:[%s7358_s16 + $0x6c] sm:$0xf] }
  0xda   : > { %v1408_v52 = vrot.slane %v1406_v42, 4  ;;  %v3955_v53 = vor.u32 %v3954_v2, %v3951_v44  ;;  %v3965_v51 = vor.u32 %v3964_v1, %v8312_v34  ;;  %v3973_v35 = vshrl.u32 %v5820_v28, 16  ;;  %v7225_v2 = vld [vmem:[%s7358_s16 + $0xa4] sm:$0x1] }
  0xdb   : > { %6488 = vmatpush3.bf16.msra.mxu1 %v7151_v31  ;;  %v8328_v31 = vsel %vm7636_vm5, %v5454_v22, %v1406_v42  ;;  %v3968_v22 = vshll.u32 %v8308_v39, 16  ;;  %v3986_v42 = vshrl.u32 %v8334_v43, 16  ;;  %v3932_v61 = vrot.slane %v3931_v5, 4  ;;  %v8503_v39 = vld [vmem:[%s7358_s16 + $0x98] sm:$0x1] }
  0xdc   : > { %6489 = vmatprep.subr.bf16.mxu1 %v7155_v30  ;;  %v5455_v44 = vrot.slane %v1282_v18, 9  ;;  %v1416_v1 = vrot.slane %v7225_v2, 5  ;;  %v3956_v5 = vrot.slane %v3955_v53, 4  ;;  %v3966_v18 = vrot.slane %v3965_v51, 4  ;;  %9210 = vst [vmem:[#allocation14_spill] sm:$0xff] %v8503_v39 }
  0xdd   : > { %6666 = vmatmul.mubr.bf16.gmra.mrb[20].mxu0 %v7152_v54  ;;  %v3923_v54 = vsel %vm7390_vm2, %v3918_v62, %v8304_v19  ;;  %v3982_v19 = vshll.u32 %v8334_v43, 16  ;;  %v7158_v62 = vld [vmem:[%s7358_s16 + $0xc0] sm:$0xff]   ;;  %v3970_v10 = vrot.slane %v3968_v22, 5  ;;  %v8370_v43 = vsel %vm7636_vm5, %v1408_v52, %v1409_v3 }
  0xde   : > { %6458 = vmatmul.mubr.bf16.gmra.mrb[4].mxu1 %v9195_v25  ;;  %6669 = vmatprep.mubr.bf16.mxu0 %v7154_v8  ;;  %v3976_v8 = vshll.u32 %v5820_v28, 16  ;;  %v3942_v25 = vrot.slane %v3941_v58, 4  ;;  %v1420_v28 = vrot.slane %v7226_v41, 5  ;;  %v8366_v55 = vcombine.low %v3913_v6, %v3923_v54  ;;  %v7164_v41 = vld [vmem:[%s9167_s1 + $0xe8] sm:$0xff]  }
  0xdf   : > { %6461 = vmatprep.mubr.bf16.mxu1 %v9196_v46  ;;  %6490 = vmatpush3.bf16.msra.mxu1 %v7155_v30  ;;  %v1283_v30 = vld [vmem:[%s7358_s16 + $0xa8] sm:$0xe]  ;;  %v1415_v46 = vrot.slane %v1413_v12, 4  ;;  %v3975_v0 = vrot.slane %v3973_v35, 4  ;;  %v8372_v58 = vrot.slane %v3982_v19, 5  ;;  %v3988_v22 = vrot.slane %v3986_v42, 4 }
  0xe0   : > { %6491 = vmatprep.subr.bf16.mxu1 %v7159_v13  ;;  %v3978_v2 = vrot.slane %v3976_v8, 5  ;;  %v3937_v3 = vsel %vm7390_vm2, %v3932_v61, %v8310_v38  ;;  %v8382_v6 = vsel %vm7636_vm5, %v5455_v44, %v1413_v12  ;;  %v3997_v54 = vshrl.u32 %v5823_v17, 16  ;;  %v7227_v38 = vld [vmem:[%s7358_s16 + $0xb0] sm:$0x1]  ;;  %v1284_v19 = vld [vmem:[%s7358_s16 + $0xb4] sm:$0xe] }
  0xe1   : > { %v4000_v52 = vshll.u32 %v5823_v17, 16  ;;  %v3947_v53 = vsel %vm7390_vm2, %v3942_v25, %v3946_v36  ;;  %v8391_v51 = vsel %vm7636_vm5, %v1415_v46, %v1416_v1  ;;  %v5456_v35 = vrot.slane %v1283_v30, 9  ;;  %v8413_v30 = vld [vmem:[%s7358_s16 + $0x74] sm:$0x1]  ;;  %v7228_v25 = vld [vmem:[%s7358_s16 + $0xb8] sm:$0xf] }
  0xe2   : > { %v1423_v8 = vrot.slane %v7227_v38, 5  ;;  %v9199_v12 = vcombine.low %v8085_v49, %v8099_v4  ;;  %v3961_v42 = vsel %vm7390_vm2, %v3956_v5, %v8312_v34  ;;  %v3971_v61 = vsel %vm7390_vm2, %v3966_v18, %v3970_v10  ;;  %v7160_v4 = vld [vmem:[%s7358_s16 + $0xcc] sm:$0xff]   ;;  %9201 = vst [vmem:[#allocation7_spill] sm:$0xff] %v8413_v30  ;;  %v5829_v38 = vld [vmem:[%s7358_s16 + $0x84] sm:$0xf] }
  0xe3   : > { %6492 = vmatpush3.bf16.msra.mxu1 %v7159_v13  ;;  %v8385_v13 = vld [vmem:[%s7358_s16 + $0x70] sm:$0xf]  ;;  %v1422_v36 = vrot.slane %v1420_v28, 4  ;;  %v3992_v44 = vshll.u32 %v8364_v47, 16  ;;  %v9200_v49 = vcombine.low %v8121_v26, %v8125_v56  ;;  %v3989_v1 = vor.u32 %v3988_v22, %v8372_v58  ;;  %v8430_v22 = vld [vmem:[%s7358_s16 + $0x7c] sm:$0xf] }
  0xe4   : > { %6493 = vmatprep.subr.bf16.mxu1 %v7162_v24  ;;  %9198 = vst [vmem:[#allocation6_spill] sm:$0xff] %v8385_v13  ;;  %v4006_v34 = vshll.u32 %v8385_v13, 16  ;;  %v4010_v10 = vshrl.u32 %v8385_v13, 16  ;;  %v5457_v17 = vrot.slane %v1284_v19, 9  ;;  %v1427_v46 = vrot.slane %v7228_v25, 5  ;;  %9202 = vst [vmem:[#allocation8_spill] sm:$0xff] %v8430_v22 }
  0xe5   : > { %6670 = vmatmul.mubr.bf16.gmra.mrb[24].mxu0 %v7156_v23  ;;  %v7166_v23 = vld [vmem:[%s9167_s1 + $0xf0] sm:$0xff]   ;;  %v3999_v26 = vrot.slane %v3997_v54, 4  ;;  %v4002_v56 = vrot.slane %v4000_v52, 5  ;;  %v8421_v18 = vcombine.low %v3937_v3, %v3947_v53  ;;  %v8433_v19 = vcombine.low %v3961_v42, %v3971_v61  ;;  %v7229_v3 = vld [vmem:[%s7358_s16 + $0xbc] sm:$0x1] }
  0xe6   : > { %6462 = vmatmul.mubr.bf16.gmra.mrb[8].mxu1 %v9199_v12  ;;  %6673 = vmatprep.mubr.bf16.mxu0 %v7158_v62  ;;  %v3979_v62 = vor.u32 %v3978_v2, %v3975_v0  ;;  %v8427_v2 = vsel %vm7636_vm5, %v5456_v35, %v1420_v28  ;;  %v8437_v54 = vsel %vm7636_vm5, %v1422_v36, %v1423_v8  ;;  %v8439_v52 = vrot.slane %v3992_v44, 5  ;;  %v7168_v12 = vld [vmem:[%s9167_s1 + $0xf8] sm:$0xff]   ;;  %v8446_v28 = vld [vmem:[%s7358_s16 + $0x88] sm:$0xf] }
  0xe7   : > { %6465 = vmatprep.mubr.bf16.mxu1 %v9200_v49  ;;  %6494 = vmatpush3.bf16.msra.mxu1 %v7162_v24  ;;  %v5826_v24 = vld [vmem:[%s7358_s16 + $0x78] sm:$0xf]  ;;  %v1430_v53 = vrot.slane %v7229_v3, 5  ;;  %9203 = vst [vmem:[#allocation9_spill] sm:$0xff] %v8446_v28  ;;  %v8450_v42 = vrot.slane %v3989_v1, 4  ;;  %v8452_v61 = vrot.slane %v4006_v34, 5  ;;  %v8456_v36 = vsel %vm7636_vm5, %v5457_v17, %v1427_v46 }
  0xe8   : > { %6495 = vmatprep.subr.bf16.mxu1 %v7164_v41  ;;  %v8448_v35 = vrot.slane %v3979_v62, 4  ;;  %v4012_v8 = vrot.slane %v4010_v10, 4  ;;  %v1429_v44 = vrot.slane %v1427_v46, 4  ;;  %v4003_v49 = vor.u32 %v4002_v56, %v3999_v26  ;;  %v5832_v3 = vld [vmem:[%s7358_s16 + $0x90] sm:$0xf] }
  0xe9   : > { %v4016_v25 = vshll.u32 %v8413_v30, 16  ;;  %v4024_v0 = vshll.u32 %v5826_v24, 16  ;;  %v4030_v62 = vshll.u32 %v8430_v22, 16  ;;  %v4034_v1 = vshrl.u32 %v8430_v22, 16  ;;  %v8463_v34 = vld [vmem:[%s7358_s16 + $0x94] sm:$0xf] }
  0xea   : > { %9204 = vst [vmem:[#allocation10_spill] sm:$0xff] %v8463_v34  ;;  %v9205_v10 = vcombine.low %v8165_v27, %v8169_v29  ;;  %v4045_v17 = vshrl.u32 %v5829_v38, 16  ;;  %v4048_v46 = vshll.u32 %v5829_v38, 16  ;;  %v4058_v26 = vshrl.u32 %v8446_v28, 16  ;;  %v5835_v38 = vld [vmem:[%s7358_s16 + $0x9c] sm:$0xf] }
  0xeb   : > { %6496 = vmatpush3.bf16.msra.mxu1 %v7164_v41  ;;  %v4021_v41 = vshrl.u32 %v5826_v24, 16  ;;  %v9206_v56 = vcombine.low %v8176_v45, %v8180_v14  ;;  %v4013_v29 = vor.u32 %v4012_v8, %v8452_v61  ;;  %v4072_v24 = vshll.u32 %v5832_v3, 16  ;;  %v8485_v45 = vld [vmem:[%s7358_s16 + $0x80] sm:$0x1] }
  0xec   : > { %6497 = vmatprep.subr.bf16.mxu1 %v7166_v23  ;;  %v8482_v5 = vrot.slane %v4016_v25, 5  ;;  %9207 = vst [vmem:[#allocation11_spill] sm:$0xff] %v8485_v45  ;;  %v4078_v14 = vshll.u32 %v8463_v34, 16  ;;  %v4026_v27 = vrot.slane %v4024_v0, 5  ;;  %v4036_v8 = vrot.slane %v4034_v1, 4 }
  0xed   : > { %6674 = vmatmul.mubr.bf16.gmra.mrb[28].mxu0 %v7160_v4  ;;  %v4054_v4 = vshll.u32 %v8446_v28, 16  ;;  %v8489_v28 = vrot.slane %v4030_v62, 5  ;;  %v8495_v22 = vld [vmem:[%s7358_s16 + $0xa0] sm:$0xf]  ;;  %v4047_v25 = vrot.slane %v4045_v17, 4  ;;  %v4050_v30 = vrot.slane %v4048_v46, 5 }
  0xee   : > { %6466 = vmatmul.mubr.bf16.gmra.mrb[12].mxu1 %v9205_v10  ;;  %6693 = vmatprep.mubr.bf16.mxu0 %v8234_v59  ;;  %v4069_v59 = vshrl.u32 %v5832_v3, 16  ;;  %v8480_v10 = vrot.slane %v4003_v49, 4  ;;  %v8492_v3 = vld [vmem:[%s7358_s16 + $0x8c] sm:$0x1]  ;;  %9209 = vst [vmem:[#allocation13_spill] sm:$0xff] %v8495_v22  ;;  %v4060_v47 = vrot.slane %v4058_v26, 4  ;;  %v8512_v62 = vsel %vm7636_vm5, %v1429_v44, %v1430_v53 }
  0xef   : > { %6469 = vmatprep.mubr.bf16.mxu1 %v9206_v56  ;;  %6498 = vmatpush3.bf16.msra.mxu1 %v7166_v23  ;;  %v4082_v23 = vshrl.u32 %v8463_v34, 16  ;;  %v4023_v56 = vrot.slane %v4021_v41, 4  ;;  %9208 = vst [vmem:[#allocation12_spill] sm:$0xff] %v8492_v3  ;;  %v7165_v49 = vld [vmem:[%s9167_s1 + $0x208] sm:$0xff]   ;;  %v8500_v13 = vrot.slane %v4054_v4, 5  ;;  %v4074_v34 = vrot.slane %v4072_v24, 5 }
  0xf0   : > { %6499 = vmatprep.subr.bf16.mxu1 %v7168_v12  ;;  %v5838_v41 = vld [vmem:[%s7358_s16 + $0xa8] sm:$0xf]  ;;  %v4071_v1 = vrot.slane %v4069_v59, 4  ;;  %v8517_v17 = vld [vmem:[%s9167_s1 + $0x100] sm:$0xff]   ;;  %v8520_v46 = vrot.slane %v4078_v14, 5  ;;  %v4093_v26 = vshrl.u32 %v5835_v38, 16  ;;  %v9212_v24 = vcombine.low %v8184_v16, %v8194_v15 }
  0xf1   : > { %9211 = vst [vmem:[#allocation15_spill] sm:$0xff] %v8517_v17  ;;  %v4084_v4 = vrot.slane %v4082_v23, 4  ;;  %v4096_v0 = vshll.u32 %v5835_v38, 16  ;;  %v8523_v53 = vrot.slane %v4013_v29, 4  ;;  %v4102_v44 = vshll.u32 %v8495_v22, 16  ;;  %v7167_v16 = vld [vmem:[%s9167_s1 + $0x210] sm:$0xff]  }
  0xf2   : > { %v4106_v59 = vshrl.u32 %v8495_v22, 16  ;;  %v4027_v14 = vor.u32 %v4026_v27, %v4023_v56  ;;  %v4037_v38 = vor.u32 %v4036_v8, %v8489_v28  ;;  %v4051_v23 = vor.u32 %v4050_v30, %v4047_v25  ;;  %v8535_v29 = vld [vmem:[%s7358_s16 + $0xac] sm:$0xf]  ;;  %v8548_v25 = vld [vmem:[%s7358_s16 + $0xa4] sm:$0x1] }
  0xf3   : > { %6500 = vmatpush3.bf16.msra.mxu1 %v7168_v12  ;;  %v4040_v12 = vshll.u32 %v8485_v45, 16  ;;  %9213 = vst [vmem:[#allocation16_spill] sm:$0xff] %v8535_v29  ;;  %v4061_v15 = vor.u32 %v4060_v47, %v8500_v13  ;;  %v4117_v27 = vshrl.u32 %v5838_v41, 16  ;;  %v4120_v30 = vshll.u32 %v5838_v41, 16 }
  0xf4   : > { %6773 = vmatprep.subr.bf16.mxu1 %v8517_v17  ;;  %v9214_v17 = vcombine.low %v8240_v20, %v8261_v7  ;;  %v4075_v56 = vor.u32 %v4074_v34, %v4071_v1  ;;  %v4085_v8 = vor.u32 %v4084_v4, %v8520_v46  ;;  %v4095_v20 = vrot.slane %v4093_v26, 4 }
  0xf5   : > { %6694 = vmatmul.mubr.bf16.vlgmr.msra.gmra.mrb[0].mxu0 %v8317_v50  ;;  %v4064_v50 = vshll.u32 %v8492_v3, 16  ;;  %v4098_v7 = vrot.slane %v4096_v0, 5  ;;  %v4130_v22 = vshrl.u32 %v8535_v29, 16  ;;  %v4028_v47 = vrot.slane %v4027_v14, 4  ;;  %v7169_v0 = vld [vmem:[%s9167_s1 + $0x218] sm:$0xff]  }
  0xf6   : > { %6470 = vmatmul.mubr.bf16.gmra.mrb[16].mxu1 %v9212_v24  ;;  %6726 = vmatpush3.bf16.msra.mxu0 %v8221_v21  ;;  %v4088_v21 = vshll.u32 %v8503_v39, 16  ;;  %v4126_v24 = vshll.u32 %v8535_v29, 16  ;;  %v4038_v39 = vrot.slane %v4037_v38, 4  ;;  %v4042_v3 = vrot.slane %v4040_v12, 5 }
  0xf7   : > { %6473 = vmatprep.mubr.bf16.mxu1 %v9214_v17  ;;  %6697 = vmatprep.mubr.bf16.mxu0 %v8321_v48  ;;  %v8550_v17 = vrot.slane %v4102_v44, 5  ;;  %v4108_v48 = vrot.slane %v4106_v59, 4  ;;  %v4066_v41 = vrot.slane %v4064_v50, 5  ;;  %v4052_v34 = vrot.slane %v4051_v23, 4 }
  0xf8   : > { %6727 = vmatprep.subr.bf16.mxu0 %v7165_v49  ;;  %v4062_v1 = vrot.slane %v4061_v15, 4  ;;  %v4119_v4 = vrot.slane %v4117_v27, 4  ;;  %v4122_v45 = vrot.slane %v4120_v30, 5  ;;  %v4076_v26 = vrot.slane %v4075_v56, 4  ;;  %v8616_v27 = vld [vmem:[%s7358_s16 + $0xbc] sm:$0x1] }
  0xf9   : > { %v4090_v44 = vrot.slane %v4088_v21, 5  ;;  %v4099_v59 = vor.u32 %v4098_v7, %v4095_v20  ;;  %v4112_v29 = vshll.u32 %v8548_v25, 16  ;;  %v4109_v12 = vor.u32 %v4108_v48, %v8550_v17  ;;  %v8583_v21 = vld [vmem:[%s7358_s16 + $0xb0] sm:$0x1] }
  0xfa   : > { %6728 = vmatpush3.bf16.msra.mxu0 %v7165_v49  ;;  %v4086_v49 = vrot.slane %v4085_v8, 4  ;;  %v8560_v14 = vrot.slane %v4126_v24, 5  ;;  %v4132_v38 = vrot.slane %v4130_v22, 4  ;;  %v9215_v23 = vor.u32 %v7968_v57, %v7966_v11 }
  0xfb   : > { %6729 = vmatprep.subr.bf16.mxu0 %v7167_v16  ;;  %v9216_v15 = vcombine.low %v8273_v40, %v8298_v60  ;;  %v4019_v22 = vsel %vm7390_vm2, %v8523_v53, %v8482_v5  ;;  %v4033_v57 = vsel %vm7390_vm2, %v4028_v47, %v8489_v28  ;;  %v9217_v40 = vcombine.low %v8328_v31, %v8370_v43  ;;  %v7172_v31 = vld [vmem:[%s9167_s1 + $0x220] sm:$0xff]  }
  0xfc   : > { %v8565_v50 = vrot.slane %v9215_v23, 4  ;;  %v4043_v60 = vsel %vm7390_vm2, %v4038_v39, %v4042_v3  ;;  %v4123_v5 = vor.u32 %v4122_v45, %v4119_v4  ;;  %v4067_v28 = vsel %vm7390_vm2, %v4062_v1, %v4066_v41  ;;  %v5894_v41 = vld [vmem:[%s7358_s16 + $0x48] sm:$0xe] }
  0xfd   : > { %6698 = vmatmul.mubr.bf16.gmra.mrb[4].mxu0 %v8366_v55  ;;  %v4009_v55 = vsel %vm7390_vm2, %v8480_v10, %v8452_v61  ;;  %v5841_v61 = vld [vmem:[%s7358_s16 + $0xb4] sm:$0xf]  ;;  %v8595_v10 = vld [vmem:[%s7358_s16 + $0xb8] sm:$0xf]  ;;  %v4081_v39 = vsel %vm7390_vm2, %v4076_v26, %v8520_v46  ;;  %v8605_v43 = vrot.slane %v4099_v59, 4  ;;  %v8607_v3 = vrot.slane %v4112_v29, 5 }
  0xfe   : > { %6474 = vmatmul.mubr.bf16.gmra.mrb[20].mxu1 %v9216_v15  ;;  %6701 = vmatprep.mubr.bf16.mxu0 %v8421_v18  ;;  %v4057_v18 = vsel %vm7390_vm2, %v4052_v34, %v8500_v13  ;;  %v4091_v13 = vsel %vm7390_vm2, %v4086_v49, %v4090_v44  ;;  %v8611_v45 = vrot.slane %v4109_v12, 4  ;;  %v4133_v53 = vor.u32 %v4132_v38, %v8560_v14  ;;  %v5895_v26 = vld [vmem:[%s7358_s16 + $0x54] sm:$0xe] }
  0xff   : > { %6477 = vmatprep.mubr.bf16.mxu1 %v9217_v40  ;;  %6730 = vmatpush3.bf16.msra.mxu0 %v7167_v16  ;;  %v4136_v16 = vshll.u32 %v8583_v21, 16  ;;  %v9218_v46 = vsel %vm7390_vm2, %v8450_v42, %v8439_v52  ;;  %v9219_v29 = vsel %vm7390_vm2, %v8448_v35, %v8372_v58  ;;  %v4141_v56 = vshrl.u32 %v5841_v61, 16 }
 0x100   : > { %6731 = vmatprep.subr.bf16.mxu0 %v7169_v0  ;;  %v5872_v30 = vcombine.low %v9219_v29, %v9218_v46  ;;  %v4144_v8 = vshll.u32 %v5841_v61, 16  ;;  %v4150_v20 = vshll.u32 %v8595_v10, 16  ;;  %v5488_v7 = vcombine.low %v8427_v2, %v8437_v54  ;;  %v7175_v2 = vld [vmem:[%s9167_s1 + $0x228] sm:$0xff]   ;;  %v5844_v54 = vld [vmem:[%s7358_s16 + $0xc0] sm:$0xf]  ;;  %v9223_v29 = vld [vmem:[#allocation5_spill] sm:$0xff] }
 0x101   : > { %v5489_v48 = vcombine.low %v8456_v36, %v8512_v62  ;;  %v5873_v24 = vcombine.low %v4009_v55, %v4019_v22  ;;  %v8633_v52 = vrot.slane %v4123_v5, 4  ;;  %v5874_v42 = vcombine.low %v4033_v57, %v4043_v60 }
 0x102   : > { %v8635_v58 = vcombine.low %v4057_v18, %v4067_v28  ;;  %v8637_v35 = vcombine.low %v4081_v39, %v4091_v13  ;;  %v4105_v47 = vsel %vm7390_vm2, %v8605_v43, %v8550_v17  ;;  %v4115_v34 = vsel %vm7390_vm2, %v8611_v45, %v8607_v3  ;;  %v5897_v28 = vld [vmem:[%s7358_s16 + $0x6c] sm:$0xe] }
 0x103   : > { %6732 = vmatpush3.bf16.msra.mxu0 %v7169_v0  ;;  %v8653_v1 = vrot.slane %v4133_v53, 4  ;;  %v8655_v4 = vrot.slane %v4136_v16, 5  ;;  %v4154_v0 = vshrl.u32 %v8595_v10, 16  ;;  %v9220_v44 = vcombine.low %v8382_v6, %v8391_v51  ;;  %v7178_v6 = vld [vmem:[%s9167_s1 + $0x230] sm:$0xff]   ;;  %v8677_v51 = vld [vmem:[%s7358_s16 + $0xc4] sm:$0xf] }
 0x104   : > { %6733 = vmatprep.subr.bf16.mxu0 %v7172_v31  ;;  %v8662_v59 = vrot.slane %v4141_v56, 4  ;;  %v8666_v49 = vrot.slane %v4150_v20, 5  ;;  %v4160_v12 = vshll.u32 %v8616_v27, 16  ;;  %v4129_v38 = vsel %vm7390_vm2, %v8633_v52, %v8560_v14  ;;  %v5896_v14 = vld [vmem:[%s7358_s16 + $0x60] sm:$0xe]  ;;  %v9221_v39 = vld [vmem:[#allocation3_spill] sm:$0xff] }
 0x105   : > { %6702 = vmatmul.mubr.bf16.gmra.mrb[8].mxu0 %v8433_v19  ;;  %v8664_v19 = vrot.slane %v4144_v8, 5  ;;  %v4165_v23 = vshrl.u32 %v5844_v54, 16  ;;  %v5910_v15 = vrot.slane %v5894_v41, 9  ;;  %v4628_v55 = vrot.slane %v8253_v32, 5  ;;  %v7170_v13 = vld [vmem:[%s7358_s16 + $0xc] sm:$0xff]   ;;  %v7181_v56 = vld [vmem:[%s9167_s1 + $0x238] sm:$0xff]  }
 0x106   : > { %6478 = vmatmul.mubr.bf16.gmra.mrb[24].mxu1 %v9220_v44  ;;  %6705 = vmatprep.mubr.bf16.mxu0 %v5872_v30  ;;  %v4168_v22 = vshll.u32 %v5844_v54, 16  ;;  %v4631_v57 = vrot.slane %v8301_v63, 5  ;;  %v5911_v40 = vrot.slane %v5895_v26, 9  ;;  %v4635_v60 = vrot.slane %v8265_v33, 5  ;;  %v9222_v16 = vld [vmem:[#allocation4_spill] sm:$0xff]  ;;  %v9224_v52 = vld [vmem:[#allocation6_spill] sm:$0xff] }
 0x107   : > { %6481 = vmatprep.mubr.bf16.mxu1 %v5488_v7  ;;  %6734 = vmatpush3.bf16.msra.mxu0 %v7172_v31  ;;  %v4139_v18 = vsel %vm7390_vm2, %v8653_v1, %v8655_v4  ;;  %v8687_v5 = vrot.slane %v4154_v0, 4  ;;  %v8691_v61 = vsel %vm7636_vm5, %v5910_v15, %v4628_v55  ;;  %v4630_v32 = vrot.slane %v4628_v55, 4  ;;  %v9225_v4 = vld [vmem:[#allocation7_spill] sm:$0xff] }
 0x108   : > { %6735 = vmatprep.subr.bf16.mxu0 %v7175_v2  ;;  %v4174_v31 = vshll.u32 %v8677_v51, 16  ;;  %v8697_v63 = vsel %vm7636_vm5, %v5911_v40, %v4635_v60  ;;  %v4637_v33 = vrot.slane %v4635_v60, 4  ;;  %v4638_v3 = vrot.slane %v9221_v39, 5  ;;  %v8728_v26 = vld [vmem:[%s7358_s16 + $0xc8] sm:$0x1]  ;;  %v7171_v40 = vld [vmem:[%s7358_s16 + $0x18] sm:$0xff]  }
 0x109   : > { %v8703_v45 = vsel %vm7636_vm5, %v4630_v32, %v4631_v57  ;;  %v5912_v53 = vrot.slane %v5896_v14, 9  ;;  %v4642_v46 = vrot.slane %v9222_v16, 5  ;;  %v4645_v30 = vrot.slane %v9223_v29, 5  ;;  %v7173_v39 = vld [vmem:[%s7358_s16 + $0x24] sm:$0xff]  }
 0x10a   : > { %v5942_v8 = vcombine.low %v8691_v61, %v8703_v45  ;;  %v8714_v20 = vsel %vm7636_vm5, %v4637_v33, %v4638_v3  ;;  %v5913_v7 = vrot.slane %v5897_v28, 9  ;;  %v4652_v0 = vrot.slane %v9225_v4, 5  ;;  %v9227_v28 = vld [vmem:[#allocation11_spill] sm:$0xff]  ;;  %v5603_v61 = vld [vmem:[%s7358_s16 + $0x90] sm:$0xf] }
 0x10b   : > { %6736 = vmatpush3.bf16.msra.mxu0 %v7175_v2  ;;  %v4649_v2 = vrot.slane %v9224_v52, 5  ;;  %v5943_v54 = vcombine.low %v8697_v63, %v8714_v20  ;;  %v8721_v41 = vsel %vm7636_vm5, %v5912_v53, %v4642_v46  ;;  %v4644_v1 = vrot.slane %v4642_v46, 4  ;;  %v9228_v53 = vld [vmem:[#allocation2_spill] sm:$0xff]  ;;  %v7187_v45 = vld [vmem:[%s7358_s16 + $0xa8] sm:$0xff]  }
 0x10c   : > { %6737 = vmatprep.subr.bf16.mxu0 %v7178_v6  ;;  %v8730_v44 = vrot.slane %v4165_v23, 4  ;;  %v8743_v36 = vcombine.low %v4105_v47, %v4115_v34  ;;  %v4147_v62 = vor.u32 %v8664_v19, %v8662_v59  ;;  %v5898_v23 = vld [vmem:[%s7358_s16 + $0x78] sm:$0xe]  ;;  %v8755_v57 = vrot.slane %v4160_v12, 5  ;;  %v5847_v12 = vld [vmem:[%s7358_s16 + $0xcc] sm:$0xf] }
 0x10d   : > { %6706 = vmatmul.mubr.bf16.gmra.mrb[12].mxu0 %v5873_v24  ;;  %v8732_v24 = vrot.slane %v4168_v22, 5  ;;  %v8736_v15 = vsel %vm7636_vm5, %v5913_v7, %v4649_v2  ;;  %v4651_v55 = vrot.slane %v4649_v2, 4  ;;  %v8753_v22 = vcombine.low %v4129_v38, %v4139_v18  ;;  %v5597_v47 = vld [vmem:[%s7358_s16 + $0x78] sm:$0xf]  ;;  %v9226_v18 = vld [vmem:[#allocation8_spill] sm:$0xff] }
 0x10e   : > { %6482 = vmatmul.mubr.bf16.gmra.mrb[28].mxu1 %v5489_v48  ;;  %6709 = vmatprep.mubr.bf16.mxu0 %v5874_v42  ;;  %v4178_v48 = vshrl.u32 %v8677_v51, 16  ;;  %v8750_v42 = vsel %vm7636_vm5, %v4644_v1, %v4645_v30  ;;  %v4157_v34 = vor.u32 %v8687_v5, %v8666_v49  ;;  %v8766_v59 = vrot.slane %v4174_v31, 5  ;;  %v8780_v31 = vld [vmem:[%s7358_s16 + $0xd0] sm:$0xf]  ;;  %v9229_v1 = vld [vmem:[#allocation9_spill] sm:$0xff] }
 0x10f   : > { %6501 = vmatprep.mubr.bf16.mxu1 %v7170_v13  ;;  %6738 = vmatpush3.bf16.msra.mxu0 %v7178_v6  ;;  %v5944_v17 = vcombine.low %v8721_v41, %v8750_v42  ;;  %v8761_v43 = vsel %vm7636_vm5, %v4651_v55, %v4652_v0  ;;  %v4184_v19 = vshll.u32 %v8728_v26, 16  ;;  %v5899_v6 = vld [vmem:[%s7358_s16 + $0x84] sm:$0xe]  ;;  %v4171_v60 = vor.u32 %v8732_v24, %v8730_v44  ;;  %v9230_v24 = vld [vmem:[#allocation12_spill] sm:$0xff]  ;;  %v7251_v63 = vld [vmem:[%s7358_s16 + $0x8c] sm:$0x1] }
 0x110   : > { %6739 = vmatprep.subr.bf16.mxu0 %v7181_v56  ;;  %v5945_v38 = vcombine.low %v8736_v15, %v8761_v43  ;;  %v5914_v14 = vrot.slane %v5898_v23, 9  ;;  %v4656_v32 = vrot.slane %v9226_v18, 5  ;;  %v4659_v33 = vrot.slane %v9227_v28, 5 }
 0x111   : > { %v4180_v5 = vrot.slane %v4178_v48, 4  ;;  %v2406_v3 = vshrl.u32 %v5597_v47, 16  ;;  %v2409_v13 = vshll.u32 %v5597_v47, 16  ;;  %v2428_v16 = vsel %vm7390_vm2, %v8565_v50, %v9228_v53 }
 0x112   : > { %v4189_v46 = vshrl.u32 %v5847_v12, 16  ;;  %v8788_v29 = vsel %vm7636_vm5, %v5914_v14, %v4656_v32  ;;  %v4658_v30 = vrot.slane %v4656_v32, 4  ;;  %v5915_v7 = vrot.slane %v5899_v6, 9  ;;  %v7231_v6 = vld [vmem:[%s9167_s1 + $0x108] sm:$0xff]  }
 0x113   : > { %6740 = vmatpush3.bf16.msra.mxu0 %v7181_v56  ;;  %v4192_v52 = vshll.u32 %v5847_v12, 16  ;;  %v2408_v2 = vrot.slane %v2406_v3, 4  ;;  %v2411_v56 = vrot.slane %v2409_v13, 5  ;;  %v4663_v4 = vrot.slane %v9229_v1, 5  ;;  %v5900_v12 = vld [vmem:[%s7358_s16 + $0x90] sm:$0xe] }
 0x114   : > { %v4198_v50 = vshll.u32 %v8780_v31, 16  ;;  %v4202_v0 = vshrl.u32 %v8780_v31, 16  ;;  %v8797_v44 = vsel %vm7636_vm5, %v4658_v30, %v4659_v33  ;;  %v4666_v55 = vrot.slane %v9230_v24, 5  ;;  %v7174_v3 = vld [vmem:[%s7358_s16 + $0x30] sm:$0xff]  }
 0x115   : > { %6710 = vmatmul.mubr.bf16.gmra.mrb[16].mxu0 %v8635_v58  ;;  %v9231_v58 = vld [vmem:[#allocation15_spill] sm:$0xff]  ;;  %v4181_v48 = vor.u32 %v4180_v5, %v8766_v59  ;;  %v2412_v23 = vor.u32 %v2411_v56, %v2408_v2  ;;  %v4665_v47 = vrot.slane %v4663_v4, 4  ;;  %v4158_v14 = vrot.slane %v4157_v34, 4  ;;  %v8818_v13 = vld [vmem:[%s7358_s16 + $0xd4] sm:$0x1]  ;;  %v9232_v2 = vld [vmem:[#allocation10_spill] sm:$0xff] }
 0x116   : > { %6502 = vmatmul.mubr.bf16.vlgmr.msra.gmra.mrb[0].mxu1 %v7171_v40  ;;  %6713 = vmatprep.mubr.bf16.mxu0 %v8637_v35  ;;  %v5946_v35 = vcombine.low %v8788_v29, %v8797_v44  ;;  %v4148_v40 = vrot.slane %v4147_v62, 4  ;;  %v4186_v18 = vrot.slane %v4184_v19, 5  ;;  %v8810_v32 = vsel %vm7636_vm5, %v5915_v7, %v4663_v4  ;;  %v7176_v19 = vld [vmem:[%s7358_s16 + $0x3c] sm:$0xff]   ;;  %v7232_v1 = vld [vmem:[%s9167_s1 + $0x110] sm:$0xff]  }
 0x117   : > { %6781 = vmatpush3.bf16.msra.mxu1 %v9231_v58  ;;  %6505 = vmatprep.mubr.bf16.mxu1 %v7173_v39  ;;  %v4191_v28 = vrot.slane %v4189_v46, 4  ;;  %v4194_v33 = vrot.slane %v4192_v52, 5  ;;  %v2413_v39 = vrot.slane %v2412_v23, 4  ;;  %v8814_v5 = vsel %vm7636_vm5, %v4665_v47, %v4666_v55  ;;  %v7233_v47 = vld [vmem:[%s7358_s16 + $0x1c] sm:$0xf] }
 0x118   : > { %6774 = vmatprep.subr.bf16.mxu1 %v7231_v6  ;;  %v8820_v53 = vrot.slane %v4198_v50, 5  ;;  %v4204_v30 = vrot.slane %v4202_v0, 4  ;;  %v5947_v62 = vcombine.low %v8810_v32, %v8814_v5  ;;  %v5916_v34 = vrot.slane %v5900_v12, 9 }
 0x119   : > { %v4172_v7 = vrot.slane %v4171_v60, 4  ;;  %v4182_v46 = vrot.slane %v4181_v48, 4  ;;  %v2418_v52 = vsel %vm7390_vm2, %v2413_v39, %v7966_v11  ;;  %v4670_v56 = vrot.slane %v9232_v2, 5  ;;  %v9233_v11 = vld [vmem:[#allocation14_spill] sm:$0xff]  ;;  %v7177_v39 = vld [vmem:[%s7358_s16 + $0x48] sm:$0xff]  }
 0x11a   : > { %v4153_v4 = vsel %vm7390_vm2, %v4148_v40, %v8666_v49  ;;  %v4163_v60 = vsel %vm7390_vm2, %v4158_v14, %v8755_v57  ;;  %v8838_v50 = vcombine.low %v2418_v52, %v2428_v16  ;;  %v4673_v0 = vrot.slane %v9233_v11, 5  ;;  %v5890_v57 = vld [vmem:[%s7358_s16 + $0x18] sm:$0xe]  ;;  %v5901_v16 = vld [vmem:[%s7358_s16 + $0x9c] sm:$0xe] }
 0x11b   : > { %6782 = vmatpush3.bf16.msra.mxu1 %v7231_v6  ;;  %v4195_v24 = vor.u32 %v4194_v33, %v4191_v28  ;;  %v4208_v55 = vshll.u32 %v8818_v13, 16  ;;  %v8845_v58 = vsel %vm7636_vm5, %v5916_v34, %v4670_v56  ;;  %v4672_v48 = vrot.slane %v4670_v56, 4  ;;  %v7234_v40 = vld [vmem:[%s9167_s1 + $0x118] sm:$0xff]   ;;  %v7235_v2 = vld [vmem:[%s7358_s16 + $0x20] sm:$0x1] }
 0x11c   : > { %6775 = vmatprep.subr.bf16.mxu1 %v7232_v1  ;;  %v4205_v49 = vor.u32 %v4204_v30, %v8820_v53  ;;  %v4187_v23 = vsel %vm7390_vm2, %v4182_v46, %v4186_v18  ;;  %v4600_v12 = vrot.slane %v7233_v47, 5  ;;  %v5879_v6 = vcombine.low %v4153_v4, %v4163_v60  ;;  %v9234_v34 = vld [vmem:[#allocation13_spill] sm:$0xff]  ;;  %v5902_v11 = vld [vmem:[%s7358_s16 + $0xa8] sm:$0xe] }
 0x11d   : > { %6714 = vmatmul.mubr.bf16.gmra.mrb[20].mxu0 %v8743_v36  ;;  %v4177_v36 = vsel %vm7390_vm2, %v4172_v7, %v8766_v59  ;;  %v4196_v14 = vrot.slane %v4195_v24, 4  ;;  %v4210_v28 = vrot.slane %v4208_v55, 5  ;;  %v5906_v18 = vrot.slane %v5890_v57, 9  ;;  %v7179_v46 = vld [vmem:[%s7358_s16 + $0x54] sm:$0xff]   ;;  %v5891_v55 = vld [vmem:[%s7358_s16 + $0x24] sm:$0xe] }
 0x11e   : > { %6506 = vmatmul.mubr.bf16.gmra.mrb[4].mxu1 %v7174_v3  ;;  %6717 = vmatprep.mubr.bf16.mxu0 %v8753_v22  ;;  %v8859_v22 = vsel %vm7636_vm5, %v4672_v48, %v4673_v0  ;;  %v5917_v33 = vrot.slane %v5901_v16, 9  ;;  %v5880_v3 = vcombine.low %v4177_v36, %v4187_v23  ;;  %v4206_v30 = vrot.slane %v4205_v49, 4  ;;  %v7237_v48 = vld [vmem:[%s7358_s16 + $0x28] sm:$0xf]  ;;  %v7238_v36 = vld [vmem:[%s7358_s16 + $0x34] sm:$0xf] }
 0x11f   : > { %6509 = vmatprep.mubr.bf16.mxu1 %v7176_v19  ;;  %6783 = vmatpush3.bf16.msra.mxu1 %v7232_v1  ;;  %v5948_v59 = vcombine.low %v8845_v58, %v8859_v22  ;;  %v4677_v19 = vrot.slane %v9234_v34, 5  ;;  %v4680_v7 = vrot.slane %v8548_v25, 5  ;;  %v4602_v52 = vrot.slane %v4600_v12, 4  ;;  %v7236_v1 = vld [vmem:[%s9167_s1 + $0x120] sm:$0xff]  }
 0x120   : > { %6776 = vmatprep.subr.bf16.mxu1 %v7234_v40  ;;  %v4603_v56 = vrot.slane %v7235_v2, 5  ;;  %v4601_v25 = vsel %vm7636_vm5, %v5906_v18, %v4600_v12  ;;  %v4201_v0 = vsel %vm7390_vm2, %v4196_v14, %v8820_v53  ;;  %v4211_v24 = vsel %vm7390_vm2, %v4206_v30, %v4210_v28  ;;  %v5892_v12 = vld [vmem:[%s7358_s16 + $0x30] sm:$0xe]  ;;  %v7180_v30 = vld [vmem:[%s7358_s16 + $0x60] sm:$0xff]  }
 0x121   : > { %v8876_v4 = vsel %vm7636_vm5, %v5917_v33, %v4677_v19  ;;  %v4679_v60 = vrot.slane %v4677_v19, 4  ;;  %v4607_v49 = vrot.slane %v7237_v48, 5  ;;  %v4614_v23 = vrot.slane %v7238_v36, 5  ;;  %v7240_v33 = vld [vmem:[%s7358_s16 + $0x2c] sm:$0x1] }
 0x122   : > { %v4604_v16 = vsel %vm7636_vm5, %v4602_v52, %v4603_v56  ;;  %v5918_v47 = vrot.slane %v5902_v11, 9  ;;  %v5881_v28 = vcombine.low %v4201_v0, %v4211_v24  ;;  %v5907_v18 = vrot.slane %v5891_v55, 9  ;;  %v7182_v52 = vld [vmem:[%s7358_s16 + $0x6c] sm:$0xff]   ;;  %v5903_v11 = vld [vmem:[%s7358_s16 + $0xb4] sm:$0xe] }
 0x123   : > { %6784 = vmatpush3.bf16.msra.mxu1 %v7234_v40  ;;  %v8890_v57 = vsel %vm7636_vm5, %v4679_v60, %v4680_v7  ;;  %v9235_v40 = vld [vmem:[#allocation16_spill] sm:$0xff]  ;;  %v5938_v34 = vcombine.low %v4601_v25, %v4604_v16  ;;  %v4609_v19 = vrot.slane %v4607_v49, 4  ;;  %v5908_v2 = vrot.slane %v5892_v12, 9  ;;  %v5893_v0 = vld [vmem:[%s7358_s16 + $0x3c] sm:$0xe] }
 0x124   : > { %6777 = vmatprep.subr.bf16.mxu1 %v7236_v1  ;;  %v5949_v53 = vcombine.low %v8876_v4, %v8890_v57  ;;  %v4684_v14 = vrot.slane %v9235_v40, 5  ;;  %v4616_v56 = vrot.slane %v4614_v23, 4  ;;  %v7242_v24 = vld [vmem:[%s7358_s16 + $0x40] sm:$0xf]  ;;  %v4608_v48 = vsel %vm7636_vm5, %v5907_v18, %v4607_v49  ;;  %v7244_v18 = vld [vmem:[%s7358_s16 + $0x44] sm:$0x1] }
 0x125   : > { %6718 = vmatmul.mubr.bf16.gmra.mrb[24].mxu0 %v5879_v6  ;;  %v7239_v6 = vld [vmem:[%s9167_s1 + $0x128] sm:$0xff]   ;;  %v4621_v55 = vrot.slane %v7242_v24, 5  ;;  %v4691_v12 = vrot.slane %v8595_v10, 5  ;;  %v4615_v49 = vsel %vm7636_vm5, %v5908_v2, %v4614_v23  ;;  %v7245_v10 = vld [vmem:[%s9167_s1 + $0x138] sm:$0xff]   ;;  %v5904_v23 = vld [vmem:[%s7358_s16 + $0xc0] sm:$0xe] }
 0x126   : > { %6510 = vmatmul.mubr.bf16.gmra.mrb[8].mxu1 %v7177_v39  ;;  %6721 = vmatprep.mubr.bf16.mxu0 %v5880_v3  ;;  %v4610_v39 = vrot.slane %v7240_v33, 5  ;;  %v4687_v3 = vrot.slane %v8583_v21, 5  ;;  %v8907_v7 = vsel %vm7636_vm5, %v5918_v47, %v4684_v14  ;;  %v7243_v21 = vld [vmem:[%s9167_s1 + $0x130] sm:$0xff]   ;;  %v5919_v47 = vrot.slane %v5903_v11, 9 }
 0x127   : > { %6513 = vmatprep.mubr.bf16.mxu1 %v7179_v46  ;;  %6785 = vmatpush3.bf16.msra.mxu1 %v7236_v1  ;;  %v4686_v46 = vrot.slane %v4684_v14, 4  ;;  %v7241_v1 = vld [vmem:[%s7358_s16 + $0x38] sm:$0x1]  ;;  %v5909_v14 = vrot.slane %v5893_v0, 9  ;;  %v4624_v33 = vrot.slane %v7244_v18, 5  ;;  %v4698_v11 = vrot.slane %v8677_v51, 5 }
 0x128   : > { %6778 = vmatprep.subr.bf16.mxu1 %v7239_v6  ;;  %v4617_v60 = vrot.slane %v7241_v1, 5  ;;  %v4611_v36 = vsel %vm7636_vm5, %v4609_v19, %v4610_v39  ;;  %v4693_v39 = vrot.slane %v4691_v12, 4  ;;  %v5594_v19 = vld [vmem:[%s7358_s16 + $0x6c] sm:$0xf]  ;;  %v7185_v18 = vld [vmem:[%s7358_s16 + $0x90] sm:$0xff]   ;;  %v2449_v20 = vshll.u32 %v7251_v63, 16 }
 0x129   : > { %v8919_v25 = vsel %vm7636_vm5, %v4686_v46, %v4687_v3  ;;  %v5939_v3 = vcombine.low %v4608_v48, %v4611_v36  ;;  %v4622_v1 = vsel %vm7636_vm5, %v5909_v14, %v4621_v55  ;;  %v2382_v0 = vshrl.u32 %v5594_v19, 16  ;;  %v5905_v51 = vld [vmem:[%s7358_s16 + $0xcc] sm:$0xe] }
 0x12a   : > { %v5950_v16 = vcombine.low %v8907_v7, %v8919_v25  ;;  %v4618_v40 = vsel %vm7636_vm5, %v4616_v56, %v4617_v60  ;;  %v5920_v56 = vrot.slane %v5904_v23, 9  ;;  %v2385_v24 = vshll.u32 %v5594_v19, 16 }
 0x12b   : > { %6786 = vmatpush3.bf16.msra.mxu1 %v7239_v6  ;;  %v4694_v6 = vrot.slane %v8616_v27, 5  ;;  %v8939_v27 = vsel %vm7636_vm5, %v5919_v47, %v4691_v12  ;;  %v4701_v36 = vrot.slane %v8728_v26, 5  ;;  %v4700_v12 = vrot.slane %v4698_v11, 4 }
 0x12c   : > { %6779 = vmatprep.subr.bf16.mxu1 %v7243_v21  ;;  %v2387_v26 = vrot.slane %v2385_v24, 5  ;;  %v4708_v23 = vrot.slane %v8818_v13, 5 }
 0x12d   : > { %6722 = vmatmul.mubr.bf16.gmra.mrb[28].mxu0 %v5881_v28  ;;  %v4623_v28 = vrot.slane %v4621_v55, 4  ;;  %v8946_v46 = vsel %vm7636_vm5, %v4693_v39, %v4694_v6  ;;  %v8960_v55 = vsel %vm7636_vm5, %v5920_v56, %v4698_v11  ;;  %v4705_v39 = vrot.slane %v8780_v31, 5  ;;  %v7247_v56 = vld [vmem:[%s7358_s16 + $0x74] sm:$0x1] }
 0x12e   : > { %6514 = vmatmul.mubr.bf16.gmra.mrb[12].mxu1 %v7180_v30  ;;  %6741 = vmatprep.mubr.bf16.mxu0 %v5938_v34  ;;  %v7183_v30 = vld [vmem:[%s7358_s16 + $0x78] sm:$0xff]   ;;  %v5940_v34 = vcombine.low %v4615_v49, %v4618_v40  ;;  %v5951_v2 = vcombine.low %v8939_v27, %v8946_v46  ;;  %v8965_v49 = vsel %vm7636_vm5, %v4700_v12, %v4701_v36  ;;  %v2384_v40 = vrot.slane %v2382_v0, 4  ;;  %v7248_v0 = vld [vmem:[%s7358_s16 + $0x88] sm:$0xf] }
 0x12f   : > { %6517 = vmatprep.mubr.bf16.mxu1 %v7182_v52  ;;  %6787 = vmatpush3.bf16.msra.mxu1 %v7243_v21  ;;  %v7184_v52 = vld [vmem:[%s7358_s16 + $0x84] sm:$0xff]   ;;  %v4625_v60 = vsel %vm7636_vm5, %v4623_v28, %v4624_v33  ;;  %v7246_v21 = vld [vmem:[%s7358_s16 + $0x70] sm:$0xf]  ;;  %v5952_v28 = vcombine.low %v8960_v55, %v8965_v49  ;;  %v4707_v19 = vrot.slane %v4705_v39, 4  ;;  %v2439_v24 = vshll.u32 %v7248_v0, 16 }
 0x130   : > { %6780 = vmatprep.subr.bf16.mxu1 %v7245_v10  ;;  %v2391_v48 = vshll.u32 %v7246_v21, 16  ;;  %v2395_v47 = vshrl.u32 %v7246_v21, 16  ;;  %v5941_v6 = vcombine.low %v4622_v1, %v4625_v60  ;;  %v2401_v1 = vshll.u32 %v7247_v56, 16 }
 0x131   : > { %v8987_v11 = vsel %vm7636_vm5, %v4707_v19, %v4708_v23  ;;  %v2443_v21 = vshrl.u32 %v7248_v0, 16  ;;  %v7250_v19 = vld [vmem:[%s7358_s16 + $0xa0] sm:$0xf] }
 0x132   : > { %v8967_v14 = vrot.slane %v2391_v48, 5  ;;  %v2397_v33 = vrot.slane %v2395_v47, 4  ;;  %v2491_v56 = vshrl.u32 %v7250_v19, 16 }
 0x133   : > { %6788 = vmatpush3.bf16.msra.mxu1 %v7245_v10  ;;  %v5921_v10 = vrot.slane %v5905_v51, 9 }
 0x134   : > { %v2398_v31 = vor.u32 %v2397_v33, %v8967_v14  ;;  %v2457_v33 = vshll.u32 %v5603_v61, 16 }
 0x135   : > { %6742 = vmatmul.mubr.bf16.vlgmr.msra.gmra.mrb[0].mxu0 %v5939_v3  ;;  %v7186_v3 = vld [vmem:[%s7358_s16 + $0x9c] sm:$0xff]  }
 0x136   : > { %6518 = vmatmul.mubr.bf16.gmra.mrb[16].mxu1 %v7183_v30  ;;  %6745 = vmatprep.mubr.bf16.mxu0 %v5940_v34  ;;  %v5600_v30 = vld [vmem:[%s7358_s16 + $0x84] sm:$0xf]  ;;  %v8978_v34 = vsel %vm7636_vm5, %v5921_v10, %v4705_v39  ;;  %v2399_v47 = vrot.slane %v2398_v31, 4  ;;  %v7249_v10 = vld [vmem:[%s7358_s16 + $0x94] sm:$0xf]  ;;  %v2459_v0 = vrot.slane %v2457_v33, 5 }
 0x137   : > { %6521 = vmatprep.mubr.bf16.mxu1 %v7184_v52  ;;  %v2388_v52 = vor.u32 %v2387_v26, %v2384_v40  ;;  %v2430_v13 = vshrl.u32 %v5600_v30, 16  ;;  %v2433_v60 = vshll.u32 %v5600_v30, 16  ;;  %v5953_v48 = vcombine.low %v8978_v34, %v8987_v11 }
 0x138   : > { %v8996_v40 = vrot.slane %v2439_v24, 5  ;;  %v2445_v26 = vrot.slane %v2443_v21, 4  ;;  %v2463_v39 = vshll.u32 %v7249_v10, 16  ;;  %v2467_v23 = vshrl.u32 %v7249_v10, 16  ;;  %v7253_v10 = vld [vmem:[%s7358_s16 + $0xa4] sm:$0x1] }
 0x139   : > { %v2389_v36 = vrot.slane %v2388_v52, 4  ;;  %v2432_v12 = vrot.slane %v2430_v13, 4  ;;  %v2435_v51 = vrot.slane %v2433_v60, 5  ;;  %v2487_v52 = vshll.u32 %v7250_v19, 16  ;;  %v7254_v19 = vld [vmem:[%s7358_s16 + $0xac] sm:$0xf] }
 0x13a   : > { %v2446_v13 = vor.u32 %v2445_v26, %v8996_v40  ;;  %v9013_v41 = vrot.slane %v2463_v39, 5  ;;  %v2469_v42 = vrot.slane %v2467_v23, 4  ;;  %v2493_v21 = vrot.slane %v2491_v56, 4  ;;  %v5612_v23 = vld [vmem:[%s7358_s16 + $0xb4] sm:$0xf] }
 0x13b   : > { %v2497_v39 = vshll.u32 %v7253_v10, 16  ;;  %v2515_v15 = vshrl.u32 %v7254_v19, 16  ;;  %v2529_v63 = vshll.u32 %v5612_v23, 16 }
 0x13c   : > { %v2470_v26 = vor.u32 %v2469_v42, %v9013_v41 }
 0x13d   : > { %6746 = vmatmul.mubr.bf16.gmra.mrb[4].mxu0 %v5941_v6  ;;  %v5606_v6 = vld [vmem:[%s7358_s16 + $0x9c] sm:$0xf] }
 0x13e   : > { %6522 = vmatmul.mubr.bf16.gmra.mrb[20].mxu1 %v7185_v18  ;;  %6749 = vmatprep.mubr.bf16.mxu0 %v5942_v8  ;;  %v2403_v8 = vrot.slane %v2401_v1, 5  ;;  %v2454_v18 = vshrl.u32 %v5603_v61, 16  ;;  %v2481_v30 = vshll.u32 %v5606_v6, 16  ;;  %v2394_v1 = vsel %vm7390_vm2, %v2389_v36, %v8967_v14  ;;  %v7189_v61 = vld [vmem:[%s7358_s16 + $0xc0] sm:$0xff]  }
 0x13f   : > { %6525 = vmatprep.mubr.bf16.mxu1 %v7186_v3  ;;  %v2478_v3 = vshrl.u32 %v5606_v6, 16  ;;  %v9015_v14 = vrot.slane %v2487_v52, 5  ;;  %v2511_v52 = vshll.u32 %v7254_v19, 16 }
 0x140   : > { %v2404_v31 = vsel %vm7390_vm2, %v2399_v47, %v2403_v8  ;;  %v2456_v60 = vrot.slane %v2454_v18, 4  ;;  %v2483_v24 = vrot.slane %v2481_v30, 5  ;;  %v2451_v8 = vrot.slane %v2449_v20, 5  ;;  %v7255_v20 = vld [vmem:[%s7358_s16 + $0xb8] sm:$0xf] }
 0x141   : > { %v2447_v47 = vrot.slane %v2446_v13, 4  ;;  %v2494_v33 = vor.u32 %v2493_v21, %v9015_v14  ;;  %v2535_v29 = vshll.u32 %v7255_v20, 16  ;;  %v2539_v44 = vshrl.u32 %v7255_v20, 16 }
 0x143   : > { %v2495_v13 = vrot.slane %v2494_v33, 4 }
 0x145   : > { %6750 = vmatmul.mubr.bf16.gmra.mrb[8].mxu0 %v5943_v54  ;;  %v2436_v54 = vor.u32 %v2435_v51, %v2432_v12  ;;  %v2460_v12 = vor.u32 %v2459_v0, %v2456_v60  ;;  %v7252_v51 = vld [vmem:[%s7358_s16 + $0x98] sm:$0x1]  ;;  %v2499_v60 = vrot.slane %v2497_v39, 5 }
 0x146   : > { %6526 = vmatmul.mubr.bf16.gmra.mrb[24].mxu1 %v7187_v45  ;;  %6753 = vmatprep.mubr.bf16.mxu0 %v5944_v17  ;;  %v2480_v17 = vrot.slane %v2478_v3, 4  ;;  %v5642_v45 = vcombine.low %v2394_v1, %v2404_v31  ;;  %v2473_v6 = vshll.u32 %v7252_v51, 16  ;;  %v2526_v31 = vshrl.u32 %v5612_v23, 16 }
 0x147   : > { %6529 = vmatprep.mubr.bf16.mxu1 %v7188_v9  ;;  %v2437_v36 = vrot.slane %v2436_v54, 4  ;;  %v5609_v9 = vld [vmem:[%s7358_s16 + $0xa8] sm:$0xf]  ;;  %v2461_v56 = vrot.slane %v2460_v12, 4  ;;  %v2500_v32 = vsel %vm7390_vm2, %v2495_v13, %v2499_v60 }
 0x148   : > { %v2484_v18 = vor.u32 %v2483_v24, %v2480_v17  ;;  %v2502_v3 = vshrl.u32 %v5609_v9, 16  ;;  %v2505_v30 = vshll.u32 %v5609_v9, 16  ;;  %v2475_v1 = vrot.slane %v2473_v6, 5 }
 0x149   : > { %v2442_v43 = vsel %vm7390_vm2, %v2437_v36, %v8996_v40  ;;  %v2513_v17 = vrot.slane %v2511_v52, 5  ;;  %v2517_v24 = vrot.slane %v2515_v15, 4  ;;  %v2528_v21 = vrot.slane %v2526_v31, 4  ;;  %v5615_v36 = vld [vmem:[%s7358_s16 + $0xc0] sm:$0xf] }
 0x14a   : > { %v2485_v54 = vrot.slane %v2484_v18, 4  ;;  %v2504_v0 = vrot.slane %v2502_v3, 4  ;;  %v2507_v42 = vrot.slane %v2505_v30, 5  ;;  %v2550_v9 = vshrl.u32 %v5615_v36, 16  ;;  %v7257_v18 = vld [vmem:[%s7358_s16 + $0xc4] sm:$0xf] }
 0x14b   : > { %v2559_v33 = vshll.u32 %v7257_v18, 16 }
 0x14c   : > { %v2490_v51 = vsel %vm7390_vm2, %v2485_v54, %v9015_v14  ;;  %v2508_v5 = vor.u32 %v2507_v42, %v2504_v0  ;;  %v2563_v14 = vshrl.u32 %v7257_v18, 16  ;;  %v2552_v19 = vrot.slane %v2550_v9, 4 }
 0x14d   : > { %6754 = vmatmul.mubr.bf16.gmra.mrb[12].mxu0 %v5945_v38  ;;  %v2452_v38 = vsel %vm7390_vm2, %v2447_v47, %v2451_v8  ;;  %v2541_v8 = vrot.slane %v2539_v44, 4  ;;  %v2466_v47 = vsel %vm7390_vm2, %v2461_v56, %v9013_v41  ;;  %v7256_v41 = vld [vmem:[%s7358_s16 + $0xb0] sm:$0x1]  ;;  %v5646_v58 = vcombine.low %v2490_v51, %v2500_v32  ;;  %v7259_v44 = vld [vmem:[%s7358_s16 + $0xc8] sm:$0x1] }
 0x14e   : > { %6530 = vmatmul.mubr.bf16.gmra.mrb[28].mxu1 %v7189_v61  ;;  %6757 = vmatprep.mubr.bf16.mxu0 %v5946_v35  ;;  %v2471_v35 = vrot.slane %v2470_v26, 4  ;;  %v5644_v40 = vcombine.low %v2442_v43, %v2452_v38  ;;  %v2531_v61 = vrot.slane %v2529_v63, 5  ;;  %v2521_v6 = vshll.u32 %v7256_v41, 16 }
 0x14f   : > { %6565 = vmatprep.mubr.bf16.mxu1 %v5642_v45  ;;  %v2537_v45 = vrot.slane %v2535_v29, 5  ;;  %v2553_v26 = vshll.u32 %v5615_v36, 16  ;;  %v2509_v22 = vrot.slane %v2508_v5, 4  ;;  %v2561_v15 = vrot.slane %v2559_v33, 5 }
 0x150   : > { %v2476_v12 = vsel %vm7390_vm2, %v2471_v35, %v2475_v1  ;;  %v2532_v10 = vor.u32 %v2531_v61, %v2528_v21  ;;  %v2523_v30 = vrot.slane %v2521_v6, 5  ;;  %v2565_v43 = vrot.slane %v2563_v14, 4 }
 0x151   : > { %v2542_v39 = vor.u32 %v2541_v8, %v2537_v45  ;;  %v5645_v3 = vcombine.low %v2466_v47, %v2476_v12  ;;  %v2555_v52 = vrot.slane %v2553_v26, 5  ;;  %v2514_v31 = vsel %vm7390_vm2, %v2509_v22, %v2513_v17  ;;  %v9097_v8 = vld [vmem:[%s9168_s2] ss:$0 sm:$0xff] }
 0x152   : > { %v2533_v38 = vrot.slane %v2532_v10, 4  ;;  %v2566_v29 = vor.u32 %v2565_v43, %v2561_v15  ;;  %v2569_v35 = vshll.u32 %v7259_v44, 16 }
 0x153   : > { %v2543_v56 = vrot.slane %v2542_v39, 4  ;;  %v2556_v20 = vor.u32 %v2555_v52, %v2552_v19 }
 0x154   : > { %v2538_v4 = vsel %vm7390_vm2, %v2533_v38, %v2537_v45  ;;  %v2571_v54 = vrot.slane %v2569_v35, 5 }
 0x155   : > { %6758 = vmatmul.mubr.bf16.gmra.mrb[16].mxu0 %v5947_v62  ;;  %v2518_v62 = vor.u32 %v2517_v24, %v2513_v17  ;;  %v2557_v25 = vrot.slane %v2556_v20, 4 }
 0x156   : > { %6566 = vmatmul.mubr.bf16.vlgmr.msra.gmra.mrb[16].mxu1 %v8838_v50  ;;  %6761 = vmatprep.mubr.bf16.mxu0 %v5948_v59  ;;  %v7258_v50 = vld [vmem:[%s7358_s16 + $0xbc] sm:$0x1] }
 0x157   : > { %6569 = vmatprep.mubr.bf16.mxu1 %v5644_v40  ;;  %v2545_v23 = vshll.u32 %v7258_v50, 16  ;;  %v2519_v59 = vrot.slane %v2518_v62, 4  ;;  %v2562_v13 = vsel %vm7390_vm2, %v2557_v25, %v2561_v15 }
 0x159   : > { %v2547_v1 = vrot.slane %v2545_v23, 5  ;;  %v2524_v63 = vsel %vm7390_vm2, %v2519_v59, %v2523_v30 }
 0x15b   : > { %v2548_v57 = vsel %vm7390_vm2, %v2543_v56, %v2547_v1 }
 0x15c   : > { %v5648_v7 = vcombine.low %v2538_v4, %v2548_v57 }
 0x15d   : > { %6762 = vmatmul.mubr.bf16.gmra.mrb[20].mxu0 %v5949_v53  ;;  %v5647_v53 = vcombine.low %v2514_v31, %v2524_v63 }
 0x15e   : > { %6570 = vmatmul.mubr.bf16.gmra.mrb[20].mxu1 %v5645_v3  ;;  %6765 = vmatprep.mubr.bf16.mxu0 %v5950_v16  ;;  %v2567_v16 = vrot.slane %v2566_v29, 4 }
 0x15f   : > { %6573 = vmatprep.mubr.bf16.mxu1 %v5646_v58 }
 0x160   : > { %v2572_v60 = vsel %vm7390_vm2, %v2567_v16, %v2571_v54 }
 0x161   : > { %v5649_v0 = vcombine.low %v2562_v13, %v2572_v60 }
 0x165   : > { %6766 = vmatmul.mubr.bf16.gmra.mrb[24].mxu0 %v5951_v2 }
 0x166   : > { %6574 = vmatmul.mubr.bf16.gmra.mrb[24].mxu1 %v5647_v53  ;;  %6769 = vmatprep.mubr.bf16.mxu0 %v5952_v28 }
 0x167   : > { %6577 = vmatprep.mubr.bf16.mxu1 %v5648_v7 }
 0x16d   : > { %6770 = vmatmul.mubr.bf16.gmra.mrb[28].mxu0 %v5953_v48 }
 0x16e   : > { %6578 = vmatmul.mubr.bf16.gmra.mrb[28].mxu1 %v5649_v0 }
 0x1e9   : > { %v6503_v27 = vpop.f32.mrb[0].mxu1 }
 0x1ea   : > { %v1982_v46 = vpop.f32.mrb[1].mxu1 }
 0x1eb   : > { %v6504_v2 = vpop.f32.mrb[2].mxu1 }
 0x1ec   : > { %v1985_v42 = vpop.f32.mrb[3].mxu1 }
 0x1f1   : > { %v6507_v17 = vpop.f32.mrb[4].mxu1 }
 0x1f2   : > { %v1998_v55 = vpop.f32.mrb[5].mxu1 }
 0x1f3   : > { %v6508_v49 = vpop.f32.mrb[6].mxu1 }
 0x1f4   : > { %v2001_v28 = vpop.f32.mrb[7].mxu1 }
 0x1f9   : > { %v6511_v24 = vpop.f32.mrb[8].mxu1 }
 0x1fa   : > { %v2014_v40 = vpop.f32.mrb[9].mxu1 }
 0x1fb   : > { %v6512_v21 = vpop.f32.mrb[10].mxu1 }
 0x1fc   : > { %v2017_v61 = vpop.f32.mrb[11].mxu1 }
 0x201   : > { %v9086_v37 = vpop.f32.mrb[12].mxu1 }
 0x202   : > { %v9088_v45 = vpop.f32.mrb[13].mxu1 }
 0x203   : > { %v9090_v34 = vpop.f32.mrb[14].mxu1 }
 0x204   : > { %v9092_v11 = vpop.f32.mrb[15].mxu1 }
 0x208   : > { %v6743_v48 = vpop.f32.mrb[0].mxu0 }
 0x209   : > { %v6789_v36 = vadd.f32 %v6743_v48, %v6503_v27  ;;  %v4873_v47 = vpop.f32.mrb[1].mxu0 }
 0x20a   : > { %v6790_v12 = vadd.f32 %v4873_v47, %v1982_v46  ;;  %v6744_v51 = vpop.f32.mrb[2].mxu0 }
 0x20b   : > { %v5041_v32 = vadd.f32 %v6789_v36, %v9097_v8  ;;  %v6791_v5 = vadd.f32 %v6744_v51, %v6504_v2  ;;  %v4876_v62 = vpop.f32.mrb[3].mxu0 }
 0x20c   : > { %v5039_v41 = vadd.f32 %v6790_v12, %v9097_v8  ;;  %v6792_v6 = vadd.f32 %v4876_v62, %v1985_v42 }
 0x20d   : > { %v5042_v9 = vadd.f32 %v6791_v5, %v9097_v8  ;;  %v5073_v18 = vmax.f32 %v5041_v32, 0.0 }
 0x20e   : > { %v5040_v26 = vadd.f32 %v6792_v6, %v9097_v8  ;;  %v5071_v14 = vmax.f32 %v5039_v41, 0.0 }
 0x20f   : > { %v5074_v33 = vmax.f32 %v5042_v9, 0.0 }
 0x210   : > { %v5072_v10 = vmax.f32 %v5040_v26, 0.0  ;;  %v6747_v39 = vpop.f32.mrb[4].mxu0 }
 0x211   : > { %v6038_v50 = vpack.c.bf16 %v5074_v33, %v5073_v18  ;;  %v6793_v23 = vadd.f32 %v6747_v39, %v6507_v17  ;;  %v4889_v3 = vpop.f32.mrb[5].mxu0 }
 0x212   : > { %v6033_v58 = vpack.c.bf16 %v5072_v10, %v5071_v14  ;;  %v6794_v22 = vadd.f32 %v4889_v3, %v1998_v55  ;;  %v6748_v59 = vpop.f32.mrb[6].mxu0 }
 0x213   : > { %6110 = vst [vmem:[%s9107_s29 + $0x8] sm:$0xff] %v6038_v50   ;;  %v5045_v30 = vadd.f32 %v6793_v23, %v9097_v8  ;;  %v6795_v19 = vadd.f32 %v6748_v59, %v6508_v49  ;;  %v4892_v52 = vpop.f32.mrb[7].mxu0 }
 0x214   : > { %6034 = vst [vmem:[%s9107_s29] sm:$0xff] %v6033_v58   ;;  %v5043_v15 = vadd.f32 %v6794_v22, %v9097_v8  ;;  %v6796_v43 = vadd.f32 %v4892_v52, %v2001_v28 }
 0x215   : > { %v5046_v38 = vadd.f32 %v6795_v19, %v9097_v8  ;;  %v5077_v1 = vmax.f32 %v5045_v30, 0.0 }
 0x216   : > { %v5044_v56 = vadd.f32 %v6796_v43, %v9097_v8  ;;  %v5075_v63 = vmax.f32 %v5043_v15, 0.0 }
 0x217   : > { %v5078_v31 = vmax.f32 %v5046_v38, 0.0 }
 0x218   : > { %v5076_v20 = vmax.f32 %v5044_v56, 0.0  ;;  %v6751_v29 = vpop.f32.mrb[8].mxu0 }
 0x219   : > { %v6048_v44 = vpack.c.bf16 %v5078_v31, %v5077_v1  ;;  %v6797_v35 = vadd.f32 %v6751_v29, %v6511_v24  ;;  %v4905_v4 = vpop.f32.mrb[9].mxu0 }
 0x21a   : > { %v6043_v57 = vpack.c.bf16 %v5076_v20, %v5075_v63  ;;  %v6798_v53 = vadd.f32 %v4905_v4, %v2014_v40  ;;  %v6752_v7 = vpop.f32.mrb[10].mxu0 }
 0x21b   : > { %6112 = vst [vmem:[%s9107_s29 + $0x18] sm:$0xff] %v6048_v44   ;;  %v5049_v25 = vadd.f32 %v6797_v35, %v9097_v8  ;;  %v6799_v16 = vadd.f32 %v6752_v7, %v6512_v21  ;;  %v4908_v54 = vpop.f32.mrb[11].mxu0 }
 0x21c   : > { %6111 = vst [vmem:[%s9107_s29 + $0x10] sm:$0xff] %v6043_v57   ;;  %v5047_v13 = vadd.f32 %v6798_v53, %v9097_v8  ;;  %v6800_v60 = vadd.f32 %v4908_v54, %v2017_v61 }
 0x21d   : > { %v5050_v0 = vadd.f32 %v6799_v16, %v9097_v8  ;;  %v5081_v46 = vmax.f32 %v5049_v25, 0.0 }
 0x21e   : > { %v5048_v27 = vadd.f32 %v6800_v60, %v9097_v8  ;;  %v5079_v42 = vmax.f32 %v5047_v13, 0.0 }
 0x21f   : > { %v5082_v2 = vmax.f32 %v5050_v0, 0.0 }
 0x220   : > { %v5080_v17 = vmax.f32 %v5048_v27, 0.0  ;;  %v6755_v55 = vpop.f32.mrb[12].mxu0 }
 0x221   : > { %v6058_v49 = vpack.c.bf16 %v5082_v2, %v5081_v46  ;;  %v6801_v28 = vadd.f32 %v6755_v55, %v9086_v37  ;;  %v4921_v24 = vpop.f32.mrb[13].mxu0 }
 0x222   : > { %v6053_v40 = vpack.c.bf16 %v5080_v17, %v5079_v42  ;;  %v6802_v21 = vadd.f32 %v4921_v24, %v9088_v45  ;;  %v6756_v48 = vpop.f32.mrb[14].mxu0 }
 0x223   : > { %6114 = vst [vmem:[%s9107_s29 + $0x28] sm:$0xff] %v6058_v49   ;;  %v5053_v61 = vadd.f32 %v6801_v28, %v9097_v8  ;;  %v6803_v36 = vadd.f32 %v6756_v48, %v9090_v34  ;;  %v4924_v47 = vpop.f32.mrb[15].mxu0 }
 0x224   : > { %6113 = vst [vmem:[%s9107_s29 + $0x20] sm:$0xff] %v6053_v40   ;;  %v5051_v12 = vadd.f32 %v6802_v21, %v9097_v8  ;;  %v6804_v51 = vadd.f32 %v4924_v47, %v9092_v11 }
 0x225   : > { %v5054_v32 = vadd.f32 %v6803_v36, %v9097_v8  ;;  %v5085_v5 = vmax.f32 %v5053_v61, 0.0 }
 0x226   : > { %v5052_v37 = vadd.f32 %v6804_v51, %v9097_v8  ;;  %v5083_v62 = vmax.f32 %v5051_v12, 0.0 }
 0x227   : > { %v5086_v45 = vmax.f32 %v5054_v32, 0.0 }
 0x228   : > { %v5084_v41 = vmax.f32 %v5052_v37, 0.0  ;;  %v6759_v6 = vpop.f32.mrb[16].mxu0 }
 0x229   : > { %v6068_v9 = vpack.c.bf16 %v5086_v45, %v5085_v5  ;;  %v6567_v26 = vpop.f32.mrb[16].mxu1  ;;  %v4937_v34 = vpop.f32.mrb[17].mxu0 }
 0x22a   : > { %v6063_v18 = vpack.c.bf16 %v5084_v41, %v5083_v62  ;;  %v6805_v33 = vadd.f32 %v6759_v6, %v6567_v26  ;;  %v2800_v14 = vpop.f32.mrb[17].mxu1  ;;  %v6760_v10 = vpop.f32.mrb[18].mxu0 }
 0x22b   : > { %6116 = vst [vmem:[%s9107_s29 + $0x38] sm:$0xff] %v6068_v9   ;;  %v6806_v39 = vadd.f32 %v4937_v34, %v2800_v14  ;;  %v6568_v11 = vpop.f32.mrb[18].mxu1  ;;  %v4940_v50 = vpop.f32.mrb[19].mxu0 }
 0x22c   : > { %6115 = vst [vmem:[%s9107_s29 + $0x30] sm:$0xff] %v6063_v18   ;;  %v5057_v23 = vadd.f32 %v6805_v33, %v9097_v8  ;;  %v6807_v3 = vadd.f32 %v6760_v10, %v6568_v11  ;;  %v2803_v58 = vpop.f32.mrb[19].mxu1 }
 0x22d   : > { %v5055_v22 = vadd.f32 %v6806_v39, %v9097_v8  ;;  %v6808_v59 = vadd.f32 %v4940_v50, %v2803_v58 }
 0x22e   : > { %v5058_v30 = vadd.f32 %v6807_v3, %v9097_v8  ;;  %v5089_v52 = vmax.f32 %v5057_v23, 0.0 }
 0x22f   : > { %v5056_v19 = vadd.f32 %v6808_v59, %v9097_v8  ;;  %v5087_v38 = vmax.f32 %v5055_v22, 0.0 }
 0x230   : > { %v5090_v15 = vmax.f32 %v5058_v30, 0.0  ;;  %v6763_v43 = vpop.f32.mrb[20].mxu0 }
 0x231   : > { %v5088_v56 = vmax.f32 %v5056_v19, 0.0  ;;  %v6571_v1 = vpop.f32.mrb[20].mxu1  ;;  %v4953_v31 = vpop.f32.mrb[21].mxu0 }
 0x232   : > { %v6078_v63 = vpack.c.bf16 %v5090_v15, %v5089_v52  ;;  %v6809_v20 = vadd.f32 %v6763_v43, %v6571_v1  ;;  %v2816_v29 = vpop.f32.mrb[21].mxu1  ;;  %v6764_v44 = vpop.f32.mrb[22].mxu0 }
 0x233   : > { %v6073_v35 = vpack.c.bf16 %v5088_v56, %v5087_v38  ;;  %v6810_v4 = vadd.f32 %v4953_v31, %v2816_v29  ;;  %v6572_v57 = vpop.f32.mrb[22].mxu1  ;;  %v4956_v53 = vpop.f32.mrb[23].mxu0 }
 0x234   : > { %6118 = vst [vmem:[%s9107_s29 + $0x48] sm:$0xff] %v6078_v63   ;;  %v5061_v7 = vadd.f32 %v6809_v20, %v9097_v8  ;;  %v6811_v25 = vadd.f32 %v6764_v44, %v6572_v57  ;;  %v2819_v16 = vpop.f32.mrb[23].mxu1 }
 0x235   : > { %6117 = vst [vmem:[%s9107_s29 + $0x40] sm:$0xff] %v6073_v35   ;;  %v5059_v54 = vadd.f32 %v6810_v4, %v9097_v8  ;;  %v6812_v13 = vadd.f32 %v4956_v53, %v2819_v16 }
 0x236   : > { %v5062_v60 = vadd.f32 %v6811_v25, %v9097_v8  ;;  %v5093_v27 = vmax.f32 %v5061_v7, 0.0 }
 0x237   : > { %v5060_v0 = vadd.f32 %v6812_v13, %v9097_v8  ;;  %v5091_v42 = vmax.f32 %v5059_v54, 0.0 }
 0x238   : > { %v5094_v46 = vmax.f32 %v5062_v60, 0.0  ;;  %v6767_v2 = vpop.f32.mrb[24].mxu0 }
 0x239   : > { %v5092_v17 = vmax.f32 %v5060_v0, 0.0  ;;  %v6575_v55 = vpop.f32.mrb[24].mxu1  ;;  %v4969_v49 = vpop.f32.mrb[25].mxu0 }
 0x23a   : > { %v6088_v28 = vpack.c.bf16 %v5094_v46, %v5093_v27  ;;  %v6813_v24 = vadd.f32 %v6767_v2, %v6575_v55  ;;  %v2832_v40 = vpop.f32.mrb[25].mxu1  ;;  %v6768_v21 = vpop.f32.mrb[26].mxu0 }
 0x23b   : > { %v6083_v48 = vpack.c.bf16 %v5092_v17, %v5091_v42  ;;  %v6814_v61 = vadd.f32 %v4969_v49, %v2832_v40  ;;  %v6576_v36 = vpop.f32.mrb[26].mxu1  ;;  %v4972_v47 = vpop.f32.mrb[27].mxu0 }
 0x23c   : > { %6120 = vst [vmem:[%s9107_s29 + $0x58] sm:$0xff] %v6088_v28   ;;  %v5065_v12 = vadd.f32 %v6813_v24, %v9097_v8  ;;  %v6815_v51 = vadd.f32 %v6768_v21, %v6576_v36  ;;  %v2835_v32 = vpop.f32.mrb[27].mxu1 }
 0x23d   : > { %6119 = vst [vmem:[%s9107_s29 + $0x50] sm:$0xff] %v6083_v48   ;;  %v5063_v37 = vadd.f32 %v6814_v61, %v9097_v8  ;;  %v6816_v5 = vadd.f32 %v4972_v47, %v2835_v32 }
 0x23e   : > { %v5066_v45 = vadd.f32 %v6815_v51, %v9097_v8  ;;  %v5097_v41 = vmax.f32 %v5065_v12, 0.0 }
 0x23f   : > { %v5064_v62 = vadd.f32 %v6816_v5, %v9097_v8  ;;  %v5095_v26 = vmax.f32 %v5063_v37, 0.0 }
 0x240   : > { %v5098_v6 = vmax.f32 %v5066_v45, 0.0  ;;  %v6771_v9 = vpop.f32.mrb[28].mxu0 }
 0x241   : > { %v5096_v34 = vmax.f32 %v5064_v62, 0.0  ;;  %v6579_v18 = vpop.f32.mrb[28].mxu1  ;;  %v4985_v33 = vpop.f32.mrb[29].mxu0 }
 0x242   : > { %v6098_v14 = vpack.c.bf16 %v5098_v6, %v5097_v41  ;;  %v6817_v10 = vadd.f32 %v6771_v9, %v6579_v18  ;;  %v2848_v39 = vpop.f32.mrb[29].mxu1  ;;  %v6772_v11 = vpop.f32.mrb[30].mxu0 }
 0x243   : > { %v6093_v50 = vpack.c.bf16 %v5096_v34, %v5095_v26  ;;  %v6818_v23 = vadd.f32 %v4985_v33, %v2848_v39  ;;  %v6580_v3 = vpop.f32.mrb[30].mxu1  ;;  %v4988_v58 = vpop.f32.mrb[31].mxu0 }
 0x244   : > { %6122 = vst [vmem:[%s9107_s29 + $0x68] sm:$0xff] %v6098_v14   ;;  %v5069_v22 = vadd.f32 %v6817_v10, %v9097_v8  ;;  %v6819_v59 = vadd.f32 %v6772_v11, %v6580_v3  ;;  %v2851_v30 = vpop.f32.mrb[31].mxu1 }
 0x245   : > { %6121 = vst [vmem:[%s9107_s29 + $0x60] sm:$0xff] %v6093_v50   ;;  %v5067_v19 = vadd.f32 %v6818_v23, %v9097_v8  ;;  %v6820_v52 = vadd.f32 %v4988_v58, %v2851_v30 }
 0x246   : > { %v5070_v15 = vadd.f32 %v6819_v59, %v9097_v8  ;;  %v5101_v38 = vmax.f32 %v5069_v22, 0.0 }
 0x247   : > { %v5068_v43 = vadd.f32 %v6820_v52, %v9097_v8  ;;  %v5099_v1 = vmax.f32 %v5067_v19, 0.0 }
 0x248   : > { %v5102_v56 = vmax.f32 %v5070_v15, 0.0 }
 0x249   : > { %v5100_v31 = vmax.f32 %v5068_v43, 0.0 }
 0x24a   : > { %v6108_v63 = vpack.c.bf16 %v5102_v56, %v5101_v38 }
 0x24b   : > { %v6103_v20 = vpack.c.bf16 %v5100_v31, %v5099_v1 }
 0x24c   : > { %6124 = vst [vmem:[%s9107_s29 + $0x78] sm:$0xff] %v6108_v63  }
 0x24d   : > { %6123 = vst [vmem:[%s9107_s29 + $0x70] sm:$0xff] %v6103_v20  }
 0x24e PF: > { %s13_s14 = sadd.s32 1, %s7282_s14   ;;  %s9236_s12 = smov %s7278_s13 }
 0x24f   : > { %p10_p5 = scmp.ge.s32.totalorder %s13_s14, 4   ;;  %s9237_s13 = smov %s9239_s15 }
 0x251   :  { %12 = sbr.rel (!%p10_p5) target bundleno = 2 (0x2), region = 78 }

</bundles_post_ra>
